<compile_context>
chip_gen: v5e
topology: v5e:2x2
jax: 0.10.0
libtpu: 0.0.40
codegen_flags: <defaults>
</compile_context>

<pallas_src>
import functools

import jax
import jax.numpy as jnp
from jax import lax
from jax.experimental import pallas as pl
from jax.experimental.pallas import tpu as pltpu


def _lstm_recurrence_kernel(
    gx0_ref,     # (TC, BB, 4H) stream dtype (bf16/f32): x @ W_ih0^T, cols [i,f,o,g]
    w_hh0_ref,   # (H, 4H)  f32, cols [i,f,o,g]
    w_ih1_ref,   # (H, 4H)  f32, cols [i,f,o,g]
    w_hh1_ref,   # (H, 4H)  f32, cols [i,f,o,g]
    b0_ref,      # (1, 4H)  f32 : b_ih0 + b_hh0, cols [i,f,o,g]
    b1_ref,      # (1, 4H)  f32 : b_ih1 + b_hh1, cols [i,f,o,g]
    w_fc_ref,    # (1, H)   f32
    b_fc_ref,    # (1, 1)   f32
    out_ref,     # (BB, 1)  f32
    h0_ref, c0_ref, h1_ref, c1_ref,   # VMEM scratch, each (BB, H) f32
    *,
    hidden_size: int,
    time_chunk: int,
    seq_len: int,
    padded_len: int,
    precision,
):
    H = hidden_size
    TC = time_chunk
    BB = out_ref.shape[0]
    t_blk = pl.program_id(1)
    needs_tail_guard = padded_len != seq_len   # static

    # Reset state at the start of each batch block's time sweep.
    @pl.when(t_blk == 0)
    def _():
        z = jnp.zeros((BB, H), dtype=jnp.float32)
        h0_ref[...] = z
        c0_ref[...] = z
        h1_ref[...] = z
        c1_ref[...] = z

    # Hoist weight loads and bias broadcasts out of the unrolled loop
    # (JAX does not CSE broadcasts inside loops).
    w_hh0 = w_hh0_ref[...]
    w_ih1 = w_ih1_ref[...]
    w_hh1 = w_hh1_ref[...]
    b0 = jnp.broadcast_to(b0_ref[...], (BB, 4 * H))
    b1 = jnp.broadcast_to(b1_ref[...], (BB, 4 * H))

    def activate(gates):
        # Columns are pre-permuted to [i, f, o, g]:
        #   sigmoid on the first 3H lanes, tanh only on the last H lanes.
        sfo = jax.nn.sigmoid(gates[:, : 3 * H])
        g = jnp.tanh(gates[:, 3 * H:])
        i = sfo[:, 0 * H:1 * H]
        f = sfo[:, 1 * H:2 * H]
        o = sfo[:, 2 * H:3 * H]
        return i, f, o, g

    t_base = t_blk * TC

    def step(tt, carry):
        h0, c0, h1, c1 = carry
        # Streamed pre-projected input gates (bf16 on the wire), upcast to f32.
        gx_t = gx0_ref[tt].astype(jnp.float32)                       # (BB, 4H)
        # layer 0: only the recurrent matmul is on the serial chain
        gates0 = gx_t + b0 + jnp.dot(
            h0, w_hh0, preferred_element_type=jnp.float32, precision=precision)
        i0, f0, o0, g0 = activate(gates0)
        c0n = f0 * c0 + i0 * g0
        h0n = o0 * jnp.tanh(c0n)
        # layer 1: two accumulating dots (no per-step concat copy);
        # dropout = identity in eval mode.
        gates1 = (
            jnp.dot(h0n, w_ih1, preferred_element_type=jnp.float32,
                    precision=precision)
            + jnp.dot(h1, w_hh1, preferred_element_type=jnp.float32,
                      precision=precision)
            + b1)
        i1, f1, o1, g1 = activate(gates1)
        c1n = f1 * c1 + i1 * g1
        h1n = o1 * jnp.tanh(c1n)
        if needs_tail_guard:
            # Padded timesteps must leave the carried state untouched.
            valid = (t_base + tt) < seq_len
            h0n = jnp.where(valid, h0n, h0)
            c0n = jnp.where(valid, c0n, c0)
            h1n = jnp.where(valid, h1n, h1)
            c1n = jnp.where(valid, c1n, c1)
        return h0n, c0n, h1n, c1n

    carry0 = (h0_ref[...], c0_ref[...], h1_ref[...], c1_ref[...])
    h0, c0, h1, c1 = lax.fori_loop(0, TC, step, carry0, unroll=True)
    h0_ref[...] = h0
    c0_ref[...] = c0
    h1_ref[...] = h1
    c1_ref[...] = c1

    # Final classifier head: (B,H)@(H,1) done as a VPU multiply + lane reduction
    # (avoids an N=1 MXU pass); single 1-lane store, once per batch block.
    @pl.when(t_blk == pl.num_programs(1) - 1)
    def _():
        logits = jnp.sum(h1 * w_fc_ref[...], axis=-1, keepdims=True) + b_fc_ref[...]
        out_ref[...] = jax.nn.sigmoid(logits)


def _reorder_gate_cols(w, hidden_size):
    """Permute the last axis from PyTorch's [i, f, g, o] blocks to [i, f, o, g]."""
    H = hidden_size
    return jnp.concatenate(
        [w[..., : 2 * H], w[..., 3 * H: 4 * H], w[..., 2 * H: 3 * H]], axis=-1)


def lstm_classifier_forward(x, params, *, hidden_size, time_chunk=16,
                            batch_block=128, stream_bf16=True, precision=None):
    """x: (B, T, I) float32 (batch_first, like PyTorch). Returns (B,) probabilities."""
    B, T, I = x.shape
    H = hidden_size
    stream_dtype = jnp.bfloat16 if stream_bf16 else jnp.float32

    # ---- batch tiling: pad to a sublane multiple (8) and tile in blocks ----
    B8 = max(8, -(-B // 8) * 8)
    BB = min(batch_block, B8)
    B_pad = -(-B8 // BB) * BB
    if B_pad != B:
        x = jnp.pad(x, ((0, B_pad - B), (0, 0), (0, 0)))

    # ---- time chunking: fixed chunk, tail handled in-kernel (no divisor fallback) ----
    TC = min(time_chunk, T)
    nt = -(-T // TC)
    T_pad = nt * TC
    nb = B_pad // BB

    # ---- weights, gate columns reordered once to [i, f, o, g] ----
    w_ih0_t = _reorder_gate_cols(params["w_ih0"].T, H).astype(jnp.float32)   # (I, 4H)
    w_hh0_t = _reorder_gate_cols(params["w_hh0"].T, H).astype(jnp.float32)   # (H, 4H)
    w_ih1_t = _reorder_gate_cols(params["w_ih1"].T, H).astype(jnp.float32)   # (H, 4H)
    w_hh1_t = _reorder_gate_cols(params["w_hh1"].T, H).astype(jnp.float32)   # (H, 4H)
    b0 = _reorder_gate_cols(params["b_ih0"] + params["b_hh0"], H)
    b0 = b0.reshape(1, 4 * H).astype(jnp.float32)
    b1 = _reorder_gate_cols(params["b_ih1"] + params["b_hh1"], H)
    b1 = b1.reshape(1, 4 * H).astype(jnp.float32)
    w_fc_row = params["w_fc"].reshape(1, H).astype(jnp.float32)              # (1, H)
    b_fc = params["b_fc"].reshape(1, 1).astype(jnp.float32)                  # (1, 1)

    # ---- hoist the layer-0 input projection out of the recurrence ----
    # One big matmul (f32 operands; MXU-native on TPU), emitted time-major,
    # then cast to the stream dtype (bf16 by default) to halve HBM traffic.
    # Bias is NOT folded here — it is added in f32 inside the kernel.
    gx0 = jnp.einsum("bti,ig->tbg", x.astype(jnp.float32), w_ih0_t,
                     preferred_element_type=jnp.float32, precision=precision)
    gx0 = gx0.astype(stream_dtype)                                           # (T, B_pad, 4H)
    if T_pad != T:
        gx0 = jnp.pad(gx0, ((0, T_pad - T), (0, 0), (0, 0)))

    kernel = functools.partial(
        _lstm_recurrence_kernel,
        hidden_size=H, time_chunk=TC, seq_len=T, padded_len=T_pad,
        precision=precision)

    out = pl.pallas_call(
        kernel,
        out_shape=jax.ShapeDtypeStruct((B_pad, 1), jnp.float32),
        grid_spec=pltpu.PrefetchScalarGridSpec(
            num_scalar_prefetch=0,
            grid=(nb, nt),
            in_specs=[
                pl.BlockSpec((TC, BB, 4 * H), lambda b, t: (t, b, 0)),  # streamed gates
                pl.BlockSpec((H, 4 * H), lambda b, t: (0, 0)),
                pl.BlockSpec((H, 4 * H), lambda b, t: (0, 0)),
                pl.BlockSpec((H, 4 * H), lambda b, t: (0, 0)),
                pl.BlockSpec((1, 4 * H), lambda b, t: (0, 0)),
                pl.BlockSpec((1, 4 * H), lambda b, t: (0, 0)),
                pl.BlockSpec((1, H), lambda b, t: (0, 0)),
                pl.BlockSpec((1, 1), lambda b, t: (0, 0)),
            ],
            out_specs=pl.BlockSpec((BB, 1), lambda b, t: (b, 0)),
            scratch_shapes=[pltpu.VMEM((BB, H), jnp.float32)] * 4,
        ),
        compiler_params=pltpu.CompilerParams(
            dimension_semantics=("parallel", "arbitrary"),  # batch across cores, time serial
            vmem_limit_bytes=32 * 1024 * 1024,              # safe on every generation
        ),
    )(gx0, w_hh0_t, w_ih1_t, w_hh1_t, b0, b1, w_fc_row, b_fc)

    # matches torch .squeeze() for B > 1 (for B == 1 torch returns a 0-d tensor)
    return out[:B, 0]


def _lstm_classifier_reference(x, params, *, hidden_size):
    """Pure-JAX f32 reference of the PyTorch forward (eval mode)."""
    H = hidden_size
    B, T, _ = x.shape

    def cell(x_t, h, c, w_ih, w_hh, b_ih, b_hh):
        gates = x_t @ w_ih.T + h @ w_hh.T + b_ih + b_hh
        i = jax.nn.sigmoid(gates[:, 0 * H:1 * H])
        f = jax.nn.sigmoid(gates[:, 1 * H:2 * H])
        g = jnp.tanh(gates[:, 2 * H:3 * H])
        o = jax.nn.sigmoid(gates[:, 3 * H:4 * H])
        c = f * c + i * g
        h = o * jnp.tanh(c)
        return h, c

    h0 = c0 = h1 = c1 = jnp.zeros((B, H), jnp.float32)
    for t in range(T):
        h0, c0 = cell(x[:, t], h0, c0, params["w_ih0"], params["w_hh0"],
                      params["b_ih0"], params["b_hh0"])
        h1, c1 = cell(h0, h1, c1, params["w_ih1"], params["w_hh1"],
                      params["b_ih1"], params["b_hh1"])
    logits = h1 @ params["w_fc"].T + params["b_fc"]
    return jax.nn.sigmoid(logits)[:, 0]


def init_params(key, input_size, hidden_size):
    """Deterministic init mimicking nn.LSTM / nn.Linear U(-1/sqrt(H), 1/sqrt(H))."""
    H = hidden_size
    bound = 1.0 / jnp.sqrt(jnp.float32(H))
    keys = jax.random.split(key, 10)

    def u(k, shape):
        return jax.random.uniform(k, shape, jnp.float32, -bound, bound)

    return {
        "w_ih0": u(keys[0], (4 * H, input_size)),
        "w_hh0": u(keys[1], (4 * H, H)),
        "b_ih0": u(keys[2], (4 * H,)),
        "b_hh0": u(keys[3], (4 * H,)),
        "w_ih1": u(keys[4], (4 * H, H)),
        "w_hh1": u(keys[5], (4 * H, H)),
        "b_ih1": u(keys[6], (4 * H,)),
        "b_hh1": u(keys[7], (4 * H,)),
        "w_fc": u(keys[8], (1, H)),
        "b_fc": u(keys[9], (1,)),
    }


if __name__ == "__main__":
    B, T, I, H = 4, 8, 8, 32

    key = jax.random.PRNGKey(0)
    k_x, k_p = jax.random.split(key)
    x = jax.random.normal(k_x, (B, T, I), dtype=jnp.float32)
    params = init_params(k_p, input_size=I, hidden_size=H)

    ref = jax.block_until_ready(_lstm_classifier_reference(x, params, hidden_size=H))

    # Strict path: f32 stream + highest matmul precision; tracks the reference closely.
    out_strict = lstm_classifier_forward(
        x, params, hidden_size=H, stream_bf16=False,
        precision=lax.Precision.HIGHEST)
    out_strict = jax.block_until_ready(out_strict)
    assert out_strict.shape == (B,), out_strict.shape
    assert bool(jnp.all(jnp.isfinite(out_strict)))
    assert bool(jnp.allclose(out_strict, ref, atol=5e-3, rtol=5e-3)), (out_strict, ref)

    # Default perf path: bf16-streamed gates, default (MXU-native) matmul precision.
    out = lstm_classifier_forward(x, params, hidden_size=H)
    out = jax.block_until_ready(out)
    assert out.shape == (B,), out.shape
    assert bool(jnp.all(jnp.isfinite(out)))
    assert bool(jnp.all((out >= 0.0) & (out <= 1.0)))
    assert bool(jnp.allclose(out, ref, atol=5e-2, rtol=5e-2)), (out, ref)

    print("KERNEL_OK")
</pallas_src>

<mosaic_0001>
module attributes {stable_mosaic.version = 11 : i64} {
  func.func @_lstm_recurrence_kernel(%arg0: i32, %arg1: i32, %arg2: memref<8x8x128xf32, #tpu.memory_space<vmem>>, %arg3: memref<32x128xf32, #tpu.memory_space<vmem>>, %arg4: memref<32x128xf32, #tpu.memory_space<vmem>>, %arg5: memref<32x128xf32, #tpu.memory_space<vmem>>, %arg6: memref<1x128xf32, #tpu.memory_space<vmem>>, %arg7: memref<1x128xf32, #tpu.memory_space<vmem>>, %arg8: memref<1x32xf32, #tpu.memory_space<vmem>>, %arg9: memref<1x1xf32, #tpu.memory_space<vmem>>, %arg10: memref<8x1xf32, #tpu.memory_space<vmem>>, %arg11: memref<8x32xf32, #tpu.memory_space<vmem>>, %arg12: memref<8x32xf32, #tpu.memory_space<vmem>>, %arg13: memref<8x32xf32, #tpu.memory_space<vmem>>, %arg14: memref<8x32xf32, #tpu.memory_space<vmem>>) attributes {dimension_semantics = [#tpu.dimension_semantics<parallel>, #tpu.dimension_semantics<arbitrary>], iteration_bounds = array<i64: 1, 1>, scalar_prefetch = 0 : i64, scratch_operands = 4 : i64, tpu.core_type = #tpu.core_type<tc>, window_params = [{transform_indices = @transform_0, window_bounds = array<i64: 8, 8, 128>}, {pipeline_mode = #tpu.pipeline_mode<synchronous>, transform_indices = @transform_1, window_bounds = array<i64: 32, 128>}, {pipeline_mode = #tpu.pipeline_mode<synchronous>, transform_indices = @transform_2, window_bounds = array<i64: 32, 128>}, {pipeline_mode = #tpu.pipeline_mode<synchronous>, transform_indices = @transform_3, window_bounds = array<i64: 32, 128>}, {pipeline_mode = #tpu.pipeline_mode<synchronous>, transform_indices = @transform_4, window_bounds = array<i64: 1, 128>}, {pipeline_mode = #tpu.pipeline_mode<synchronous>, transform_indices = @transform_5, window_bounds = array<i64: 1, 128>}, {pipeline_mode = #tpu.pipeline_mode<synchronous>, transform_indices = @transform_6, window_bounds = array<i64: 1, 32>}, {pipeline_mode = #tpu.pipeline_mode<synchronous>, transform_indices = @transform_7, window_bounds = array<i64: 1, 1>}, {transform_indices = @transform_8, window_bounds = array<i64: 8, 1>}]} {
    %c0_i32 = arith.constant 0 : i32
    %0 = arith.cmpi eq, %arg1, %c0_i32 : i32
    %1 = arith.extui %0 : i1 to i32
    %c0_i32_0 = arith.constant 0 : i32
    %2 = arith.cmpi ne, %1, %c0_i32_0 : i32
    scf.if %2 {
      %cst_84 = arith.constant 0.000000e+00 : f32
      %359 = vector.broadcast %cst_84 : f32 to vector<8x32xf32>
      %c0_85 = arith.constant 0 : index
      %c0_86 = arith.constant 0 : index
      %360 = vector.load %arg11[%c0_85, %c0_86] : memref<8x32xf32, #tpu.memory_space<vmem>>, vector<8x32xf32>
      tpu.vector_store %arg11[%c0_85, %c0_86], %359 {strides = array<i32>} : memref<8x32xf32, #tpu.memory_space<vmem>>, vector<8x32xf32>,
      %c0_87 = arith.constant 0 : index
      %c0_88 = arith.constant 0 : index
      %361 = vector.load %arg12[%c0_87, %c0_88] : memref<8x32xf32, #tpu.memory_space<vmem>>, vector<8x32xf32>
      tpu.vector_store %arg12[%c0_87, %c0_88], %359 {strides = array<i32>} : memref<8x32xf32, #tpu.memory_space<vmem>>, vector<8x32xf32>,
      %c0_89 = arith.constant 0 : index
      %c0_90 = arith.constant 0 : index
      %362 = vector.load %arg13[%c0_89, %c0_90] : memref<8x32xf32, #tpu.memory_space<vmem>>, vector<8x32xf32>
      tpu.vector_store %arg13[%c0_89, %c0_90], %359 {strides = array<i32>} : memref<8x32xf32, #tpu.memory_space<vmem>>, vector<8x32xf32>,
      %c0_91 = arith.constant 0 : index
      %c0_92 = arith.constant 0 : index
      %363 = vector.load %arg14[%c0_91, %c0_92] : memref<8x32xf32, #tpu.memory_space<vmem>>, vector<8x32xf32>
      tpu.vector_store %arg14[%c0_91, %c0_92], %359 {strides = array<i32>} : memref<8x32xf32, #tpu.memory_space<vmem>>, vector<8x32xf32>,
    } else {
    }
    %c0 = arith.constant 0 : index
    %c0_1 = arith.constant 0 : index
    %3 = vector.load %arg3[%c0, %c0_1] : memref<32x128xf32, #tpu.memory_space<vmem>>, vector<32x128xf32>
    %c0_2 = arith.constant 0 : index
    %c0_3 = arith.constant 0 : index
    %4 = vector.load %arg4[%c0_2, %c0_3] : memref<32x128xf32, #tpu.memory_space<vmem>>, vector<32x128xf32>
    %c0_4 = arith.constant 0 : index
    %c0_5 = arith.constant 0 : index
    %5 = vector.load %arg5[%c0_4, %c0_5] : memref<32x128xf32, #tpu.memory_space<vmem>>, vector<32x128xf32>
    %c0_6 = arith.constant 0 : index
    %c0_7 = arith.constant 0 : index
    %6 = vector.load %arg6[%c0_6, %c0_7] : memref<1x128xf32, #tpu.memory_space<vmem>>, vector<1x128xf32>
    %7 = vector.shape_cast %6 : vector<1x128xf32> to vector<1x128xf32>
    %8 = vector.broadcast %7 : vector<1x128xf32> to vector<8x128xf32>
    %c0_8 = arith.constant 0 : index
    %c0_9 = arith.constant 0 : index
    %9 = vector.load %arg7[%c0_8, %c0_9] : memref<1x128xf32, #tpu.memory_space<vmem>>, vector<1x128xf32>
    %10 = vector.shape_cast %9 : vector<1x128xf32> to vector<1x128xf32>
    %11 = vector.broadcast %10 : vector<1x128xf32> to vector<8x128xf32>
    %c0_10 = arith.constant 0 : index
    %c0_11 = arith.constant 0 : index
    %12 = vector.load %arg11[%c0_10, %c0_11] : memref<8x32xf32, #tpu.memory_space<vmem>>, vector<8x32xf32>
    %c0_12 = arith.constant 0 : index
    %c0_13 = arith.constant 0 : index
    %13 = vector.load %arg12[%c0_12, %c0_13] : memref<8x32xf32, #tpu.memory_space<vmem>>, vector<8x32xf32>
    %c0_14 = arith.constant 0 : index
    %c0_15 = arith.constant 0 : index
    %14 = vector.load %arg13[%c0_14, %c0_15] : memref<8x32xf32, #tpu.memory_space<vmem>>, vector<8x32xf32>
    %c0_16 = arith.constant 0 : index
    %c0_17 = arith.constant 0 : index
    %15 = vector.load %arg14[%c0_16, %c0_17] : memref<8x32xf32, #tpu.memory_space<vmem>>, vector<8x32xf32>
    %c0_i32_18 = arith.constant 0 : i32
    %16 = arith.index_cast %c0_i32_18 : i32 to index
    %c0_19 = arith.constant 0 : index
    %c0_20 = arith.constant 0 : index
    %17 = vector.load %arg2[%16, %c0_19, %c0_20] : memref<8x8x128xf32, #tpu.memory_space<vmem>>, vector<1x8x128xf32>
    %18 = vector.shape_cast %17 : vector<1x8x128xf32> to vector<8x128xf32>
    %19 = arith.addf %18, %8 : vector<8x128xf32>
    %cst = arith.constant dense<0.000000e+00> : vector<8x128xf32>
    %20 = tpu.matmul %12, %3, %cst {dimension_numbers = #tpu.dot_dimension_numbers<[1], [0], [0], [1], [0, 0, 1, 1], [], []>, precision = #tpu.contract_precision<fp32>} : vector<8x32xf32>, vector<32x128xf32>, vector<8x128xf32> -> vector<8x128xf32>
    %21 = arith.addf %19, %20 : vector<8x128xf32>
    %22 = vector.extract_strided_slice %21 {offsets = [0, 0], sizes = [8, 96], strides = [1, 1]} : vector<8x128xf32> to vector<8x96xf32>
    %23 = arith.negf %22 : vector<8x96xf32>
    %24 = math.exp %23 : vector<8x96xf32>
    %cst_21 = arith.constant 1.000000e+00 : f32
    %25 = vector.broadcast %cst_21 : f32 to vector<8x96xf32>
    %26 = arith.addf %25, %24 : vector<8x96xf32>
    %27 = arith.divf %25, %26 : vector<8x96xf32>
    %28 = vector.extract_strided_slice %21 {offsets = [0, 96], sizes = [8, 32], strides = [1, 1]} : vector<8x128xf32> to vector<8x32xf32>
    %29 = math.tanh %28 : vector<8x32xf32>
    %30 = vector.extract_strided_slice %27 {offsets = [0, 0], sizes = [8, 32], strides = [1, 1]} : vector<8x96xf32> to vector<8x32xf32>
    %31 = vector.extract_strided_slice %27 {offsets = [0, 32], sizes = [8, 32], strides = [1, 1]} : vector<8x96xf32> to vector<8x32xf32>
    %32 = vector.extract_strided_slice %27 {offsets = [0, 64], sizes = [8, 32], strides = [1, 1]} : vector<8x96xf32> to vector<8x32xf32>
    %33 = arith.mulf %31, %13 : vector<8x32xf32>
    %34 = arith.mulf %30, %29 : vector<8x32xf32>
    %35 = arith.addf %33, %34 : vector<8x32xf32>
    %36 = math.tanh %35 : vector<8x32xf32>
    %37 = arith.mulf %32, %36 : vector<8x32xf32>
    %cst_22 = arith.constant dense<0.000000e+00> : vector<8x128xf32>
    %38 = tpu.matmul %37, %4, %cst_22 {dimension_numbers = #tpu.dot_dimension_numbers<[1], [0], [0], [1], [0, 0, 1, 1], [], []>, precision = #tpu.contract_precision<fp32>} : vector<8x32xf32>, vector<32x128xf32>, vector<8x128xf32> -> vector<8x128xf32>
    %cst_23 = arith.constant dense<0.000000e+00> : vector<8x128xf32>
    %39 = tpu.matmul %14, %5, %cst_23 {dimension_numbers = #tpu.dot_dimension_numbers<[1], [0], [0], [1], [0, 0, 1, 1], [], []>, precision = #tpu.contract_precision<fp32>} : vector<8x32xf32>, vector<32x128xf32>, vector<8x128xf32> -> vector<8x128xf32>
    %40 = arith.addf %38, %39 : vector<8x128xf32>
    %41 = arith.addf %40, %11 : vector<8x128xf32>
    %42 = vector.extract_strided_slice %41 {offsets = [0, 0], sizes = [8, 96], strides = [1, 1]} : vector<8x128xf32> to vector<8x96xf32>
    %43 = arith.negf %42 : vector<8x96xf32>
    %44 = math.exp %43 : vector<8x96xf32>
    %cst_24 = arith.constant 1.000000e+00 : f32
    %45 = vector.broadcast %cst_24 : f32 to vector<8x96xf32>
    %46 = arith.addf %45, %44 : vector<8x96xf32>
    %47 = arith.divf %45, %46 : vector<8x96xf32>
    %48 = vector.extract_strided_slice %41 {offsets = [0, 96], sizes = [8, 32], strides = [1, 1]} : vector<8x128xf32> to vector<8x32xf32>
    %49 = math.tanh %48 : vector<8x32xf32>
    %50 = vector.extract_strided_slice %47 {offsets = [0, 0], sizes = [8, 32], strides = [1, 1]} : vector<8x96xf32> to vector<8x32xf32>
    %51 = vector.extract_strided_slice %47 {offsets = [0, 32], sizes = [8, 32], strides = [1, 1]} : vector<8x96xf32> to vector<8x32xf32>
    %52 = vector.extract_strided_slice %47 {offsets = [0, 64], sizes = [8, 32], strides = [1, 1]} : vector<8x96xf32> to vector<8x32xf32>
    %53 = arith.mulf %51, %15 : vector<8x32xf32>
    %54 = arith.mulf %50, %49 : vector<8x32xf32>
    %55 = arith.addf %53, %54 : vector<8x32xf32>
    %56 = math.tanh %55 : vector<8x32xf32>
    %57 = arith.mulf %52, %56 : vector<8x32xf32>
    %c1_i32 = arith.constant 1 : i32
    %58 = arith.index_cast %c1_i32 : i32 to index
    %c0_25 = arith.constant 0 : index
    %c0_26 = arith.constant 0 : index
    %59 = vector.load %arg2[%58, %c0_25, %c0_26] : memref<8x8x128xf32, #tpu.memory_space<vmem>>, vector<1x8x128xf32>
    %60 = vector.shape_cast %59 : vector<1x8x128xf32> to vector<8x128xf32>
    %61 = arith.addf %60, %8 : vector<8x128xf32>
    %cst_27 = arith.constant dense<0.000000e+00> : vector<8x128xf32>
    %62 = tpu.matmul %37, %3, %cst_27 {dimension_numbers = #tpu.dot_dimension_numbers<[1], [0], [0], [1], [0, 0, 1, 1], [], []>, precision = #tpu.contract_precision<fp32>} : vector<8x32xf32>, vector<32x128xf32>, vector<8x128xf32> -> vector<8x128xf32>
    %63 = arith.addf %61, %62 : vector<8x128xf32>
    %64 = vector.extract_strided_slice %63 {offsets = [0, 0], sizes = [8, 96], strides = [1, 1]} : vector<8x128xf32> to vector<8x96xf32>
    %65 = arith.negf %64 : vector<8x96xf32>
    %66 = math.exp %65 : vector<8x96xf32>
    %cst_28 = arith.constant 1.000000e+00 : f32
    %67 = vector.broadcast %cst_28 : f32 to vector<8x96xf32>
    %68 = arith.addf %67, %66 : vector<8x96xf32>
    %69 = arith.divf %67, %68 : vector<8x96xf32>
    %70 = vector.extract_strided_slice %63 {offsets = [0, 96], sizes = [8, 32], strides = [1, 1]} : vector<8x128xf32> to vector<8x32xf32>
    %71 = math.tanh %70 : vector<8x32xf32>
    %72 = vector.extract_strided_slice %69 {offsets = [0, 0], sizes = [8, 32], strides = [1, 1]} : vector<8x96xf32> to vector<8x32xf32>
    %73 = vector.extract_strided_slice %69 {offsets = [0, 32], sizes = [8, 32], strides = [1, 1]} : vector<8x96xf32> to vector<8x32xf32>
    %74 = vector.extract_strided_slice %69 {offsets = [0, 64], sizes = [8, 32], strides = [1, 1]} : vector<8x96xf32> to vector<8x32xf32>
    %75 = arith.mulf %73, %35 : vector<8x32xf32>
    %76 = arith.mulf %72, %71 : vector<8x32xf32>
    %77 = arith.addf %75, %76 : vector<8x32xf32>
    %78 = math.tanh %77 : vector<8x32xf32>
    %79 = arith.mulf %74, %78 : vector<8x32xf32>
    %cst_29 = arith.constant dense<0.000000e+00> : vector<8x128xf32>
    %80 = tpu.matmul %79, %4, %cst_29 {dimension_numbers = #tpu.dot_dimension_numbers<[1], [0], [0], [1], [0, 0, 1, 1], [], []>, precision = #tpu.contract_precision<fp32>} : vector<8x32xf32>, vector<32x128xf32>, vector<8x128xf32> -> vector<8x128xf32>
    %cst_30 = arith.constant dense<0.000000e+00> : vector<8x128xf32>
    %81 = tpu.matmul %57, %5, %cst_30 {dimension_numbers = #tpu.dot_dimension_numbers<[1], [0], [0], [1], [0, 0, 1, 1], [], []>, precision = #tpu.contract_precision<fp32>} : vector<8x32xf32>, vector<32x128xf32>, vector<8x128xf32> -> vector<8x128xf32>
    %82 = arith.addf %80, %81 : vector<8x128xf32>
    %83 = arith.addf %82, %11 : vector<8x128xf32>
    %84 = vector.extract_strided_slice %83 {offsets = [0, 0], sizes = [8, 96], strides = [1, 1]} : vector<8x128xf32> to vector<8x96xf32>
    %85 = arith.negf %84 : vector<8x96xf32>
    %86 = math.exp %85 : vector<8x96xf32>
    %cst_31 = arith.constant 1.000000e+00 : f32
    %87 = vector.broadcast %cst_31 : f32 to vector<8x96xf32>
    %88 = arith.addf %87, %86 : vector<8x96xf32>
    %89 = arith.divf %87, %88 : vector<8x96xf32>
    %90 = vector.extract_strided_slice %83 {offsets = [0, 96], sizes = [8, 32], strides = [1, 1]} : vector<8x128xf32> to vector<8x32xf32>
    %91 = math.tanh %90 : vector<8x32xf32>
    %92 = vector.extract_strided_slice %89 {offsets = [0, 0], sizes = [8, 32], strides = [1, 1]} : vector<8x96xf32> to vector<8x32xf32>
    %93 = vector.extract_strided_slice %89 {offsets = [0, 32], sizes = [8, 32], strides = [1, 1]} : vector<8x96xf32> to vector<8x32xf32>
    %94 = vector.extract_strided_slice %89 {offsets = [0, 64], sizes = [8, 32], strides = [1, 1]} : vector<8x96xf32> to vector<8x32xf32>
    %95 = arith.mulf %93, %55 : vector<8x32xf32>
    %96 = arith.mulf %92, %91 : vector<8x32xf32>
    %97 = arith.addf %95, %96 : vector<8x32xf32>
    %98 = math.tanh %97 : vector<8x32xf32>
    %99 = arith.mulf %94, %98 : vector<8x32xf32>
    %c2_i32 = arith.constant 2 : i32
    %100 = arith.index_cast %c2_i32 : i32 to index
    %c0_32 = arith.constant 0 : index
    %c0_33 = arith.constant 0 : index
    %101 = vector.load %arg2[%100, %c0_32, %c0_33] : memref<8x8x128xf32, #tpu.memory_space<vmem>>, vector<1x8x128xf32>
    %102 = vector.shape_cast %101 : vector<1x8x128xf32> to vector<8x128xf32>
    %103 = arith.addf %102, %8 : vector<8x128xf32>
    %cst_34 = arith.constant dense<0.000000e+00> : vector<8x128xf32>
    %104 = tpu.matmul %79, %3, %cst_34 {dimension_numbers = #tpu.dot_dimension_numbers<[1], [0], [0], [1], [0, 0, 1, 1], [], []>, precision = #tpu.contract_precision<fp32>} : vector<8x32xf32>, vector<32x128xf32>, vector<8x128xf32> -> vector<8x128xf32>
    %105 = arith.addf %103, %104 : vector<8x128xf32>
    %106 = vector.extract_strided_slice %105 {offsets = [0, 0], sizes = [8, 96], strides = [1, 1]} : vector<8x128xf32> to vector<8x96xf32>
    %107 = arith.negf %106 : vector<8x96xf32>
    %108 = math.exp %107 : vector<8x96xf32>
    %cst_35 = arith.constant 1.000000e+00 : f32
    %109 = vector.broadcast %cst_35 : f32 to vector<8x96xf32>
    %110 = arith.addf %109, %108 : vector<8x96xf32>
    %111 = arith.divf %109, %110 : vector<8x96xf32>
    %112 = vector.extract_strided_slice %105 {offsets = [0, 96], sizes = [8, 32], strides = [1, 1]} : vector<8x128xf32> to vector<8x32xf32>
    %113 = math.tanh %112 : vector<8x32xf32>
    %114 = vector.extract_strided_slice %111 {offsets = [0, 0], sizes = [8, 32], strides = [1, 1]} : vector<8x96xf32> to vector<8x32xf32>
    %115 = vector.extract_strided_slice %111 {offsets = [0, 32], sizes = [8, 32], strides = [1, 1]} : vector<8x96xf32> to vector<8x32xf32>
    %116 = vector.extract_strided_slice %111 {offsets = [0, 64], sizes = [8, 32], strides = [1, 1]} : vector<8x96xf32> to vector<8x32xf32>
    %117 = arith.mulf %115, %77 : vector<8x32xf32>
    %118 = arith.mulf %114, %113 : vector<8x32xf32>
    %119 = arith.addf %117, %118 : vector<8x32xf32>
    %120 = math.tanh %119 : vector<8x32xf32>
    %121 = arith.mulf %116, %120 : vector<8x32xf32>
    %cst_36 = arith.constant dense<0.000000e+00> : vector<8x128xf32>
    %122 = tpu.matmul %121, %4, %cst_36 {dimension_numbers = #tpu.dot_dimension_numbers<[1], [0], [0], [1], [0, 0, 1, 1], [], []>, precision = #tpu.contract_precision<fp32>} : vector<8x32xf32>, vector<32x128xf32>, vector<8x128xf32> -> vector<8x128xf32>
    %cst_37 = arith.constant dense<0.000000e+00> : vector<8x128xf32>
    %123 = tpu.matmul %99, %5, %cst_37 {dimension_numbers = #tpu.dot_dimension_numbers<[1], [0], [0], [1], [0, 0, 1, 1], [], []>, precision = #tpu.contract_precision<fp32>} : vector<8x32xf32>, vector<32x128xf32>, vector<8x128xf32> -> vector<8x128xf32>
    %124 = arith.addf %122, %123 : vector<8x128xf32>
    %125 = arith.addf %124, %11 : vector<8x128xf32>
    %126 = vector.extract_strided_slice %125 {offsets = [0, 0], sizes = [8, 96], strides = [1, 1]} : vector<8x128xf32> to vector<8x96xf32>
    %127 = arith.negf %126 : vector<8x96xf32>
    %128 = math.exp %127 : vector<8x96xf32>
    %cst_38 = arith.constant 1.000000e+00 : f32
    %129 = vector.broadcast %cst_38 : f32 to vector<8x96xf32>
    %130 = arith.addf %129, %128 : vector<8x96xf32>
    %131 = arith.divf %129, %130 : vector<8x96xf32>
    %132 = vector.extract_strided_slice %125 {offsets = [0, 96], sizes = [8, 32], strides = [1, 1]} : vector<8x128xf32> to vector<8x32xf32>
    %133 = math.tanh %132 : vector<8x32xf32>
    %134 = vector.extract_strided_slice %131 {offsets = [0, 0], sizes = [8, 32], strides = [1, 1]} : vector<8x96xf32> to vector<8x32xf32>
    %135 = vector.extract_strided_slice %131 {offsets = [0, 32], sizes = [8, 32], strides = [1, 1]} : vector<8x96xf32> to vector<8x32xf32>
    %136 = vector.extract_strided_slice %131 {offsets = [0, 64], sizes = [8, 32], strides = [1, 1]} : vector<8x96xf32> to vector<8x32xf32>
    %137 = arith.mulf %135, %97 : vector<8x32xf32>
    %138 = arith.mulf %134, %133 : vector<8x32xf32>
    %139 = arith.addf %137, %138 : vector<8x32xf32>
    %140 = math.tanh %139 : vector<8x32xf32>
    %141 = arith.mulf %136, %140 : vector<8x32xf32>
    %c3_i32 = arith.constant 3 : i32
    %142 = arith.index_cast %c3_i32 : i32 to index
    %c0_39 = arith.constant 0 : index
    %c0_40 = arith.constant 0 : index
    %143 = vector.load %arg2[%142, %c0_39, %c0_40] : memref<8x8x128xf32, #tpu.memory_space<vmem>>, vector<1x8x128xf32>
    %144 = vector.shape_cast %143 : vector<1x8x128xf32> to vector<8x128xf32>
    %145 = arith.addf %144, %8 : vector<8x128xf32>
    %cst_41 = arith.constant dense<0.000000e+00> : vector<8x128xf32>
    %146 = tpu.matmul %121, %3, %cst_41 {dimension_numbers = #tpu.dot_dimension_numbers<[1], [0], [0], [1], [0, 0, 1, 1], [], []>, precision = #tpu.contract_precision<fp32>} : vector<8x32xf32>, vector<32x128xf32>, vector<8x128xf32> -> vector<8x128xf32>
    %147 = arith.addf %145, %146 : vector<8x128xf32>
    %148 = vector.extract_strided_slice %147 {offsets = [0, 0], sizes = [8, 96], strides = [1, 1]} : vector<8x128xf32> to vector<8x96xf32>
    %149 = arith.negf %148 : vector<8x96xf32>
    %150 = math.exp %149 : vector<8x96xf32>
    %cst_42 = arith.constant 1.000000e+00 : f32
    %151 = vector.broadcast %cst_42 : f32 to vector<8x96xf32>
    %152 = arith.addf %151, %150 : vector<8x96xf32>
    %153 = arith.divf %151, %152 : vector<8x96xf32>
    %154 = vector.extract_strided_slice %147 {offsets = [0, 96], sizes = [8, 32], strides = [1, 1]} : vector<8x128xf32> to vector<8x32xf32>
    %155 = math.tanh %154 : vector<8x32xf32>
    %156 = vector.extract_strided_slice %153 {offsets = [0, 0], sizes = [8, 32], strides = [1, 1]} : vector<8x96xf32> to vector<8x32xf32>
    %157 = vector.extract_strided_slice %153 {offsets = [0, 32], sizes = [8, 32], strides = [1, 1]} : vector<8x96xf32> to vector<8x32xf32>
    %158 = vector.extract_strided_slice %153 {offsets = [0, 64], sizes = [8, 32], strides = [1, 1]} : vector<8x96xf32> to vector<8x32xf32>
    %159 = arith.mulf %157, %119 : vector<8x32xf32>
    %160 = arith.mulf %156, %155 : vector<8x32xf32>
    %161 = arith.addf %159, %160 : vector<8x32xf32>
    %162 = math.tanh %161 : vector<8x32xf32>
    %163 = arith.mulf %158, %162 : vector<8x32xf32>
    %cst_43 = arith.constant dense<0.000000e+00> : vector<8x128xf32>
    %164 = tpu.matmul %163, %4, %cst_43 {dimension_numbers = #tpu.dot_dimension_numbers<[1], [0], [0], [1], [0, 0, 1, 1], [], []>, precision = #tpu.contract_precision<fp32>} : vector<8x32xf32>, vector<32x128xf32>, vector<8x128xf32> -> vector<8x128xf32>
    %cst_44 = arith.constant dense<0.000000e+00> : vector<8x128xf32>
    %165 = tpu.matmul %141, %5, %cst_44 {dimension_numbers = #tpu.dot_dimension_numbers<[1], [0], [0], [1], [0, 0, 1, 1], [], []>, precision = #tpu.contract_precision<fp32>} : vector<8x32xf32>, vector<32x128xf32>, vector<8x128xf32> -> vector<8x128xf32>
    %166 = arith.addf %164, %165 : vector<8x128xf32>
    %167 = arith.addf %166, %11 : vector<8x128xf32>
    %168 = vector.extract_strided_slice %167 {offsets = [0, 0], sizes = [8, 96], strides = [1, 1]} : vector<8x128xf32> to vector<8x96xf32>
    %169 = arith.negf %168 : vector<8x96xf32>
    %170 = math.exp %169 : vector<8x96xf32>
    %cst_45 = arith.constant 1.000000e+00 : f32
    %171 = vector.broadcast %cst_45 : f32 to vector<8x96xf32>
    %172 = arith.addf %171, %170 : vector<8x96xf32>
    %173 = arith.divf %171, %172 : vector<8x96xf32>
    %174 = vector.extract_strided_slice %167 {offsets = [0, 96], sizes = [8, 32], strides = [1, 1]} : vector<8x128xf32> to vector<8x32xf32>
    %175 = math.tanh %174 : vector<8x32xf32>
    %176 = vector.extract_strided_slice %173 {offsets = [0, 0], sizes = [8, 32], strides = [1, 1]} : vector<8x96xf32> to vector<8x32xf32>
    %177 = vector.extract_strided_slice %173 {offsets = [0, 32], sizes = [8, 32], strides = [1, 1]} : vector<8x96xf32> to vector<8x32xf32>
    %178 = vector.extract_strided_slice %173 {offsets = [0, 64], sizes = [8, 32], strides = [1, 1]} : vector<8x96xf32> to vector<8x32xf32>
    %179 = arith.mulf %177, %139 : vector<8x32xf32>
    %180 = arith.mulf %176, %175 : vector<8x32xf32>
    %181 = arith.addf %179, %180 : vector<8x32xf32>
    %182 = math.tanh %181 : vector<8x32xf32>
    %183 = arith.mulf %178, %182 : vector<8x32xf32>
    %c4_i32 = arith.constant 4 : i32
    %184 = arith.index_cast %c4_i32 : i32 to index
    %c0_46 = arith.constant 0 : index
    %c0_47 = arith.constant 0 : index
    %185 = vector.load %arg2[%184, %c0_46, %c0_47] : memref<8x8x128xf32, #tpu.memory_space<vmem>>, vector<1x8x128xf32>
    %186 = vector.shape_cast %185 : vector<1x8x128xf32> to vector<8x128xf32>
    %187 = arith.addf %186, %8 : vector<8x128xf32>
    %cst_48 = arith.constant dense<0.000000e+00> : vector<8x128xf32>
    %188 = tpu.matmul %163, %3, %cst_48 {dimension_numbers = #tpu.dot_dimension_numbers<[1], [0], [0], [1], [0, 0, 1, 1], [], []>, precision = #tpu.contract_precision<fp32>} : vector<8x32xf32>, vector<32x128xf32>, vector<8x128xf32> -> vector<8x128xf32>
    %189 = arith.addf %187, %188 : vector<8x128xf32>
    %190 = vector.extract_strided_slice %189 {offsets = [0, 0], sizes = [8, 96], strides = [1, 1]} : vector<8x128xf32> to vector<8x96xf32>
    %191 = arith.negf %190 : vector<8x96xf32>
    %192 = math.exp %191 : vector<8x96xf32>
    %cst_49 = arith.constant 1.000000e+00 : f32
    %193 = vector.broadcast %cst_49 : f32 to vector<8x96xf32>
    %194 = arith.addf %193, %192 : vector<8x96xf32>
    %195 = arith.divf %193, %194 : vector<8x96xf32>
    %196 = vector.extract_strided_slice %189 {offsets = [0, 96], sizes = [8, 32], strides = [1, 1]} : vector<8x128xf32> to vector<8x32xf32>
    %197 = math.tanh %196 : vector<8x32xf32>
    %198 = vector.extract_strided_slice %195 {offsets = [0, 0], sizes = [8, 32], strides = [1, 1]} : vector<8x96xf32> to vector<8x32xf32>
    %199 = vector.extract_strided_slice %195 {offsets = [0, 32], sizes = [8, 32], strides = [1, 1]} : vector<8x96xf32> to vector<8x32xf32>
    %200 = vector.extract_strided_slice %195 {offsets = [0, 64], sizes = [8, 32], strides = [1, 1]} : vector<8x96xf32> to vector<8x32xf32>
    %201 = arith.mulf %199, %161 : vector<8x32xf32>
    %202 = arith.mulf %198, %197 : vector<8x32xf32>
    %203 = arith.addf %201, %202 : vector<8x32xf32>
    %204 = math.tanh %203 : vector<8x32xf32>
    %205 = arith.mulf %200, %204 : vector<8x32xf32>
    %cst_50 = arith.constant dense<0.000000e+00> : vector<8x128xf32>
    %206 = tpu.matmul %205, %4, %cst_50 {dimension_numbers = #tpu.dot_dimension_numbers<[1], [0], [0], [1], [0, 0, 1, 1], [], []>, precision = #tpu.contract_precision<fp32>} : vector<8x32xf32>, vector<32x128xf32>, vector<8x128xf32> -> vector<8x128xf32>
    %cst_51 = arith.constant dense<0.000000e+00> : vector<8x128xf32>
    %207 = tpu.matmul %183, %5, %cst_51 {dimension_numbers = #tpu.dot_dimension_numbers<[1], [0], [0], [1], [0, 0, 1, 1], [], []>, precision = #tpu.contract_precision<fp32>} : vector<8x32xf32>, vector<32x128xf32>, vector<8x128xf32> -> vector<8x128xf32>
    %208 = arith.addf %206, %207 : vector<8x128xf32>
    %209 = arith.addf %208, %11 : vector<8x128xf32>
    %210 = vector.extract_strided_slice %209 {offsets = [0, 0], sizes = [8, 96], strides = [1, 1]} : vector<8x128xf32> to vector<8x96xf32>
    %211 = arith.negf %210 : vector<8x96xf32>
    %212 = math.exp %211 : vector<8x96xf32>
    %cst_52 = arith.constant 1.000000e+00 : f32
    %213 = vector.broadcast %cst_52 : f32 to vector<8x96xf32>
    %214 = arith.addf %213, %212 : vector<8x96xf32>
    %215 = arith.divf %213, %214 : vector<8x96xf32>
    %216 = vector.extract_strided_slice %209 {offsets = [0, 96], sizes = [8, 32], strides = [1, 1]} : vector<8x128xf32> to vector<8x32xf32>
    %217 = math.tanh %216 : vector<8x32xf32>
    %218 = vector.extract_strided_slice %215 {offsets = [0, 0], sizes = [8, 32], strides = [1, 1]} : vector<8x96xf32> to vector<8x32xf32>
    %219 = vector.extract_strided_slice %215 {offsets = [0, 32], sizes = [8, 32], strides = [1, 1]} : vector<8x96xf32> to vector<8x32xf32>
    %220 = vector.extract_strided_slice %215 {offsets = [0, 64], sizes = [8, 32], strides = [1, 1]} : vector<8x96xf32> to vector<8x32xf32>
    %221 = arith.mulf %219, %181 : vector<8x32xf32>
    %222 = arith.mulf %218, %217 : vector<8x32xf32>
    %223 = arith.addf %221, %222 : vector<8x32xf32>
    %224 = math.tanh %223 : vector<8x32xf32>
    %225 = arith.mulf %220, %224 : vector<8x32xf32>
    %c5_i32 = arith.constant 5 : i32
    %226 = arith.index_cast %c5_i32 : i32 to index
    %c0_53 = arith.constant 0 : index
    %c0_54 = arith.constant 0 : index
    %227 = vector.load %arg2[%226, %c0_53, %c0_54] : memref<8x8x128xf32, #tpu.memory_space<vmem>>, vector<1x8x128xf32>
    %228 = vector.shape_cast %227 : vector<1x8x128xf32> to vector<8x128xf32>
    %229 = arith.addf %228, %8 : vector<8x128xf32>
    %cst_55 = arith.constant dense<0.000000e+00> : vector<8x128xf32>
    %230 = tpu.matmul %205, %3, %cst_55 {dimension_numbers = #tpu.dot_dimension_numbers<[1], [0], [0], [1], [0, 0, 1, 1], [], []>, precision = #tpu.contract_precision<fp32>} : vector<8x32xf32>, vector<32x128xf32>, vector<8x128xf32> -> vector<8x128xf32>
    %231 = arith.addf %229, %230 : vector<8x128xf32>
    %232 = vector.extract_strided_slice %231 {offsets = [0, 0], sizes = [8, 96], strides = [1, 1]} : vector<8x128xf32> to vector<8x96xf32>
    %233 = arith.negf %232 : vector<8x96xf32>
    %234 = math.exp %233 : vector<8x96xf32>
    %cst_56 = arith.constant 1.000000e+00 : f32
    %235 = vector.broadcast %cst_56 : f32 to vector<8x96xf32>
    %236 = arith.addf %235, %234 : vector<8x96xf32>
    %237 = arith.divf %235, %236 : vector<8x96xf32>
    %238 = vector.extract_strided_slice %231 {offsets = [0, 96], sizes = [8, 32], strides = [1, 1]} : vector<8x128xf32> to vector<8x32xf32>
    %239 = math.tanh %238 : vector<8x32xf32>
    %240 = vector.extract_strided_slice %237 {offsets = [0, 0], sizes = [8, 32], strides = [1, 1]} : vector<8x96xf32> to vector<8x32xf32>
    %241 = vector.extract_strided_slice %237 {offsets = [0, 32], sizes = [8, 32], strides = [1, 1]} : vector<8x96xf32> to vector<8x32xf32>
    %242 = vector.extract_strided_slice %237 {offsets = [0, 64], sizes = [8, 32], strides = [1, 1]} : vector<8x96xf32> to vector<8x32xf32>
    %243 = arith.mulf %241, %203 : vector<8x32xf32>
    %244 = arith.mulf %240, %239 : vector<8x32xf32>
    %245 = arith.addf %243, %244 : vector<8x32xf32>
    %246 = math.tanh %245 : vector<8x32xf32>
    %247 = arith.mulf %242, %246 : vector<8x32xf32>
    %cst_57 = arith.constant dense<0.000000e+00> : vector<8x128xf32>
    %248 = tpu.matmul %247, %4, %cst_57 {dimension_numbers = #tpu.dot_dimension_numbers<[1], [0], [0], [1], [0, 0, 1, 1], [], []>, precision = #tpu.contract_precision<fp32>} : vector<8x32xf32>, vector<32x128xf32>, vector<8x128xf32> -> vector<8x128xf32>
    %cst_58 = arith.constant dense<0.000000e+00> : vector<8x128xf32>
    %249 = tpu.matmul %225, %5, %cst_58 {dimension_numbers = #tpu.dot_dimension_numbers<[1], [0], [0], [1], [0, 0, 1, 1], [], []>, precision = #tpu.contract_precision<fp32>} : vector<8x32xf32>, vector<32x128xf32>, vector<8x128xf32> -> vector<8x128xf32>
    %250 = arith.addf %248, %249 : vector<8x128xf32>
    %251 = arith.addf %250, %11 : vector<8x128xf32>
    %252 = vector.extract_strided_slice %251 {offsets = [0, 0], sizes = [8, 96], strides = [1, 1]} : vector<8x128xf32> to vector<8x96xf32>
    %253 = arith.negf %252 : vector<8x96xf32>
    %254 = math.exp %253 : vector<8x96xf32>
    %cst_59 = arith.constant 1.000000e+00 : f32
    %255 = vector.broadcast %cst_59 : f32 to vector<8x96xf32>
    %256 = arith.addf %255, %254 : vector<8x96xf32>
    %257 = arith.divf %255, %256 : vector<8x96xf32>
    %258 = vector.extract_strided_slice %251 {offsets = [0, 96], sizes = [8, 32], strides = [1, 1]} : vector<8x128xf32> to vector<8x32xf32>
    %259 = math.tanh %258 : vector<8x32xf32>
    %260 = vector.extract_strided_slice %257 {offsets = [0, 0], sizes = [8, 32], strides = [1, 1]} : vector<8x96xf32> to vector<8x32xf32>
    %261 = vector.extract_strided_slice %257 {offsets = [0, 32], sizes = [8, 32], strides = [1, 1]} : vector<8x96xf32> to vector<8x32xf32>
    %262 = vector.extract_strided_slice %257 {offsets = [0, 64], sizes = [8, 32], strides = [1, 1]} : vector<8x96xf32> to vector<8x32xf32>
    %263 = arith.mulf %261, %223 : vector<8x32xf32>
    %264 = arith.mulf %260, %259 : vector<8x32xf32>
    %265 = arith.addf %263, %264 : vector<8x32xf32>
    %266 = math.tanh %265 : vector<8x32xf32>
    %267 = arith.mulf %262, %266 : vector<8x32xf32>
    %c6_i32 = arith.constant 6 : i32
    %268 = arith.index_cast %c6_i32 : i32 to index
    %c0_60 = arith.constant 0 : index
    %c0_61 = arith.constant 0 : index
    %269 = vector.load %arg2[%268, %c0_60, %c0_61] : memref<8x8x128xf32, #tpu.memory_space<vmem>>, vector<1x8x128xf32>
    %270 = vector.shape_cast %269 : vector<1x8x128xf32> to vector<8x128xf32>
    %271 = arith.addf %270, %8 : vector<8x128xf32>
    %cst_62 = arith.constant dense<0.000000e+00> : vector<8x128xf32>
    %272 = tpu.matmul %247, %3, %cst_62 {dimension_numbers = #tpu.dot_dimension_numbers<[1], [0], [0], [1], [0, 0, 1, 1], [], []>, precision = #tpu.contract_precision<fp32>} : vector<8x32xf32>, vector<32x128xf32>, vector<8x128xf32> -> vector<8x128xf32>
    %273 = arith.addf %271, %272 : vector<8x128xf32>
    %274 = vector.extract_strided_slice %273 {offsets = [0, 0], sizes = [8, 96], strides = [1, 1]} : vector<8x128xf32> to vector<8x96xf32>
    %275 = arith.negf %274 : vector<8x96xf32>
    %276 = math.exp %275 : vector<8x96xf32>
    %cst_63 = arith.constant 1.000000e+00 : f32
    %277 = vector.broadcast %cst_63 : f32 to vector<8x96xf32>
    %278 = arith.addf %277, %276 : vector<8x96xf32>
    %279 = arith.divf %277, %278 : vector<8x96xf32>
    %280 = vector.extract_strided_slice %273 {offsets = [0, 96], sizes = [8, 32], strides = [1, 1]} : vector<8x128xf32> to vector<8x32xf32>
    %281 = math.tanh %280 : vector<8x32xf32>
    %282 = vector.extract_strided_slice %279 {offsets = [0, 0], sizes = [8, 32], strides = [1, 1]} : vector<8x96xf32> to vector<8x32xf32>
    %283 = vector.extract_strided_slice %279 {offsets = [0, 32], sizes = [8, 32], strides = [1, 1]} : vector<8x96xf32> to vector<8x32xf32>
    %284 = vector.extract_strided_slice %279 {offsets = [0, 64], sizes = [8, 32], strides = [1, 1]} : vector<8x96xf32> to vector<8x32xf32>
    %285 = arith.mulf %283, %245 : vector<8x32xf32>
    %286 = arith.mulf %282, %281 : vector<8x32xf32>
    %287 = arith.addf %285, %286 : vector<8x32xf32>
    %288 = math.tanh %287 : vector<8x32xf32>
    %289 = arith.mulf %284, %288 : vector<8x32xf32>
    %cst_64 = arith.constant dense<0.000000e+00> : vector<8x128xf32>
    %290 = tpu.matmul %289, %4, %cst_64 {dimension_numbers = #tpu.dot_dimension_numbers<[1], [0], [0], [1], [0, 0, 1, 1], [], []>, precision = #tpu.contract_precision<fp32>} : vector<8x32xf32>, vector<32x128xf32>, vector<8x128xf32> -> vector<8x128xf32>
    %cst_65 = arith.constant dense<0.000000e+00> : vector<8x128xf32>
    %291 = tpu.matmul %267, %5, %cst_65 {dimension_numbers = #tpu.dot_dimension_numbers<[1], [0], [0], [1], [0, 0, 1, 1], [], []>, precision = #tpu.contract_precision<fp32>} : vector<8x32xf32>, vector<32x128xf32>, vector<8x128xf32> -> vector<8x128xf32>
    %292 = arith.addf %290, %291 : vector<8x128xf32>
    %293 = arith.addf %292, %11 : vector<8x128xf32>
    %294 = vector.extract_strided_slice %293 {offsets = [0, 0], sizes = [8, 96], strides = [1, 1]} : vector<8x128xf32> to vector<8x96xf32>
    %295 = arith.negf %294 : vector<8x96xf32>
    %296 = math.exp %295 : vector<8x96xf32>
    %cst_66 = arith.constant 1.000000e+00 : f32
    %297 = vector.broadcast %cst_66 : f32 to vector<8x96xf32>
    %298 = arith.addf %297, %296 : vector<8x96xf32>
    %299 = arith.divf %297, %298 : vector<8x96xf32>
    %300 = vector.extract_strided_slice %293 {offsets = [0, 96], sizes = [8, 32], strides = [1, 1]} : vector<8x128xf32> to vector<8x32xf32>
    %301 = math.tanh %300 : vector<8x32xf32>
    %302 = vector.extract_strided_slice %299 {offsets = [0, 0], sizes = [8, 32], strides = [1, 1]} : vector<8x96xf32> to vector<8x32xf32>
    %303 = vector.extract_strided_slice %299 {offsets = [0, 32], sizes = [8, 32], strides = [1, 1]} : vector<8x96xf32> to vector<8x32xf32>
    %304 = vector.extract_strided_slice %299 {offsets = [0, 64], sizes = [8, 32], strides = [1, 1]} : vector<8x96xf32> to vector<8x32xf32>
    %305 = arith.mulf %303, %265 : vector<8x32xf32>
    %306 = arith.mulf %302, %301 : vector<8x32xf32>
    %307 = arith.addf %305, %306 : vector<8x32xf32>
    %308 = math.tanh %307 : vector<8x32xf32>
    %309 = arith.mulf %304, %308 : vector<8x32xf32>
    %c7_i32 = arith.constant 7 : i32
    %310 = arith.index_cast %c7_i32 : i32 to index
    %c0_67 = arith.constant 0 : index
    %c0_68 = arith.constant 0 : index
    %311 = vector.load %arg2[%310, %c0_67, %c0_68] : memref<8x8x128xf32, #tpu.memory_space<vmem>>, vector<1x8x128xf32>
    %312 = vector.shape_cast %311 : vector<1x8x128xf32> to vector<8x128xf32>
    %313 = arith.addf %312, %8 : vector<8x128xf32>
    %cst_69 = arith.constant dense<0.000000e+00> : vector<8x128xf32>
    %314 = tpu.matmul %289, %3, %cst_69 {dimension_numbers = #tpu.dot_dimension_numbers<[1], [0], [0], [1], [0, 0, 1, 1], [], []>, precision = #tpu.contract_precision<fp32>} : vector<8x32xf32>, vector<32x128xf32>, vector<8x128xf32> -> vector<8x128xf32>
    %315 = arith.addf %313, %314 : vector<8x128xf32>
    %316 = vector.extract_strided_slice %315 {offsets = [0, 0], sizes = [8, 96], strides = [1, 1]} : vector<8x128xf32> to vector<8x96xf32>
    %317 = arith.negf %316 : vector<8x96xf32>
    %318 = math.exp %317 : vector<8x96xf32>
    %cst_70 = arith.constant 1.000000e+00 : f32
    %319 = vector.broadcast %cst_70 : f32 to vector<8x96xf32>
    %320 = arith.addf %319, %318 : vector<8x96xf32>
    %321 = arith.divf %319, %320 : vector<8x96xf32>
    %322 = vector.extract_strided_slice %315 {offsets = [0, 96], sizes = [8, 32], strides = [1, 1]} : vector<8x128xf32> to vector<8x32xf32>
    %323 = math.tanh %322 : vector<8x32xf32>
    %324 = vector.extract_strided_slice %321 {offsets = [0, 0], sizes = [8, 32], strides = [1, 1]} : vector<8x96xf32> to vector<8x32xf32>
    %325 = vector.extract_strided_slice %321 {offsets = [0, 32], sizes = [8, 32], strides = [1, 1]} : vector<8x96xf32> to vector<8x32xf32>
    %326 = vector.extract_strided_slice %321 {offsets = [0, 64], sizes = [8, 32], strides = [1, 1]} : vector<8x96xf32> to vector<8x32xf32>
    %327 = arith.mulf %325, %287 : vector<8x32xf32>
    %328 = arith.mulf %324, %323 : vector<8x32xf32>
    %329 = arith.addf %327, %328 : vector<8x32xf32>
    %330 = math.tanh %329 : vector<8x32xf32>
    %331 = arith.mulf %326, %330 : vector<8x32xf32>
    %cst_71 = arith.constant dense<0.000000e+00> : vector<8x128xf32>
    %332 = tpu.matmul %331, %4, %cst_71 {dimension_numbers = #tpu.dot_dimension_numbers<[1], [0], [0], [1], [0, 0, 1, 1], [], []>, precision = #tpu.contract_precision<fp32>} : vector<8x32xf32>, vector<32x128xf32>, vector<8x128xf32> -> vector<8x128xf32>
    %cst_72 = arith.constant dense<0.000000e+00> : vector<8x128xf32>
    %333 = tpu.matmul %309, %5, %cst_72 {dimension_numbers = #tpu.dot_dimension_numbers<[1], [0], [0], [1], [0, 0, 1, 1], [], []>, precision = #tpu.contract_precision<fp32>} : vector<8x32xf32>, vector<32x128xf32>, vector<8x128xf32> -> vector<8x128xf32>
    %334 = arith.addf %332, %333 : vector<8x128xf32>
    %335 = arith.addf %334, %11 : vector<8x128xf32>
    %336 = vector.extract_strided_slice %335 {offsets = [0, 0], sizes = [8, 96], strides = [1, 1]} : vector<8x128xf32> to vector<8x96xf32>
    %337 = arith.negf %336 : vector<8x96xf32>
    %338 = math.exp %337 : vector<8x96xf32>
    %cst_73 = arith.constant 1.000000e+00 : f32
    %339 = vector.broadcast %cst_73 : f32 to vector<8x96xf32>
    %340 = arith.addf %339, %338 : vector<8x96xf32>
    %341 = arith.divf %339, %340 : vector<8x96xf32>
    %342 = vector.extract_strided_slice %335 {offsets = [0, 96], sizes = [8, 32], strides = [1, 1]} : vector<8x128xf32> to vector<8x32xf32>
    %343 = math.tanh %342 : vector<8x32xf32>
    %344 = vector.extract_strided_slice %341 {offsets = [0, 0], sizes = [8, 32], strides = [1, 1]} : vector<8x96xf32> to vector<8x32xf32>
    %345 = vector.extract_strided_slice %341 {offsets = [0, 32], sizes = [8, 32], strides = [1, 1]} : vector<8x96xf32> to vector<8x32xf32>
    %346 = vector.extract_strided_slice %341 {offsets = [0, 64], sizes = [8, 32], strides = [1, 1]} : vector<8x96xf32> to vector<8x32xf32>
    %347 = arith.mulf %345, %307 : vector<8x32xf32>
    %348 = arith.mulf %344, %343 : vector<8x32xf32>
    %349 = arith.addf %347, %348 : vector<8x32xf32>
    %350 = math.tanh %349 : vector<8x32xf32>
    %351 = arith.mulf %346, %350 : vector<8x32xf32>
    %c8_i32 = arith.constant 8 : i32
    %c0_74 = arith.constant 0 : index
    %c0_75 = arith.constant 0 : index
    %352 = vector.load %arg11[%c0_74, %c0_75] : memref<8x32xf32, #tpu.memory_space<vmem>>, vector<8x32xf32>
    tpu.vector_store %arg11[%c0_74, %c0_75], %331 {strides = array<i32>} : memref<8x32xf32, #tpu.memory_space<vmem>>, vector<8x32xf32>,
    %c0_76 = arith.constant 0 : index
    %c0_77 = arith.constant 0 : index
    %353 = vector.load %arg12[%c0_76, %c0_77] : memref<8x32xf32, #tpu.memory_space<vmem>>, vector<8x32xf32>
    tpu.vector_store %arg12[%c0_76, %c0_77], %329 {strides = array<i32>} : memref<8x32xf32, #tpu.memory_space<vmem>>, vector<8x32xf32>,
    %c0_78 = arith.constant 0 : index
    %c0_79 = arith.constant 0 : index
    %354 = vector.load %arg13[%c0_78, %c0_79] : memref<8x32xf32, #tpu.memory_space<vmem>>, vector<8x32xf32>
    tpu.vector_store %arg13[%c0_78, %c0_79], %351 {strides = array<i32>} : memref<8x32xf32, #tpu.memory_space<vmem>>, vector<8x32xf32>,
    %c0_80 = arith.constant 0 : index
    %c0_81 = arith.constant 0 : index
    %355 = vector.load %arg14[%c0_80, %c0_81] : memref<8x32xf32, #tpu.memory_space<vmem>>, vector<8x32xf32>
    tpu.vector_store %arg14[%c0_80, %c0_81], %349 {strides = array<i32>} : memref<8x32xf32, #tpu.memory_space<vmem>>, vector<8x32xf32>,
    %c0_i32_82 = arith.constant 0 : i32
    %356 = arith.cmpi eq, %arg1, %c0_i32_82 : i32
    %357 = arith.extui %356 : i1 to i32
    %c0_i32_83 = arith.constant 0 : i32
    %358 = arith.cmpi ne, %357, %c0_i32_83 : i32
    scf.if %358 {
      %c0_84 = arith.constant 0 : index
      %c0_85 = arith.constant 0 : index
      %359 = vector.load %arg8[%c0_84, %c0_85] : memref<1x32xf32, #tpu.memory_space<vmem>>, vector<1x32xf32>
      %360 = vector.broadcast %359 : vector<1x32xf32> to vector<8x32xf32>
      %361 = arith.mulf %351, %360 : vector<8x32xf32>
      %cst_86 = arith.constant dense<0.000000e+00> : vector<8xf32>
      %362 = vector.multi_reduction <add>, %361, %cst_86 [1] : vector<8x32xf32> to vector<8xf32>
      %363 = vector.shape_cast %362 : vector<8xf32> to vector<8x1xf32>
      %c0_87 = arith.constant 0 : index
      %c0_88 = arith.constant 0 : index
      %364 = vector.load %arg9[%c0_87, %c0_88] : memref<1x1xf32, #tpu.memory_space<vmem>>, vector<1x1xf32>
      %365 = vector.broadcast %364 : vector<1x1xf32> to vector<8x1xf32>
      %366 = arith.addf %363, %365 : vector<8x1xf32>
      %367 = arith.negf %366 : vector<8x1xf32>
      %368 = math.exp %367 : vector<8x1xf32>
      %cst_89 = arith.constant 1.000000e+00 : f32
      %369 = vector.broadcast %cst_89 : f32 to vector<8x1xf32>
      %370 = arith.addf %369, %368 : vector<8x1xf32>
      %371 = arith.divf %369, %370 : vector<8x1xf32>
      %c0_90 = arith.constant 0 : index
      %c0_91 = arith.constant 0 : index
      %372 = vector.load %arg10[%c0_90, %c0_91] : memref<8x1xf32, #tpu.memory_space<vmem>>, vector<8x1xf32>
      tpu.vector_store %arg10[%c0_90, %c0_91], %371 {strides = array<i32>} : memref<8x1xf32, #tpu.memory_space<vmem>>, vector<8x1xf32>,
    } else {
    }
    return
  }
  func.func @transform_0(%arg0: i32, %arg1: i32) -> (i32, i32, i32) {
    %c0_i32 = arith.constant 0 : i32
    %c0_i32_0 = arith.constant 0 : i32
    return %arg1, %arg0, %c0_i32 : i32, i32, i32
  }
  func.func @transform_1(%arg0: i32, %arg1: i32) -> (i32, i32) {
    %c0_i32 = arith.constant 0 : i32
    %c0_i32_0 = arith.constant 0 : i32
    %c0_i32_1 = arith.constant 0 : i32
    return %c0_i32, %c0_i32_0 : i32, i32
  }
  func.func @transform_2(%arg0: i32, %arg1: i32) -> (i32, i32) {
    %c0_i32 = arith.constant 0 : i32
    %c0_i32_0 = arith.constant 0 : i32
    %c0_i32_1 = arith.constant 0 : i32
    return %c0_i32, %c0_i32_0 : i32, i32
  }
  func.func @transform_3(%arg0: i32, %arg1: i32) -> (i32, i32) {
    %c0_i32 = arith.constant 0 : i32
    %c0_i32_0 = arith.constant 0 : i32
    %c0_i32_1 = arith.constant 0 : i32
    return %c0_i32, %c0_i32_0 : i32, i32
  }
  func.func @transform_4(%arg0: i32, %arg1: i32) -> (i32, i32) {
    %c0_i32 = arith.constant 0 : i32
    %c0_i32_0 = arith.constant 0 : i32
    %c0_i32_1 = arith.constant 0 : i32
    return %c0_i32, %c0_i32_0 : i32, i32
  }
  func.func @transform_5(%arg0: i32, %arg1: i32) -> (i32, i32) {
    %c0_i32 = arith.constant 0 : i32
    %c0_i32_0 = arith.constant 0 : i32
    %c0_i32_1 = arith.constant 0 : i32
    return %c0_i32, %c0_i32_0 : i32, i32
  }
  func.func @transform_6(%arg0: i32, %arg1: i32) -> (i32, i32) {
    %c0_i32 = arith.constant 0 : i32
    %c0_i32_0 = arith.constant 0 : i32
    %c0_i32_1 = arith.constant 0 : i32
    return %c0_i32, %c0_i32_0 : i32, i32
  }
  func.func @transform_7(%arg0: i32, %arg1: i32) -> (i32, i32) {
    %c0_i32 = arith.constant 0 : i32
    %c0_i32_0 = arith.constant 0 : i32
    %c0_i32_1 = arith.constant 0 : i32
    return %c0_i32, %c0_i32_0 : i32, i32
  }
  func.func @transform_8(%arg0: i32, %arg1: i32) -> (i32, i32) {
    %c0_i32 = arith.constant 0 : i32
    %c0_i32_0 = arith.constant 0 : i32
    return %arg0, %c0_i32 : i32, i32
  }
}

</mosaic_0001>

<bundles_post_ra>
// kernel: tpu_custom_call.1
= control target key start
LH: loop header
LB: loop body
LE: loop exit
PB: predicated region body
PF: predicated region fallthrough
CT: control target
= control target key end

     0   :  { %s6654_s0 = inlined_call_operand.hbm [shape: f32[8,8,128], index: 0, kind: input, shape index: {}]   ;;  %s6655_s1 = inlined_call_operand.hbm [shape: f32[32,128], index: 1, kind: input, shape index: {}]   ;;  %s6656_s2 = inlined_call_operand.hbm [shape: f32[32,128], index: 2, kind: input, shape index: {}]   ;;  %s6657_s3 = inlined_call_operand.hbm [shape: f32[32,128], index: 3, kind: input, shape index: {}]   ;;  %s6658_s4 = inlined_call_operand.vmem [shape: f32[1,128], index: 4, kind: input, shape index: {}]   ;;  %s6659_s5 = inlined_call_operand.vmem [shape: f32[1,128], index: 5, kind: input, shape index: {}]   ;;  %s6660_s6 = inlined_call_operand.vmem [shape: f32[1,32], index: 6, kind: input, shape index: {}]   ;;  %s6661_s7 = inlined_call_operand.<no memory space> [shape: f32[1,1], index: 7, kind: input, shape index: {}]   ;;  %s6662_s8 = inlined_call_operand.vmem [shape: f32[8,1], index: 8, kind: output, shape index: {}]  }
   0x1   :  { %v13_v0 = vstv %s6661_s7 }
   0x2   :  { %14 = vst [vmem:[#allocation6] sm:$0x1] %v13_v0 }
   0x3   :  { %15 = vsyncpa [#allocation8], 0 }
   0x4   :  { %16 = vsyncpa [#allocation10], 0 }
   0x5   :  { %17 = vsyncpa [#allocation13], 0  ;;  %s35_s9 = sshll.u32 %s6655_s1, 4  ;;  %s5624_s10 = smov [#allocation9]   ;;  %s36_s9 = int_to_ptr.hbm [resolvable:$true] %s35_s9 }
   0x6   :  { %s37_s11 = sshll.u32 %s5624_s10, 4  ;;  %s22_s14 = sshll.u32 %s6654_s0, 4  ;;  %s38_s11 = int_to_ptr.vmem [resolvable:$true] %s37_s11  ;;  %s23_s14 = int_to_ptr.hbm [resolvable:$true] %s22_s14 }
   0x7   :  { %s5625_s15 = smov 128   ;;  %s5626_s16 = smov 8  }
   0x8   :  { %43 = dma.hbm_to_vmem [thread:$0]  %s36_s9, 512, %s38_s11, [#allocation10], %s5625_s15, %s5625_s15, %s5626_s16  }
   0x9   :  { %s5627_s7 = smov [#allocation7]   ;;  %s48_s20 = sshll.u32 %s6656_s2, 4  ;;  %s49_s20 = int_to_ptr.hbm [resolvable:$true] %s48_s20 }
   0xa   :  { %s24_s17 = sshll.u32 %s5627_s7, 4  ;;  %s61_s22 = sshll.u32 %s6657_s3, 4  ;;  %s25_s17 = int_to_ptr.vmem [resolvable:$true] %s24_s17  ;;  %s62_s22 = int_to_ptr.hbm [resolvable:$true] %s61_s22 }
   0xb   :  { %30 = dma.hbm_to_vmem [thread:$0]  %s23_s14, 1024, %s25_s17, [#allocation8], %s5625_s15, %s5625_s15, %s5626_s16  }
   0xc   :  { %s5628_s23 = smov [#allocation11]   ;;  %s5629_s0 = smov [#allocation12]  }
   0xd   :  { %s50_s24 = sshll.u32 %s5628_s23, 4  ;;  %s63_s25 = sshll.u32 %s5629_s0, 4  ;;  %s51_s24 = int_to_ptr.vmem [resolvable:$true] %s50_s24  ;;  %s64_s25 = int_to_ptr.vmem [resolvable:$true] %s63_s25 }
   0xe   :  { %56 = dma.hbm_to_vmem [thread:$0]  %s49_s20, 512, %s51_s24, [#allocation10], %s5625_s15, %s5625_s15, %s5626_s16  }
   0xf   :  { %69 = dma.hbm_to_vmem [thread:$0]  %s62_s22, 512, %s64_s25, [#allocation13], %s5625_s15, %s5625_s15, %s5626_s16  }
  0x10   :  { %5618 = dma.done.wait [#allocation8], 1024  }
  0x11   :  { %5619 = vsyncadd [#allocation8], 4294966272 }
  0x12   :  { %5620 = dma.done.wait [#allocation10], 1024  }
  0x13   :  { %5621 = vsyncadd [#allocation10], 4294966272 }
  0x14   :  { %5622 = dma.done.wait [#allocation13], 512  }
  0x15   :  { %5623 = vsyncadd [#allocation13], 4294966784  ;;  %vm98_vm0 = vcmask 261120   ;;  %v5630_v1 = vmov 0.0   ;;  %v106_v2 = vld [vmem:[#allocation9 + $0x18] sm:$0xff]  ;;  %v105_v3 = vld [vmem:[#allocation9 + $0x10] sm:$0xff] }
  0x16   :  { %99 = vst.msk [vmem:[#allocation2] sm:$0xff] %vm98_vm0, %v5630_v1  ;;  %v104_v4 = vld [vmem:[#allocation9 + $0x8] sm:$0xff]  ;;  %v5698_v5 = vand.u32 4294901760, %v106_v2  ;;  %v5700_v6 = vand.u32 4294901760, %v105_v3  ;;  %v103_v8 = vld [vmem:[#allocation9] sm:$0xff]  ;;  %s5631_s26 = smov 32  }
  0x17   :  { %100 = vst.msk [vmem:[#allocation3] sm:$0xff] %vm98_vm0, %v5630_v1  ;;  %v5702_v7 = vand.u32 4294901760, %v104_v4  ;;  %v5704_v10 = vand.u32 4294901760, %v103_v8  ;;  %v5774_v39 = vld [vmem:[%s6658_s4] ss:$0 sm:$0xff]  ;;  %v127_v41 = vld [vmem:[#allocation7] sm:$0xff] }
  0x18   :  { %101 = vst.msk [vmem:[#allocation4] sm:$0xff] %vm98_vm0, %v5630_v1  ;;  %v5708_v12 = vsub.f32 %v106_v2, %v5698_v5  ;;  %146 = vmatpush.msra.mxu0 %v5698_v5  ;;  %v5712_v13 = vsub.f32 %v105_v3, %v5700_v6  ;;  %246 = vmatpush.msra.mxu3 %v5698_v5  ;;  %s5632_s27 = smov 64   ;;  %s5633_s16 = smov 96  }
  0x19   :  { %102 = vst.msk [vmem:[#allocation5] sm:$0xff] %vm98_vm0, %v5630_v1  ;;  %v5716_v14 = vsub.f32 %v104_v4, %v5702_v7  ;;  %v5719_v16 = vsub.f32 %v103_v8, %v5704_v10  ;;  %v128_v44 = vadd.f32 %v5774_v39, %v127_v41 }
  0x1a   :  { %217 = vmatpush.msra.mxu2 %v5708_v12  ;;  %148 = vmatpush.msra.mxu0 %v5700_v6  ;;  %v5724_v17 = vand.u32 4294901760, %v5708_v12  ;;  %v5727_v18 = vand.u32 4294901760, %v5712_v13 }
  0x1b   :  { %v5730_v20 = vand.u32 4294901760, %v5716_v14  ;;  %248 = vmatpush.msra.mxu3 %v5700_v6  ;;  %v5734_v21 = vand.u32 4294901760, %v5719_v16 }
  0x1c   :  { %220 = vmatpush.msra.mxu2 %v5712_v13  ;;  %v177_v22 = vsub.f32 %v5708_v12, %v5724_v17  ;;  %150 = vmatpush.msra.mxu0 %v5702_v7  ;;  %v183_v23 = vsub.f32 %v5712_v13, %v5727_v18 }
  0x1d   :  { %v123_v9 = vld [vmem:[#allocation2] sm:$0xff]  ;;  %v189_v24 = vsub.f32 %v5716_v14, %v5730_v20  ;;  %250 = vmatpush.msra.mxu3 %v5702_v7  ;;  %v195_v29 = vsub.f32 %v5719_v16, %v5734_v21 }
  0x1e   :  { %v131_v11 = vsel %vm98_vm0, %v123_v9, 0  ;;  %v5745_v26 = vand.u32 4294901760, %v177_v22  ;;  %223 = vmatpush.msra.mxu2 %v5716_v14  ;;  %v5748_v27 = vand.u32 4294901760, %v183_v23  ;;  %152 = vmatpush.msra.mxu0 %v5704_v10  ;;  %v124_v49 = vld [vmem:[#allocation3] sm:$0xff]  ;;  %v114_v9 = vld [vmem:[#allocation12 + $0x18] sm:$0xff] }
  0x1f   :  { %v153_v15 = vand.u32 4294901760, %v131_v11  ;;  %252 = vmatpush.msra.mxu3 %v5704_v10  ;;  %v5757_v30 = vand.u32 4294901760, %v189_v24  ;;  %v5760_v32 = vand.u32 4294901760, %v195_v29  ;;  %v111_v24 = vld [vmem:[#allocation12] sm:$0xff] }
  0x20   :  { %275 = vmatpush.msrb.mxu0 %v5724_v17  ;;  %179 = vmatpush.msra.mxu1 %v5745_v26  ;;  %v5794_v29 = vand.u32 4294901760, %v111_v24 }
  0x21   :  { %v154_v19 = vsub.f32 %v131_v11, %v153_v15  ;;  %226 = vmatpush.msra.mxu2 %v5719_v16  ;;  %v113_v11 = vld [vmem:[#allocation12 + $0x10] sm:$0xff] }
  0x22   :  { %185 = vmatpush.msra.mxu1 %v5748_v27  ;;  %279 = vmatpush.msrb.mxu0 %v5727_v18  ;;  %v5790_v22 = vand.u32 4294901760, %v113_v11  ;;  %6696 = vst [vmem:[#allocation19_spill] sm:$0xff] %v5794_v29 }
  0x23   :  { %v155_v25 = vand.u32 4294901760, %v154_v19  ;;  %229 = vmatmul.f32.vlgmr.msra.gmra.mxu2 %v154_v19 }
  0x24   :  { %191 = vmatpush.msra.mxu1 %v5757_v30  ;;  %283 = vmatpush.msrb.mxu0 %v5730_v20  ;;  %6694 = vst [vmem:[#allocation17_spill] sm:$0xff] %v5790_v22 }
  0x25   :  { %v156_v28 = vsub.f32 %v154_v19, %v155_v25  ;;  %256 = vmatmul.f32.vlgmr.msra.gmra.mxu3 %v155_v25  ;;  %v5788_v19 = vand.u32 4294901760, %v114_v9  ;;  %v125_v25 = vld [vmem:[#allocation4] sm:$0xff] }
  0x26   :  { %197 = vmatpush.msra.mxu1 %v5760_v32  ;;  %287 = vmatpush.msrb.mxu0 %v5734_v21 }
  0x27   :  { %v157_v31 = vand.u32 4294901760, %v156_v28  ;;  %199 = vmatmul.f32.vlgmr.msra.gmra.mxu1 %v153_v15  ;;  %v110_v28 = vld [vmem:[#allocation11 + $0x18] sm:$0xff]  ;;  %376 = vmatpush.msrb.mxu2 %v5788_v19 }
  0x28   :  { %306 = vmatpush.msrb.mxu1 %v5698_v5 }
  0x29   :  { %158 = vmatmul.f32.vlgmr.msra.gmra.mxu0 %v157_v31  ;;  %v361_v31 = vsel %vm98_vm0, %v125_v25, 0  ;;  %378 = vmatpush.msrb.mxu2 %v5790_v22 }
  0x2a   :  { %308 = vmatpush.msrb.mxu1 %v5700_v6 }
  0x2c   :  { %310 = vmatpush.msrb.mxu1 %v5702_v7 }
  0x2e   :  { %312 = vmatpush.msrb.mxu1 %v5704_v10 }
  0x2f   :  { %314 = vmatmul.f32.vlgmr.msrb.gmra.mxu1 %v153_v15 }
  0x30   :  { %476 = vmatpush.msra.mxu1 %v5788_v19 }
  0x31   :  { %289 = vmatmul.f32.vlgmr.msrb.gmra.mxu0 %v153_v15  ;;  %v112_v15 = vld [vmem:[#allocation12 + $0x8] sm:$0xff] }
  0x32   :  { %v5792_v23 = vand.u32 4294901760, %v112_v15  ;;  %478 = vmatpush.msra.mxu1 %v5790_v22 }
  0x34   :  { %6695 = vst [vmem:[#allocation18_spill] sm:$0xff] %v5792_v23  ;;  %380 = vmatpush.msrb.mxu2 %v5792_v23  ;;  %480 = vmatpush.msra.mxu1 %v5792_v23 }
  0x36   :  { %382 = vmatpush.msrb.mxu2 %v5794_v29  ;;  %482 = vmatpush.msra.mxu1 %v5794_v29 }
  0xa4   :  { %v200_v34 = vpop.f32.mrf.mxu1 }
  0xa6   :  { %v159_v33 = vpop.f32.mrf.mxu0  ;;  %v230_v35 = vpop.f32.mrf.mxu2 }
  0xa7   :  { %v201_v36 = vadd.f32 %v200_v34, %v159_v33  ;;  %v5797_v33 = vand.u32 4294901760, %v110_v28  ;;  %v109_v34 = vld [vmem:[#allocation11 + $0x10] sm:$0xff] }
  0xa8   :  { %v257_v37 = vpop.f32.mrf.mxu3 }
  0xa9   :  { %v231_v38 = vadd.f32 %v230_v35, %v201_v36  ;;  %v5801_v35 = vsub.f32 %v114_v9, %v5788_v19  ;;  %v5804_v36 = vsub.f32 %v113_v11, %v5790_v22  ;;  %v5814_v41 = vsub.f32 %v110_v28, %v5797_v33  ;;  %v108_v9 = vld [vmem:[#allocation11 + $0x8] sm:$0xff] }
  0xaa   :  { %v5895_v11 = vand.u32 4294901760, %v108_v9 }
  0xab   :  { %v258_v42 = vadd.f32 %v257_v37, %v231_v38  ;;  %v5807_v37 = vsub.f32 %v112_v15, %v5792_v23  ;;  %v383_v38 = vand.u32 4294901760, %v361_v31  ;;  %447 = vmatpush.msra.mxu0 %v5801_v35  ;;  %v107_v15 = vld [vmem:[#allocation11] sm:$0xff] }
  0xac   :  { %v315_v45 = vpop.f32.mrf.mxu1  ;;  %v5900_v25 = vand.u32 4294901760, %v107_v15 }
  0xad   :  { %6697 = vst [vmem:[#allocation20_spill] sm:$0xff] %v5807_v37  ;;  %450 = vmatpush.msra.mxu0 %v5804_v36 }
  0xae   :  { %v290_v40 = vpop.f32.mrf.mxu0 }
  0xaf   :  { %v291_v43 = vadd.f32 %v290_v40, %v258_v42  ;;  %v5811_v40 = vsub.f32 %v111_v24, %v5794_v29  ;;  %v5816_v42 = vand.u32 4294901760, %v109_v34  ;;  %453 = vmatpush.msra.mxu0 %v5807_v37  ;;  %v5898_v24 = vsub.f32 %v108_v9, %v5895_v11 }
  0xb1   :  { %v316_v46 = vadd.f32 %v315_v45, %v291_v43  ;;  %6698 = vst [vmem:[#allocation21_spill] sm:$0xff] %v5811_v40  ;;  %v5820_v43 = vand.u32 4294901760, %v5801_v35  ;;  %v5826_v45 = vand.u32 4294901760, %v5807_v37  ;;  %456 = vmatpush.msra.mxu0 %v5811_v40  ;;  %v5905_v28 = vand.u32 4294901760, %v5898_v24 }
  0xb3   :  { %v318_v47 = vadd.f32 %v316_v46, %v128_v44  ;;  %6699 = vst [vmem:[#allocation22_spill] sm:$0xff] %v5820_v43  ;;  %v5823_v44 = vand.u32 4294901760, %v5804_v36  ;;  %v384_v46 = vsub.f32 %v361_v31, %v383_v38  ;;  %505 = vmatpush.msra.mxu2 %v5820_v43  ;;  %566 = vmatpush.msrb.mxu0 %v5797_v33 }
  0xb4   :  { %6701 = vst [vmem:[#allocation24_spill] sm:$0xff] %v5826_v45  ;;  %v609_v31 = vsub.f32 %v5898_v24, %v5905_v28 }
  0xb5   :  { %5386 = vtanh.f32 %v318_v47  ;;  %v5355_v50 = vmul.f32 -1.442695, %v318_v47  ;;  %6700 = vst [vmem:[#allocation23_spill] sm:$0xff] %v5823_v44  ;;  %v5830_v47 = vand.u32 4294901760, %v5811_v40  ;;  %509 = vmatpush.msra.mxu2 %v5823_v44  ;;  %459 = vmatmul.f32.vlgmr.msra.gmra.mxu0 %v384_v46 }
  0xb6   :  { %568 = vmatpush.msrb.mxu0 %v5816_v42 }
  0xb7   :  { %5388 = vpow2.f32 %v5355_v50  ;;  %6702 = vst [vmem:[#allocation25_spill] sm:$0xff] %v5830_v47  ;;  %v407_v50 = vsub.f32 %v5801_v35, %v5820_v43  ;;  %513 = vmatpush.msra.mxu2 %v5826_v45 }
  0xb8   :  { %570 = vmatpush.msrb.mxu0 %v5895_v11 }
  0xb9   :  { %517 = vmatpush.msra.mxu2 %v5830_v47 }
  0xba   :  { %572 = vmatpush.msrb.mxu0 %v5900_v25 }
  0xbb   :  { %v5387_v48 = vpop.eup %5386 }
  0xbc   :  { %345 = vrot.lane.b32.xlu0 %v5387_v48, %s5631_s26  ;;  %v5834_v48 = vand.u32 4294901760, %v5814_v41 }
  0xbd   :  { %v5389_v51 = vpop.eup %5388 }
  0xbe   :  { %v322_v52 = vadd.f32 1.0, %v5389_v51  ;;  %v413_v51 = vsub.f32 %v5804_v36, %v5823_v44  ;;  %695 = vmatpush.msra.mxu0 %v5834_v48 }
  0xc0   :  { %5390 = vrcp.f32 %v322_v52  ;;  %v334_v58 = vand.u32 2147483648, %v322_v52  ;;  %vm328_vm2 = vweird.f32 %v322_v52  ;;  %v332_v59 = vand.u32 2147483647, %v322_v52 }
  0xc2   :  { %v335_v61 = vor.u32 1.1754944e-38, %v334_v58  ;;  %vm333_vm4 = vcmp.eq.f32.partialorder %v332_v59, 8.507059e+37  ;;  %v425_v59 = vsub.f32 %v5811_v40, %v5830_v47 }
  0xc4   :  { %340 = vrot.lane.b32.xlu0 %v124_v49, %s5631_s26  ;;  %v5837_v49 = vsub.f32 %v109_v34, %v5816_v42 }
  0xc6   :  { %v5391_v53 = vpop.eup %5390 }
  0xc7   :  { %v324_v54 = vmul.f32 %v5391_v53, %v322_v52  ;;  %vm329_vm1 = vweird.f32 %v5391_v53  ;;  %v419_v52 = vsub.f32 %v5807_v37, %v5826_v45 }
  0xc8   :  { %vm330_vm3 = vmor %vm328_vm2, %vm329_vm1 }
  0xc9   :  { %v325_v55 = vsub.f32 1.0, %v324_v54  ;;  %v597_v54 = vsub.f32 %v5814_v41, %v5834_v48 }
  0xcb   :  { %v326_v56 = vmul.f32 %v5391_v53, %v325_v55  ;;  %v5851_v55 = vand.u32 4294901760, %v5837_v49 }
  0xcd   :  { %v327_v57 = vadd.f32 %v5391_v53, %v326_v56  ;;  %v5853_v56 = vand.u32 4294901760, %v407_v50  ;;  %699 = vmatpush.msra.mxu0 %v5851_v55 }
  0xcf   :  { %v331_v60 = vsel %vm330_vm3, %v5391_v53, %v327_v57  ;;  %v385_v53 = vand.u32 4294901760, %v384_v46  ;;  %v5855_v57 = vand.u32 4294901760, %v413_v51  ;;  %409 = vmatpush.msrb.mxu3 %v5853_v56  ;;  %703 = vmatpush.msra.mxu0 %v5905_v28  ;;  %v126_v51 = vld [vmem:[#allocation5] sm:$0xff] }
  0xd0   :  { %v5779_v63 = vsel %vm333_vm4, %v335_v61, %v331_v60  ;;  %v5862_v60 = vand.u32 4294901760, %v597_v54  ;;  %v603_v61 = vsub.f32 %v5837_v49, %v5851_v55 }
  0xd1   :  { %v386_v58 = vsub.f32 %v384_v46, %v385_v53  ;;  %486 = vmatmul.f32.vlgmr.msra.gmra.mxu1 %v385_v53  ;;  %415 = vmatpush.msrb.mxu3 %v5855_v57 }
  0xd2   :  { %6703 = vst [vmem:[#allocation26_spill] sm:$0xff] %v5862_v60  ;;  %599 = vmatpush.msrb.mxu1 %v5862_v60 }
 0x12e   :  { %v346_v62 = vpop.permute.xlu0 %345 }
 0x12f   :  { %v348_v0 = vmul.f32 %v346_v62, %v5779_v63  ;;  %v5867_v62 = vand.u32 4294901760, %v419_v52 }
 0x131   :  { %350 = vrot.lane.b32.xlu1 %v348_v0, %s5631_s26  ;;  %v387_v0 = vand.u32 4294901760, %v386_v58  ;;  %421 = vmatpush.msrb.mxu3 %v5867_v62 }
 0x133   :  { %388 = vmatmul.f32.vlgmr.msrb.gmra.mxu2 %v387_v0 }
 0x134   :  { %637 = vmatpush.msrb.mxu2 %v5814_v41 }
 0x136   :  { %v341_v1 = vpop.permute.xlu0 %340  ;;  %640 = vmatpush.msrb.mxu2 %v5837_v49 }
 0x137   :  { %v343_v2 = vmul.f32 %v341_v1, %v5779_v63  ;;  %v5872_v1 = vand.u32 4294901760, %v603_v61 }
 0x138   :  { %643 = vmatpush.msrb.mxu2 %v5898_v24 }
 0x139   :  { %6704 = vst [vmem:[#allocation27_spill] sm:$0xff] %v5872_v1  ;;  %605 = vmatpush.msrb.mxu1 %v5872_v1 }
 0x13b   :  { %519 = vmatmul.f32.vlgmr.msra.gmra.mxu2 %v383_v38 }
 0x1a3   :  { %v351_v3 = vpop.permute.xlu1 %350 }
 0x1a4   :  { %v5784_v4 = vadd.f32 %v351_v3, %v343_v2  ;;  %v5875_v2 = vand.u32 4294901760, %v425_v59 }
 0x1a6   :  { %5392 = vtanh.f32 %v5784_v4  ;;  %427 = vmatpush.msrb.mxu3 %v5875_v2 }
 0x1a7   :  { %429 = vmatmul.f32.vlgmr.msrb.gmra.mxu3 %v383_v38 }
 0x1a8   :  { %536 = vmatpush.msra.mxu3 %v5788_v19 }
 0x1aa   :  { %538 = vmatpush.msra.mxu3 %v5790_v22 }
 0x1ac   :  { %v5393_v8 = vpop.eup %5392  ;;  %540 = vmatpush.msra.mxu3 %v5792_v23 }
 0x1ad   :  { %356 = vrot.lane.b32.xlu1 %v5393_v8, %s5631_s26 }
 0x1ae   :  { %542 = vmatpush.msra.mxu3 %v5794_v29 }
 0x1af   :  { %544 = vmatmul.f32.vlgmr.msra.gmra.mxu3 %v383_v38  ;;  %v5923_v38 = vand.u32 4294901760, %v609_v31 }
 0x1b0   :  { %666 = vmatpush.msrb.mxu3 %v5797_v33 }
 0x1b1   :  { %6705 = vst [vmem:[#allocation28_spill] sm:$0xff] %v5923_v38  ;;  %611 = vmatpush.msrb.mxu1 %v5923_v38 }
 0x1b2   :  { %668 = vmatpush.msrb.mxu3 %v5816_v42 }
 0x1b4   :  { %670 = vmatpush.msrb.mxu3 %v5895_v11 }
 0x1b5   :  { %760 = vrot.lane.b32.xlu1 %v126_v51, %s5631_s26 }
 0x1b6   :  { %672 = vmatpush.msrb.mxu3 %v5900_v25 }
 0x1b8   :  { %829 = vmatpush.msra.mxu3 %v5745_v26 }
 0x1ba   :  { %835 = vmatpush.msra.mxu3 %v5748_v27 }
 0x1bc   :  { %841 = vmatpush.msra.mxu3 %v5757_v30 }
 0x1be   :  { %847 = vmatpush.msra.mxu3 %v5760_v32 }
 0x21f   :  { %v357_v3 = vpop.permute.xlu1 %356 }
 0x220   :  { %v359_v8 = vmul.f32 %v357_v3, %v5779_v63  ;;  %v5908_v63 = vsub.f32 %v107_v15, %v5900_v25  ;;  %v389_v3 = vpop.f32.mrf.mxu2  ;;  %v460_v15 = vpop.f32.mrf.mxu0 }
 0x222   :  { %549 = vrot.lane.b32.xlu2 %v359_v8, %s5632_s27  ;;  %v5917_v34 = vand.u32 4294901760, %v5908_v63  ;;  %646 = vmatpush.msrb.mxu2 %v5908_v63 }
 0x224   :  { %796 = vmatpush.msra.mxu2 %v5698_v5  ;;  %v615_v46 = vsub.f32 %v5908_v63, %v5917_v34  ;;  %707 = vmatpush.msra.mxu0 %v5917_v34 }
 0x226   :  { %798 = vmatpush.msra.mxu2 %v5700_v6  ;;  %v5931_v50 = vand.u32 4294901760, %v615_v46  ;;  %v487_v46 = vpop.f32.mrf.mxu1 }
 0x228   :  { %6706 = vst [vmem:[#allocation29_spill] sm:$0xff] %v5931_v50  ;;  %800 = vmatpush.msra.mxu2 %v5702_v7  ;;  %617 = vmatpush.msrb.mxu1 %v5931_v50  ;;  %v520_v51 = vpop.f32.mrf.mxu2 }
 0x22a   :  { %726 = vmatpush.msra.mxu1 %v5797_v33  ;;  %802 = vmatpush.msra.mxu2 %v5704_v10  ;;  %v430_v8 = vpop.f32.mrf.mxu3 }
 0x22b   :  { %v431_v9 = vadd.f32 %v430_v8, %v389_v3  ;;  %v5996_v3 = vld [vmem:[%s6659_s5] ss:$0 sm:$0xff] }
 0x22c   :  { %728 = vmatpush.msra.mxu1 %v5816_v42 }
 0x22d   :  { %v461_v31 = vadd.f32 %v460_v15, %v431_v9 }
 0x22e   :  { %730 = vmatpush.msra.mxu1 %v5895_v11 }
 0x230   :  { %732 = vmatpush.msra.mxu1 %v5900_v25 }
 0x27c   :  { %v550_v52 = vpop.permute.xlu2 %549 }
 0x27d   :  { %v551_v53 = vsel %vm98_vm0, %v550_v52, 0  ;;  %v488_v52 = vadd.f32 %v487_v46, %v461_v31 }
 0x27e   :  { %v573_v54 = vand.u32 4294901760, %v551_v53 }
 0x280   :  { %v574_v58 = vsub.f32 %v551_v53, %v573_v54  ;;  %619 = vmatmul.f32.vlgmr.msrb.gmra.mxu1 %v573_v54  ;;  %v545_v53 = vpop.f32.mrf.mxu3 }
 0x281   :  { %896 = vmatpush.msrb.mxu1 %v5698_v5 }
 0x282   :  { %649 = vmatmul.f32.vlgmr.msrb.gmra.mxu2 %v574_v58  ;;  %v575_v59 = vand.u32 4294901760, %v574_v58 }
 0x283   :  { %898 = vmatpush.msrb.mxu1 %v5700_v6  ;;  %925 = vmatpush.msrb.mxu2 %v5724_v17 }
 0x284   :  { %676 = vmatmul.f32.vlgmr.msrb.gmra.mxu3 %v575_v59  ;;  %v576_v61 = vsub.f32 %v574_v58, %v575_v59 }
 0x285   :  { %900 = vmatpush.msrb.mxu1 %v5702_v7  ;;  %929 = vmatpush.msrb.mxu2 %v5727_v18 }
 0x286   :  { %v577_v0 = vand.u32 4294901760, %v576_v61  ;;  %956 = vmatpush.msrb.mxu3 %v5698_v5 }
 0x287   :  { %902 = vmatpush.msrb.mxu1 %v5704_v10  ;;  %933 = vmatpush.msrb.mxu2 %v5730_v20 }
 0x288   :  { %578 = vmatmul.f32.vlgmr.msrb.gmra.mxu0 %v577_v0  ;;  %734 = vmatmul.f32.vlgmr.msra.gmra.mxu1 %v573_v54 }
 0x289   :  { %958 = vmatpush.msrb.mxu3 %v5700_v6  ;;  %867 = vmatpush.msrb.mxu0 %v5708_v12 }
 0x28a   :  { %808 = vmatmul.f32.vlgmr.msra.gmra.mxu2 %v577_v0  ;;  %1057 = vmatpush.msra.mxu1 %v5853_v56 }
 0x28b   :  { %937 = vmatpush.msrb.mxu2 %v5734_v21  ;;  %960 = vmatpush.msrb.mxu3 %v5702_v7 }
 0x28c   :  { %849 = vmatmul.f32.vlgmr.msra.gmra.mxu3 %v573_v54  ;;  %870 = vmatpush.msrb.mxu0 %v5712_v13 }
 0x28d   :  { %962 = vmatpush.msrb.mxu3 %v5704_v10  ;;  %1063 = vmatpush.msra.mxu1 %v5855_v57 }
 0x28e   :  { %873 = vmatpush.msrb.mxu0 %v5716_v14  ;;  %1095 = vmatpush.msra.mxu2 %v5801_v35 }
 0x28f   :  { %1069 = vmatpush.msra.mxu1 %v5867_v62  ;;  %1124 = vmatpush.msra.mxu3 %v5788_v19 }
 0x290   :  { %709 = vmatmul.f32.vlgmr.msra.gmra.mxu0 %v573_v54  ;;  %906 = vmatmul.f32.vlgmr.msrb.gmra.mxu1 %v575_v59 }
 0x291   :  { %876 = vmatpush.msrb.mxu0 %v5719_v16  ;;  %1098 = vmatpush.msra.mxu2 %v5804_v36 }
 0x292   :  { %939 = vmatmul.f32.vlgmr.msrb.gmra.mxu2 %v573_v54  ;;  %1075 = vmatpush.msra.mxu1 %v5875_v2 }
 0x293   :  { %1101 = vmatpush.msra.mxu2 %v5807_v37  ;;  %1126 = vmatpush.msra.mxu3 %v5790_v22 }
 0x294   :  { %964 = vmatmul.f32.vlgmr.msrb.gmra.mxu3 %v573_v54  ;;  %1024 = vmatpush.msra.mxu0 %v5788_v19  ;;  %v521_v54 = vadd.f32 %v520_v51, %v488_v52 }
 0x295   :  { %1104 = vmatpush.msra.mxu2 %v5811_v40  ;;  %1128 = vmatpush.msra.mxu3 %v5792_v23 }
 0x296   :  { %1184 = vmatpush.msrb.mxu1 %v5788_v19  ;;  %1026 = vmatpush.msra.mxu0 %v5790_v22  ;;  %v546_v59 = vadd.f32 %v545_v53, %v521_v54 }
 0x297   :  { %1130 = vmatpush.msra.mxu3 %v5794_v29  ;;  %1214 = vmatpush.msrb.mxu2 %v5797_v33 }
 0x298   :  { %879 = vmatmul.f32.vlgmr.msrb.gmra.mxu0 %v574_v58  ;;  %1186 = vmatpush.msrb.mxu1 %v5790_v22 }
 0x299   :  { %1028 = vmatpush.msra.mxu0 %v5792_v23  ;;  %1247 = vmatpush.msrb.mxu3 %v5862_v60 }
 0x29a   :  { %1188 = vmatpush.msrb.mxu1 %v5792_v23  ;;  %1216 = vmatpush.msrb.mxu2 %v5816_v42 }
 0x29b   :  { %1030 = vmatpush.msra.mxu0 %v5794_v29  ;;  %1253 = vmatpush.msrb.mxu3 %v5872_v1 }
 0x29c   :  { %1190 = vmatpush.msrb.mxu1 %v5794_v29  ;;  %1218 = vmatpush.msrb.mxu2 %v5895_v11 }
 0x29d   :  { %1153 = vmatpush.msrb.mxu0 %v5820_v43  ;;  %1259 = vmatpush.msrb.mxu3 %v5923_v38 }
 0x29e   :  { %1220 = vmatpush.msrb.mxu2 %v5900_v25 }
 0x29f   :  { %1157 = vmatpush.msrb.mxu0 %v5823_v44  ;;  %1265 = vmatpush.msrb.mxu3 %v5931_v50 }
 0x2a1   :  { %1161 = vmatpush.msrb.mxu0 %v5826_v45 }
 0x2a3   :  { %1165 = vmatpush.msrb.mxu0 %v5830_v47 }
 0x2fd   :  { %v620_v58 = vpop.f32.mrf.mxu1 }
 0x305   :  { %v579_v61 = vpop.f32.mrf.mxu0  ;;  %v650_v0 = vpop.f32.mrf.mxu2 }
 0x306   :  { %v580_v50 = vadd.f32 %v579_v61, %v546_v59  ;;  %v735_v47 = vpop.f32.mrf.mxu1 }
 0x307   :  { %v677_v44 = vpop.f32.mrf.mxu3 }
 0x308   :  { %v621_v38 = vadd.f32 %v620_v58, %v580_v50 }
 0x30a   :  { %v651_v45 = vadd.f32 %v650_v0, %v621_v38  ;;  %v781_v38 = vld [vmem:[#allocation7 + $0x8] sm:$0xff] }
 0x30b   :  { %v782_v59 = vadd.f32 %v5774_v39, %v781_v38 }
 0x30c   :  { %v678_v43 = vadd.f32 %v677_v44, %v651_v45 }
 0x30d   :  { %v710_v1 = vpop.f32.mrf.mxu0  ;;  %v809_v9 = vpop.f32.mrf.mxu2 }
 0x30e   :  { %v711_v8 = vadd.f32 %v710_v1, %v678_v43  ;;  %v907_v50 = vpop.f32.mrf.mxu1 }
 0x30f   :  { %v850_v31 = vpop.f32.mrf.mxu3 }
 0x310   :  { %v736_v15 = vadd.f32 %v735_v47, %v711_v8  ;;  %v851_v51 = vadd.f32 %v850_v31, %v809_v9 }
 0x312   :  { %v738_v46 = vadd.f32 %v5996_v3, %v736_v15 }
 0x314   :  { %5394 = vtanh.f32 %v738_v46  ;;  %v5356_v0 = vmul.f32 -1.442695, %v738_v46 }
 0x315   :  { %v880_v52 = vpop.f32.mrf.mxu0  ;;  %v940_v45 = vpop.f32.mrf.mxu2 }
 0x316   :  { %v881_v53 = vadd.f32 %v880_v52, %v851_v51 }
 0x317   :  { %v965_v61 = vpop.f32.mrf.mxu3 }
 0x318   :  { %v908_v44 = vadd.f32 %v907_v50, %v881_v53 }
 0x31a   :  { %v5395_v54 = vpop.eup %5394  ;;  %v941_v58 = vadd.f32 %v940_v45, %v908_v44 }
 0x31b   :  { %765 = vrot.lane.b32.xlu2 %v5395_v54, %s5631_s26 }
 0x31c   :  { %v966_v43 = vadd.f32 %v965_v61, %v941_v58 }
 0x31e   :  { %v968_v47 = vadd.f32 %v966_v43, %v782_v59 }
 0x320   :  { %5396 = vtanh.f32 %v968_v47  ;;  %v5357_v53 = vmul.f32 -1.442695, %v968_v47 }
 0x321   :  { %5398 = vpow2.f32 %v5356_v0 }
 0x326   :  { %v5397_v1 = vpop.eup %5396 }
 0x327   :  { %991 = vrot.lane.b32.xlu0 %v5397_v1, %s5631_s26  ;;  %v5399_v8 = vpop.eup %5398 }
 0x328   :  { %v742_v9 = vadd.f32 1.0, %v5399_v8 }
 0x32a   :  { %5400 = vrcp.f32 %v742_v9  ;;  %v754_v38 = vand.u32 2147483648, %v742_v9  ;;  %vm748_vm6 = vweird.f32 %v742_v9  ;;  %v752_v44 = vand.u32 2147483647, %v742_v9 }
 0x32b   :  { %5402 = vpow2.f32 %v5357_v53 }
 0x32c   :  { %v755_v54 = vor.u32 1.1754944e-38, %v754_v38  ;;  %vm753_vm8 = vcmp.eq.f32.partialorder %v752_v44, 8.507059e+37  ;;  %v761_v44 = vpop.permute.xlu1 %760 }
 0x330   :  { %v5401_v15 = vpop.eup %5400 }
 0x331   :  { %v744_v31 = vmul.f32 %v5401_v15, %v742_v9  ;;  %vm749_vm5 = vweird.f32 %v5401_v15  ;;  %v5403_v59 = vpop.eup %5402 }
 0x332   :  { %vm750_vm7 = vmor %vm748_vm6, %vm749_vm5  ;;  %v972_v43 = vadd.f32 1.0, %v5403_v59 }
 0x333   :  { %v745_v51 = vsub.f32 1.0, %v744_v31 }
 0x334   :  { %5404 = vrcp.f32 %v972_v43  ;;  %vm978_vm10 = vweird.f32 %v972_v43  ;;  %v982_v9 = vand.u32 2147483647, %v972_v43 }
 0x335   :  { %v746_v52 = vmul.f32 %v5401_v15, %v745_v51  ;;  %v984_v51 = vand.u32 2147483648, %v972_v43 }
 0x336   :  { %vm983_vm12 = vcmp.eq.f32.partialorder %v982_v9, 8.507059e+37 }
 0x337   :  { %v747_v50 = vadd.f32 %v5401_v15, %v746_v52  ;;  %v985_v52 = vor.u32 1.1754944e-38, %v984_v51 }
 0x339   :  { %v751_v45 = vsel %vm750_vm7, %v5401_v15, %v747_v50 }
 0x33a   :  { %v756_v46 = vsel %vm753_vm8, %v755_v54, %v751_v45  ;;  %v5405_v1 = vpop.eup %5404 }
 0x33b   :  { %v974_v47 = vmul.f32 %v5405_v1, %v972_v43  ;;  %vm979_vm9 = vweird.f32 %v5405_v1  ;;  %v763_v45 = vmul.f32 %v761_v44, %v756_v46 }
 0x33c   :  { %vm980_vm11 = vmor %vm978_vm10, %vm979_vm9 }
 0x33d   :  { %v975_v0 = vsub.f32 1.0, %v974_v47 }
 0x33f   :  { %v976_v8 = vmul.f32 %v5405_v1, %v975_v0 }
 0x341   :  { %v977_v31 = vadd.f32 %v5405_v1, %v976_v8 }
 0x343   :  { %v981_v15 = vsel %vm980_vm11, %v5405_v1, %v977_v31 }
 0x344   :  { %v986_v50 = vsel %vm983_vm12, %v985_v52, %v981_v15 }
 0x375   :  { %v766_v58 = vpop.permute.xlu2 %765 }
 0x376   :  { %v768_v61 = vmul.f32 %v766_v58, %v756_v46 }
 0x378   :  { %770 = vrot.lane.b32.xlu2 %v768_v61, %s5631_s26  ;;  %v989_v61 = vmul.f32 %v986_v50, %v5784_v4 }
 0x399   :  { %v992_v53 = vpop.permute.xlu0 %991 }
 0x39a   :  { %v994_v38 = vmul.f32 %v992_v53, %v986_v50 }
 0x39c   :  { %996 = vrot.lane.b32.xlu0 %v994_v38, %s5631_s26 }
 0x3d2   :  { %v771_v54 = vpop.permute.xlu2 %770 }
 0x3d3   :  { %v6004_v58 = vadd.f32 %v771_v54, %v763_v45 }
 0x3d5   :  { %5406 = vtanh.f32 %v6004_v58 }
 0x3db   :  { %v5407_v59 = vpop.eup %5406 }
 0x3dc   :  { %776 = vrot.lane.b32.xlu1 %v5407_v59, %s5631_s26 }
 0x40e   :  { %v997_v43 = vpop.permute.xlu0 %996 }
 0x40f   :  { %v6009_v1 = vadd.f32 %v997_v43, %v989_v61 }
 0x411   :  { %5408 = vtanh.f32 %v6009_v1 }
 0x417   :  { %v5409_v47 = vpop.eup %5408 }
 0x418   :  { %1002 = vrot.lane.b32.xlu2 %v5409_v47, %s5631_s26  ;;  %v6707_v47 = vld [vmem:[#allocation27_spill] sm:$0xff] }
 0x44e   :  { %v777_v0 = vpop.permute.xlu1 %776 }
 0x44f   :  { %v779_v8 = vmul.f32 %v777_v0, %v756_v46  ;;  %v6708_v0 = vld [vmem:[#allocation22_spill] sm:$0xff] }
 0x451   :  { %1007 = vrot.lane.b32.xlu0 %v779_v8, %s5632_s27  ;;  %v6709_v8 = vld [vmem:[#allocation28_spill] sm:$0xff] }
 0x472   :  { %v1003_v31 = vpop.permute.xlu2 %1002 }
 0x473   :  { %v1005_v51 = vmul.f32 %v1003_v31, %v986_v50  ;;  %v6710_v31 = vld [vmem:[#allocation23_spill] sm:$0xff] }
 0x475   :  { %1197 = vrot.lane.b32.xlu1 %v1005_v51, %s5632_s27  ;;  %v6711_v51 = vld [vmem:[#allocation29_spill] sm:$0xff] }
 0x4c3   :  { %v1008_v9 = vpop.permute.xlu0 %1007 }
 0x4c4   :  { %v1009_v15 = vsel %vm98_vm0, %v1008_v9, 0  ;;  %v6712_v9 = vld [vmem:[#allocation24_spill] sm:$0xff] }
 0x4c5   :  { %v1031_v4 = vand.u32 4294901760, %v1009_v15 }
 0x4c7   :  { %v1032_v52 = vsub.f32 %v1009_v15, %v1031_v4  ;;  %1077 = vmatmul.f32.vlgmr.msra.gmra.mxu1 %v1031_v4  ;;  %v6713_v15 = vld [vmem:[#allocation25_spill] sm:$0xff] }
 0x4c8   :  { %1314 = vmatpush.msra.mxu1 %v5797_v33 }
 0x4c9   :  { %v1033_v53 = vand.u32 4294901760, %v1032_v52  ;;  %1107 = vmatmul.f32.vlgmr.msra.gmra.mxu2 %v1032_v52 }
 0x4ca   :  { %1316 = vmatpush.msra.mxu1 %v5816_v42  ;;  %1343 = vmatpush.msra.mxu2 %v5834_v48 }
 0x4cb   :  { %v1034_v46 = vsub.f32 %v1032_v52, %v1033_v53  ;;  %1134 = vmatmul.f32.vlgmr.msra.gmra.mxu3 %v1033_v53 }
 0x4cc   :  { %1318 = vmatpush.msra.mxu1 %v5895_v11  ;;  %1374 = vmatpush.msra.mxu3 %v5797_v33 }
 0x4cd   :  { %v1035_v50 = vand.u32 4294901760, %v1034_v46  ;;  %1347 = vmatpush.msra.mxu2 %v5851_v55 }
 0x4ce   :  { %1320 = vmatpush.msra.mxu1 %v5900_v25  ;;  %1376 = vmatpush.msra.mxu3 %v5816_v42 }
 0x4cf   :  { %1036 = vmatmul.f32.vlgmr.msra.gmra.mxu0 %v1035_v50  ;;  %1192 = vmatmul.f32.vlgmr.msrb.gmra.mxu1 %v1031_v4 }
 0x4d0   :  { %1285 = vmatpush.msra.mxu0 %v5814_v41  ;;  %1378 = vmatpush.msra.mxu3 %v5895_v11 }
 0x4d1   :  { %1473 = vmatpush.msrb.mxu1 %v5745_v26  ;;  %1351 = vmatpush.msra.mxu2 %v5905_v28 }
 0x4d2   :  { %1288 = vmatpush.msra.mxu0 %v5837_v49  ;;  %1380 = vmatpush.msra.mxu3 %v5900_v25 }
 0x4d3   :  { %1479 = vmatpush.msrb.mxu1 %v5748_v27  ;;  %1355 = vmatpush.msra.mxu2 %v5917_v34 }
 0x4d4   :  { %1291 = vmatpush.msra.mxu0 %v5898_v24 }
 0x4d5   :  { %1485 = vmatpush.msrb.mxu1 %v5757_v30 }
 0x4d6   :  { %1294 = vmatpush.msra.mxu0 %v5908_v63 }
 0x4d7   :  { %1167 = vmatmul.f32.vlgmr.msrb.gmra.mxu0 %v1031_v4  ;;  %1491 = vmatpush.msrb.mxu1 %v5760_v32 }
 0x4d8   :  { %1440 = vmatpush.msrb.mxu0 %v5698_v5 }
 0x4da   :  { %1442 = vmatpush.msrb.mxu0 %v5700_v6 }
 0x4dc   :  { %1444 = vmatpush.msrb.mxu0 %v5702_v7 }
 0x4de   :  { %1446 = vmatpush.msrb.mxu0 %v5704_v10 }
 0x4e7   :  { %v1198_v38 = vpop.permute.xlu1 %1197 }
 0x4e8   :  { %v1199_v44 = vsel %vm98_vm0, %v1198_v38, 0 }
 0x4e9   :  { %v1221_v45 = vand.u32 4294901760, %v1199_v44 }
 0x4eb   :  { %v1222_v54 = vsub.f32 %v1199_v44, %v1221_v45  ;;  %1267 = vmatmul.f32.vlgmr.msrb.gmra.mxu3 %v1221_v45 }
 0x4ec   :  { %1540 = vmatpush.msrb.mxu3 %v5698_v5 }
 0x4ed   :  { %1297 = vmatmul.f32.vlgmr.msra.gmra.mxu0 %v1222_v54  ;;  %v1223_v59 = vand.u32 4294901760, %v1222_v54 }
 0x4ee   :  { %1542 = vmatpush.msrb.mxu3 %v5700_v6  ;;  %1569 = vmatpush.msra.mxu0 %v5724_v17 }
 0x4ef   :  { %1324 = vmatmul.f32.vlgmr.msra.gmra.mxu1 %v1223_v59  ;;  %v1224_v61 = vsub.f32 %v1222_v54, %v1223_v59 }
 0x4f0   :  { %1544 = vmatpush.msrb.mxu3 %v5702_v7  ;;  %1573 = vmatpush.msra.mxu0 %v5727_v18 }
 0x4f1   :  { %v1225_v43 = vand.u32 4294901760, %v1224_v61  ;;  %1600 = vmatpush.msra.mxu1 %v5698_v5 }
 0x4f2   :  { %1546 = vmatpush.msrb.mxu3 %v5704_v10  ;;  %1577 = vmatpush.msra.mxu0 %v5730_v20 }
 0x4f3   :  { %1226 = vmatmul.f32.vlgmr.msrb.gmra.mxu2 %v1225_v43  ;;  %1382 = vmatmul.f32.vlgmr.msra.gmra.mxu3 %v1221_v45 }
 0x4f4   :  { %1602 = vmatpush.msra.mxu1 %v5700_v6  ;;  %1511 = vmatpush.msrb.mxu2 %v5708_v12 }
 0x4f5   :  { %1452 = vmatmul.f32.vlgmr.msrb.gmra.mxu0 %v1225_v43  ;;  %1701 = vmatpush.msra.mxu3 %v5853_v56 }
 0x4f6   :  { %1581 = vmatpush.msra.mxu0 %v5734_v21  ;;  %1604 = vmatpush.msra.mxu1 %v5702_v7 }
 0x4f7   :  { %1493 = vmatmul.f32.vlgmr.msrb.gmra.mxu1 %v1221_v45  ;;  %1514 = vmatpush.msrb.mxu2 %v5712_v13 }
 0x4f8   :  { %1606 = vmatpush.msra.mxu1 %v5704_v10  ;;  %1707 = vmatpush.msra.mxu3 %v5855_v57 }
 0x4f9   :  { %1517 = vmatpush.msrb.mxu2 %v5716_v14  ;;  %1739 = vmatpush.msrb.mxu0 %v5801_v35 }
 0x4fa   :  { %1713 = vmatpush.msra.mxu3 %v5867_v62  ;;  %1768 = vmatpush.msrb.mxu1 %v5788_v19 }
 0x4fb   :  { %1357 = vmatmul.f32.vlgmr.msra.gmra.mxu2 %v1221_v45  ;;  %1550 = vmatmul.f32.vlgmr.msrb.gmra.mxu3 %v1223_v59 }
 0x4fc   :  { %1520 = vmatpush.msrb.mxu2 %v5719_v16  ;;  %1742 = vmatpush.msrb.mxu0 %v5804_v36 }
 0x4fd   :  { %1583 = vmatmul.f32.vlgmr.msra.gmra.mxu0 %v1221_v45  ;;  %1719 = vmatpush.msra.mxu3 %v5875_v2 }
 0x4fe   :  { %1745 = vmatpush.msrb.mxu0 %v5807_v37  ;;  %1770 = vmatpush.msrb.mxu1 %v5790_v22 }
 0x4ff   :  { %1608 = vmatmul.f32.vlgmr.msra.gmra.mxu1 %v1221_v45  ;;  %1668 = vmatpush.msra.mxu2 %v5788_v19 }
 0x500   :  { %1748 = vmatpush.msrb.mxu0 %v5811_v40  ;;  %1772 = vmatpush.msrb.mxu1 %v5792_v23 }
 0x501   :  { %1828 = vmatpush.msrb.mxu3 %v5788_v19  ;;  %1670 = vmatpush.msra.mxu2 %v5790_v22 }
 0x502   :  { %1774 = vmatpush.msrb.mxu1 %v5794_v29  ;;  %1858 = vmatpush.msra.mxu0 %v5797_v33 }
 0x503   :  { %1523 = vmatmul.f32.vlgmr.msrb.gmra.mxu2 %v1222_v54  ;;  %1830 = vmatpush.msrb.mxu3 %v5790_v22 }
 0x504   :  { %1672 = vmatpush.msra.mxu2 %v5792_v23  ;;  %1891 = vmatpush.msra.mxu1 %v5862_v60 }
 0x505   :  { %1832 = vmatpush.msrb.mxu3 %v5792_v23  ;;  %1860 = vmatpush.msra.mxu0 %v5816_v42 }
 0x506   :  { %1674 = vmatpush.msra.mxu2 %v5794_v29  ;;  %1897 = vmatpush.msra.mxu1 %v6707_v47 }
 0x507   :  { %1834 = vmatpush.msrb.mxu3 %v5794_v29  ;;  %1862 = vmatpush.msra.mxu0 %v5895_v11 }
 0x508   :  { %1797 = vmatpush.msrb.mxu2 %v6708_v0  ;;  %1903 = vmatpush.msra.mxu1 %v6709_v8 }
 0x509   :  { %1864 = vmatpush.msra.mxu0 %v5900_v25 }
 0x50a   :  { %1801 = vmatpush.msrb.mxu2 %v6710_v31  ;;  %1909 = vmatpush.msra.mxu1 %v6711_v51 }
 0x50c   :  { %1805 = vmatpush.msrb.mxu2 %v6712_v9 }
 0x50e   :  { %1809 = vmatpush.msrb.mxu2 %v6713_v15 }
 0x544   :  { %v1078_v52 = vpop.f32.mrf.mxu1 }
 0x54c   :  { %v1037_v4 = vpop.f32.mrf.mxu0  ;;  %v1108_v46 = vpop.f32.mrf.mxu2 }
 0x54d   :  { %v1079_v53 = vadd.f32 %v1078_v52, %v1037_v4  ;;  %v1193_v54 = vpop.f32.mrf.mxu1 }
 0x54e   :  { %v1135_v38 = vpop.f32.mrf.mxu3 }
 0x54f   :  { %v1109_v50 = vadd.f32 %v1108_v46, %v1079_v53 }
 0x551   :  { %v1136_v45 = vadd.f32 %v1135_v38, %v1109_v50 }
 0x554   :  { %v1168_v44 = vpop.f32.mrf.mxu0 }
 0x555   :  { %v1169_v59 = vadd.f32 %v1168_v44, %v1136_v45 }
 0x557   :  { %v1194_v43 = vadd.f32 %v1193_v54, %v1169_v59  ;;  %v1425_v54 = vld [vmem:[#allocation7 + $0x10] sm:$0xff] }
 0x56a   :  { %v1298_v31 = vpop.f32.mrf.mxu0 }
 0x56c   :  { %v1325_v0 = vpop.f32.mrf.mxu1 }
 0x56e   :  { %v1268_v61 = vpop.f32.mrf.mxu3 }
 0x572   :  { %v1453_v4 = vpop.f32.mrf.mxu0 }
 0x574   :  { %v1494_v53 = vpop.f32.mrf.mxu1 }
 0x575   :  { %v1495_v50 = vadd.f32 %v1494_v53, %v1453_v4 }
 0x576   :  { %v1227_v51 = vpop.f32.mrf.mxu2  ;;  %v1383_v15 = vpop.f32.mrf.mxu3 }
 0x577   :  { %v1228_v8 = vadd.f32 %v1227_v51, %v1194_v43 }
 0x579   :  { %v1269_v47 = vadd.f32 %v1268_v61, %v1228_v8 }
 0x57a   :  { %v1584_v51 = vpop.f32.mrf.mxu0 }
 0x57b   :  { %v1299_v9 = vadd.f32 %v1298_v31, %v1269_v47  ;;  %v1426_v47 = vadd.f32 %v5774_v39, %v1425_v54 }
 0x57c   :  { %v1609_v8 = vpop.f32.mrf.mxu1 }
 0x57d   :  { %v1326_v60 = vadd.f32 %v1325_v0, %v1299_v9 }
 0x57e   :  { %v1358_v29 = vpop.f32.mrf.mxu2  ;;  %v1551_v45 = vpop.f32.mrf.mxu3 }
 0x57f   :  { %v1359_v23 = vadd.f32 %v1358_v29, %v1326_v60 }
 0x581   :  { %v1384_v52 = vadd.f32 %v1383_v15, %v1359_v23 }
 0x583   :  { %v1386_v46 = vadd.f32 %v5996_v3, %v1384_v52 }
 0x585   :  { %5410 = vtanh.f32 %v1386_v46  ;;  %v5358_v31 = vmul.f32 -1.442695, %v1386_v46 }
 0x586   :  { %v1524_v38 = vpop.f32.mrf.mxu2 }
 0x587   :  { %v1525_v44 = vadd.f32 %v1524_v38, %v1495_v50 }
 0x589   :  { %v1552_v59 = vadd.f32 %v1551_v45, %v1525_v44 }
 0x58b   :  { %v5411_v43 = vpop.eup %5410  ;;  %v1585_v0 = vadd.f32 %v1584_v51, %v1552_v59 }
 0x58c   :  { %1409 = vrot.lane.b32.xlu2 %v5411_v43, %s5631_s26 }
 0x58d   :  { %v1610_v29 = vadd.f32 %v1609_v8, %v1585_v0 }
 0x58f   :  { %v1612_v23 = vadd.f32 %v1610_v29, %v1426_v47 }
 0x591   :  { %5412 = vtanh.f32 %v1612_v23  ;;  %v5359_v39 = vmul.f32 -1.442695, %v1612_v23 }
 0x592   :  { %5414 = vpow2.f32 %v5358_v31 }
 0x597   :  { %v5413_v60 = vpop.eup %5412 }
 0x598   :  { %1635 = vrot.lane.b32.xlu0 %v5413_v60, %s5631_s26  ;;  %v5415_v9 = vpop.eup %5414 }
 0x599   :  { %v1390_v15 = vadd.f32 1.0, %v5415_v9 }
 0x59b   :  { %5416 = vrcp.f32 %v1390_v15  ;;  %v1402_v38 = vand.u32 2147483648, %v1390_v15  ;;  %vm1396_vm14 = vweird.f32 %v1390_v15  ;;  %v1400_v44 = vand.u32 2147483647, %v1390_v15 }
 0x59c   :  { %5418 = vpow2.f32 %v5359_v39 }
 0x59d   :  { %v1403_v54 = vor.u32 1.1754944e-38, %v1402_v38  ;;  %vm1401_vm1 = vcmp.eq.f32.partialorder %v1400_v44, 8.507059e+37 }
 0x5a1   :  { %v5417_v61 = vpop.eup %5416 }
 0x5a2   :  { %v1392_v4 = vmul.f32 %v5417_v61, %v1390_v15  ;;  %vm1397_vm13 = vweird.f32 %v5417_v61  ;;  %v5419_v51 = vpop.eup %5418 }
 0x5a3   :  { %vm1398_vm15 = vmor %vm1396_vm14, %vm1397_vm13  ;;  %v1616_v47 = vadd.f32 1.0, %v5419_v51 }
 0x5a4   :  { %v1393_v52 = vsub.f32 1.0, %v1392_v4 }
 0x5a5   :  { %5420 = vrcp.f32 %v1616_v47  ;;  %v1628_v31 = vand.u32 2147483648, %v1616_v47  ;;  %vm1622_vm3 = vweird.f32 %v1616_v47  ;;  %v1626_v9 = vand.u32 2147483647, %v1616_v47 }
 0x5a6   :  { %v1394_v53 = vmul.f32 %v5417_v61, %v1393_v52 }
 0x5a7   :  { %vm1627_vm5 = vcmp.eq.f32.partialorder %v1626_v9, 8.507059e+37 }
 0x5a8   :  { %v1395_v50 = vadd.f32 %v5417_v61, %v1394_v53 }
 0x5aa   :  { %v1399_v45 = vsel %vm1398_vm15, %v5417_v61, %v1395_v50  ;;  %v1629_v61 = vor.u32 1.1754944e-38, %v1628_v31 }
 0x5ab   :  { %v1404_v59 = vsel %vm1401_vm1, %v1403_v54, %v1399_v45  ;;  %v5421_v0 = vpop.eup %5420 }
 0x5ac   :  { %v1618_v8 = vmul.f32 %v5421_v0, %v1616_v47  ;;  %vm1623_vm2 = vweird.f32 %v5421_v0  ;;  %v1407_v39 = vmul.f32 %v1404_v59, %v6004_v58 }
 0x5ad   :  { %vm1624_vm4 = vmor %vm1622_vm3, %vm1623_vm2 }
 0x5ae   :  { %v1619_v29 = vsub.f32 1.0, %v1618_v8 }
 0x5b0   :  { %v1620_v23 = vmul.f32 %v5421_v0, %v1619_v29 }
 0x5b2   :  { %v1621_v60 = vadd.f32 %v5421_v0, %v1620_v23 }
 0x5b4   :  { %v1625_v15 = vsel %vm1624_vm4, %v5421_v0, %v1621_v60 }
 0x5b5   :  { %v1630_v52 = vsel %vm1627_vm5, %v1629_v61, %v1625_v15 }
 0x5b6   :  { %v1633_v45 = vmul.f32 %v1630_v52, %v6009_v1 }
 0x5e6   :  { %v1410_v46 = vpop.permute.xlu2 %1409 }
 0x5e7   :  { %v1412_v43 = vmul.f32 %v1410_v46, %v1404_v59 }
 0x5e9   :  { %1414 = vrot.lane.b32.xlu1 %v1412_v43, %s5631_s26 }
 0x60a   :  { %v1636_v4 = vpop.permute.xlu0 %1635 }
 0x60b   :  { %v1638_v53 = vmul.f32 %v1636_v4, %v1630_v52 }
 0x60d   :  { %1640 = vrot.lane.b32.xlu2 %v1638_v53, %s5631_s26 }
 0x65b   :  { %v1415_v50 = vpop.permute.xlu1 %1414 }
 0x65c   :  { %v6096_v38 = vadd.f32 %v1415_v50, %v1407_v39  ;;  %v6714_v50 = vld [vmem:[#allocation18_spill] sm:$0xff] }
 0x65e   :  { %5422 = vtanh.f32 %v6096_v38 }
 0x664   :  { %v5423_v44 = vpop.eup %5422 }
 0x665   :  { %1420 = vrot.lane.b32.xlu0 %v5423_v44, %s5631_s26  ;;  %v6715_v44 = vld [vmem:[#allocation19_spill] sm:$0xff] }
 0x667   :  { %v1641_v54 = vpop.permute.xlu2 %1640 }
 0x668   :  { %v6101_v46 = vadd.f32 %v1641_v54, %v1633_v45  ;;  %v6716_v45 = vld [vmem:[#allocation26_spill] sm:$0xff]  ;;  %v6717_v54 = vld [vmem:[#allocation27_spill] sm:$0xff] }
 0x66a   :  { %5424 = vtanh.f32 %v6101_v46 }
 0x670   :  { %v5425_v51 = vpop.eup %5424 }
 0x671   :  { %1646 = vrot.lane.b32.xlu1 %v5425_v51, %s5631_s26  ;;  %v6718_v51 = vld [vmem:[#allocation22_spill] sm:$0xff] }
 0x6d7   :  { %v1421_v43 = vpop.permute.xlu0 %1420 }
 0x6d8   :  { %v1423_v58 = vmul.f32 %v1421_v43, %v1404_v59  ;;  %v6719_v43 = vld [vmem:[#allocation28_spill] sm:$0xff] }
 0x6da   :  { %1651 = vrot.lane.b32.xlu2 %v1423_v58, %s5632_s27  ;;  %v6720_v58 = vld [vmem:[#allocation23_spill] sm:$0xff] }
 0x6e3   :  { %v1647_v47 = vpop.permute.xlu1 %1646 }
 0x6e4   :  { %v1649_v0 = vmul.f32 %v1647_v47, %v1630_v52  ;;  %v6721_v47 = vld [vmem:[#allocation29_spill] sm:$0xff] }
 0x6e6   :  { %1841 = vrot.lane.b32.xlu0 %v1649_v0, %s5632_s27  ;;  %v6722_v0 = vld [vmem:[#allocation24_spill] sm:$0xff] }
 0x734   :  { %v1652_v8 = vpop.permute.xlu2 %1651 }
 0x735   :  { %v1653_v29 = vsel %vm98_vm0, %v1652_v8, 0  ;;  %v6723_v8 = vld [vmem:[#allocation25_spill] sm:$0xff] }
 0x736   :  { %v1675_v1 = vand.u32 4294901760, %v1653_v29 }
 0x738   :  { %v1676_v23 = vsub.f32 %v1653_v29, %v1675_v1  ;;  %1721 = vmatmul.f32.vlgmr.msra.gmra.mxu3 %v1675_v1 }
 0x739   :  { %1958 = vmatpush.msra.mxu3 %v5797_v33 }
 0x73a   :  { %v1677_v60 = vand.u32 4294901760, %v1676_v23  ;;  %1751 = vmatmul.f32.vlgmr.msrb.gmra.mxu0 %v1676_v23 }
 0x73b   :  { %1960 = vmatpush.msra.mxu3 %v5816_v42  ;;  %1987 = vmatpush.msrb.mxu0 %v5834_v48 }
 0x73c   :  { %v1678_v59 = vsub.f32 %v1676_v23, %v1677_v60  ;;  %1778 = vmatmul.f32.vlgmr.msrb.gmra.mxu1 %v1677_v60 }
 0x73d   :  { %1962 = vmatpush.msra.mxu3 %v5895_v11  ;;  %2018 = vmatpush.msrb.mxu1 %v5797_v33 }
 0x73e   :  { %v1679_v31 = vand.u32 4294901760, %v1678_v59  ;;  %1991 = vmatpush.msrb.mxu0 %v5851_v55 }
 0x73f   :  { %1964 = vmatpush.msra.mxu3 %v5900_v25  ;;  %2020 = vmatpush.msrb.mxu1 %v5816_v42 }
 0x740   :  { %1680 = vmatmul.f32.vlgmr.msra.gmra.mxu2 %v1679_v31  ;;  %1836 = vmatmul.f32.vlgmr.msrb.gmra.mxu3 %v1675_v1 }
 0x741   :  { %1929 = vmatpush.msra.mxu2 %v5814_v41  ;;  %2022 = vmatpush.msrb.mxu1 %v5895_v11 }
 0x742   :  { %2117 = vmatpush.msrb.mxu3 %v5745_v26  ;;  %1995 = vmatpush.msrb.mxu0 %v5905_v28 }
 0x743   :  { %1932 = vmatpush.msra.mxu2 %v5837_v49  ;;  %2024 = vmatpush.msrb.mxu1 %v5900_v25 }
 0x744   :  { %2123 = vmatpush.msrb.mxu3 %v5748_v27  ;;  %1999 = vmatpush.msrb.mxu0 %v5917_v34 }
 0x745   :  { %1935 = vmatpush.msra.mxu2 %v5898_v24 }
 0x746   :  { %2129 = vmatpush.msrb.mxu3 %v5757_v30 }
 0x747   :  { %1938 = vmatpush.msra.mxu2 %v5908_v63 }
 0x748   :  { %1811 = vmatmul.f32.vlgmr.msrb.gmra.mxu2 %v1675_v1  ;;  %2135 = vmatpush.msrb.mxu3 %v5760_v32 }
 0x749   :  { %2084 = vmatpush.msrb.mxu2 %v5698_v5 }
 0x74b   :  { %2086 = vmatpush.msrb.mxu2 %v5700_v6 }
 0x74d   :  { %2088 = vmatpush.msrb.mxu2 %v5702_v7 }
 0x74f   :  { %2090 = vmatpush.msrb.mxu2 %v5704_v10 }
 0x758   :  { %v1842_v9 = vpop.permute.xlu0 %1841 }
 0x759   :  { %v1843_v15 = vsel %vm98_vm0, %v1842_v9, 0 }
 0x75a   :  { %v1865_v61 = vand.u32 4294901760, %v1843_v15 }
 0x75c   :  { %v1866_v4 = vsub.f32 %v1843_v15, %v1865_v61  ;;  %1911 = vmatmul.f32.vlgmr.msra.gmra.mxu1 %v1865_v61 }
 0x75d   :  { %2184 = vmatpush.msra.mxu1 %v5698_v5 }
 0x75e   :  { %1941 = vmatmul.f32.vlgmr.msra.gmra.mxu2 %v1866_v4  ;;  %v1867_v52 = vand.u32 4294901760, %v1866_v4 }
 0x75f   :  { %2186 = vmatpush.msra.mxu1 %v5700_v6  ;;  %2213 = vmatpush.msra.mxu2 %v5724_v17 }
 0x760   :  { %1968 = vmatmul.f32.vlgmr.msra.gmra.mxu3 %v1867_v52  ;;  %v1868_v53 = vsub.f32 %v1866_v4, %v1867_v52 }
 0x761   :  { %2188 = vmatpush.msra.mxu1 %v5702_v7  ;;  %2217 = vmatpush.msra.mxu2 %v5727_v18 }
 0x762   :  { %v1869_v39 = vand.u32 4294901760, %v1868_v53  ;;  %2244 = vmatpush.msra.mxu3 %v5698_v5 }
 0x763   :  { %2190 = vmatpush.msra.mxu1 %v5704_v10  ;;  %2221 = vmatpush.msra.mxu2 %v5730_v20 }
 0x764   :  { %1870 = vmatmul.f32.vlgmr.msra.gmra.mxu0 %v1869_v39  ;;  %2026 = vmatmul.f32.vlgmr.msrb.gmra.mxu1 %v1865_v61 }
 0x765   :  { %2246 = vmatpush.msra.mxu3 %v5700_v6  ;;  %2155 = vmatpush.msra.mxu0 %v5708_v12 }
 0x766   :  { %2096 = vmatmul.f32.vlgmr.msrb.gmra.mxu2 %v1869_v39  ;;  %2345 = vmatpush.msrb.mxu1 %v5853_v56 }
 0x767   :  { %2225 = vmatpush.msra.mxu2 %v5734_v21  ;;  %2248 = vmatpush.msra.mxu3 %v5702_v7 }
 0x768   :  { %2137 = vmatmul.f32.vlgmr.msrb.gmra.mxu3 %v1865_v61  ;;  %2158 = vmatpush.msra.mxu0 %v5712_v13 }
 0x769   :  { %2250 = vmatpush.msra.mxu3 %v5704_v10  ;;  %2351 = vmatpush.msrb.mxu1 %v5855_v57 }
 0x76a   :  { %2161 = vmatpush.msra.mxu0 %v5716_v14  ;;  %2383 = vmatpush.msrb.mxu2 %v5801_v35 }
 0x76b   :  { %2357 = vmatpush.msrb.mxu1 %v5867_v62  ;;  %2412 = vmatpush.msrb.mxu3 %v5788_v19 }
 0x76c   :  { %2001 = vmatmul.f32.vlgmr.msrb.gmra.mxu0 %v1865_v61  ;;  %2194 = vmatmul.f32.vlgmr.msra.gmra.mxu1 %v1867_v52 }
 0x76d   :  { %2164 = vmatpush.msra.mxu0 %v5719_v16  ;;  %2386 = vmatpush.msrb.mxu2 %v5804_v36 }
 0x76e   :  { %2227 = vmatmul.f32.vlgmr.msra.gmra.mxu2 %v1865_v61  ;;  %2363 = vmatpush.msrb.mxu1 %v5875_v2 }
 0x76f   :  { %2389 = vmatpush.msrb.mxu2 %v5807_v37  ;;  %2414 = vmatpush.msrb.mxu3 %v5790_v22 }
 0x770   :  { %2252 = vmatmul.f32.vlgmr.msra.gmra.mxu3 %v1865_v61  ;;  %2312 = vmatpush.msrb.mxu0 %v5788_v19 }
 0x771   :  { %2392 = vmatpush.msrb.mxu2 %v5811_v40  ;;  %2416 = vmatpush.msrb.mxu3 %v6714_v50 }
 0x772   :  { %2472 = vmatpush.msra.mxu1 %v5788_v19  ;;  %2314 = vmatpush.msrb.mxu0 %v5790_v22 }
 0x773   :  { %2418 = vmatpush.msrb.mxu3 %v6715_v44  ;;  %2502 = vmatpush.msra.mxu2 %v5797_v33 }
 0x774   :  { %2167 = vmatmul.f32.vlgmr.msra.gmra.mxu0 %v1866_v4  ;;  %2474 = vmatpush.msra.mxu1 %v5790_v22 }
 0x775   :  { %2316 = vmatpush.msrb.mxu0 %v6714_v50  ;;  %2504 = vmatpush.msra.mxu2 %v5816_v42 }
 0x776   :  { %2476 = vmatpush.msra.mxu1 %v6714_v50  ;;  %2535 = vmatpush.msra.mxu3 %v6716_v45 }
 0x777   :  { %2318 = vmatpush.msrb.mxu0 %v6715_v44  ;;  %2506 = vmatpush.msra.mxu2 %v5895_v11 }
 0x778   :  { %2478 = vmatpush.msra.mxu1 %v6715_v44  ;;  %2541 = vmatpush.msra.mxu3 %v6717_v54 }
 0x779   :  { %2441 = vmatpush.msra.mxu0 %v6718_v51  ;;  %2508 = vmatpush.msra.mxu2 %v5900_v25 }
 0x77a   :  { %2547 = vmatpush.msra.mxu3 %v6719_v43 }
 0x77b   :  { %2445 = vmatpush.msra.mxu0 %v6720_v58 }
 0x77c   :  { %2553 = vmatpush.msra.mxu3 %v6721_v47 }
 0x77d   :  { %2449 = vmatpush.msra.mxu0 %v6722_v0 }
 0x77f   :  { %2453 = vmatpush.msra.mxu0 %v6723_v8 }
 0x7b7   :  { %v1752_v60 = vpop.f32.mrf.mxu0 }
 0x7b9   :  { %v1779_v31 = vpop.f32.mrf.mxu1 }
 0x7bb   :  { %v1722_v1 = vpop.f32.mrf.mxu3 }
 0x7c3   :  { %v1681_v29 = vpop.f32.mrf.mxu2  ;;  %v1837_v61 = vpop.f32.mrf.mxu3 }
 0x7c4   :  { %v1723_v23 = vadd.f32 %v1722_v1, %v1681_v29 }
 0x7c6   :  { %v1753_v59 = vadd.f32 %v1752_v60, %v1723_v23 }
 0x7c8   :  { %v1780_v15 = vadd.f32 %v1779_v31, %v1753_v59 }
 0x7cb   :  { %v1812_v9 = vpop.f32.mrf.mxu2 }
 0x7cc   :  { %v1813_v4 = vadd.f32 %v1812_v9, %v1780_v15 }
 0x7ce   :  { %v1838_v53 = vadd.f32 %v1837_v61, %v1813_v4  ;;  %v2069_v61 = vld [vmem:[#allocation7 + $0x18] sm:$0xff] }
 0x7d9   :  { %v1912_v52 = vpop.f32.mrf.mxu1 }
 0x7e1   :  { %v1871_v39 = vpop.f32.mrf.mxu0  ;;  %v1942_v43 = vpop.f32.mrf.mxu2 }
 0x7e2   :  { %v1872_v40 = vadd.f32 %v1871_v39, %v1838_v53  ;;  %v2027_v8 = vpop.f32.mrf.mxu1 }
 0x7e3   :  { %v1969_v47 = vpop.f32.mrf.mxu3 }
 0x7e4   :  { %v1913_v58 = vadd.f32 %v1912_v52, %v1872_v40 }
 0x7e6   :  { %v1943_v0 = vadd.f32 %v1942_v43, %v1913_v58  ;;  %v6185_v43 = vld [vmem:[%s6658_s4] ss:$0 sm:$0xff] }
 0x7e8   :  { %v1970_v54 = vadd.f32 %v1969_v47, %v1943_v0 }
 0x7e9   :  { %v2002_v37 = vpop.f32.mrf.mxu0  ;;  %v2097_v29 = vpop.f32.mrf.mxu2 }
 0x7ea   :  { %v2003_v51 = vadd.f32 %v2002_v37, %v1970_v54  ;;  %v2195_v15 = vpop.f32.mrf.mxu1  ;;  %v2070_v37 = vadd.f32 %v6185_v43, %v2069_v61 }
 0x7eb   :  { %v2138_v23 = vpop.f32.mrf.mxu3 }
 0x7ec   :  { %v2028_v1 = vadd.f32 %v2027_v8, %v2003_v51  ;;  %v2139_v59 = vadd.f32 %v2138_v23, %v2097_v29 }
 0x7ee   :  { %v2030_v60 = vadd.f32 %v5996_v3, %v2028_v1 }
 0x7f0   :  { %5426 = vtanh.f32 %v2030_v60  ;;  %v5360_v8 = vmul.f32 -1.442695, %v2030_v60 }
 0x7f1   :  { %v2168_v31 = vpop.f32.mrf.mxu0  ;;  %v2228_v53 = vpop.f32.mrf.mxu2 }
 0x7f2   :  { %v2169_v9 = vadd.f32 %v2168_v31, %v2139_v59 }
 0x7f3   :  { %v2253_v54 = vpop.f32.mrf.mxu3 }
 0x7f4   :  { %v2196_v4 = vadd.f32 %v2195_v15, %v2169_v9 }
 0x7f6   :  { %v5427_v39 = vpop.eup %5426  ;;  %v2229_v40 = vadd.f32 %v2228_v53, %v2196_v4 }
 0x7f7   :  { %2053 = vrot.lane.b32.xlu1 %v5427_v39, %s5631_s26 }
 0x7f8   :  { %v2254_v3 = vadd.f32 %v2253_v54, %v2229_v40 }
 0x7fa   :  { %v2256_v51 = vadd.f32 %v2254_v3, %v2070_v37 }
 0x7fc   :  { %5428 = vtanh.f32 %v2256_v51  ;;  %v5361_v47 = vmul.f32 -1.442695, %v2256_v51 }
 0x7fe   :  { %5430 = vpow2.f32 %v5361_v47 }
 0x7ff   :  { %5432 = vpow2.f32 %v5360_v8 }
 0x802   :  { %v5429_v58 = vpop.eup %5428 }
 0x803   :  { %2279 = vrot.lane.b32.xlu2 %v5429_v58, %s5631_s26 }
 0x804   :  { %v5431_v0 = vpop.eup %5430 }
 0x805   :  { %v2260_v52 = vadd.f32 1.0, %v5431_v0  ;;  %v5433_v29 = vpop.eup %5432 }
 0x806   :  { %v2034_v23 = vadd.f32 1.0, %v5433_v29 }
 0x807   :  { %5434 = vrcp.f32 %v2260_v52  ;;  %v2272_v53 = vand.u32 2147483648, %v2260_v52  ;;  %vm2266_vm7 = vweird.f32 %v2260_v52  ;;  %v2270_v39 = vand.u32 2147483647, %v2260_v52 }
 0x808   :  { %5436 = vrcp.f32 %v2034_v23  ;;  %v2046_v0 = vand.u32 2147483648, %v2034_v23  ;;  %vm2040_vm11 = vweird.f32 %v2034_v23  ;;  %v2044_v8 = vand.u32 2147483647, %v2034_v23 }
 0x809   :  { %v2273_v37 = vor.u32 1.1754944e-38, %v2272_v53  ;;  %vm2271_vm9 = vcmp.eq.f32.partialorder %v2270_v39, 8.507059e+37 }
 0x80a   :  { %vm2045_vm13 = vcmp.eq.f32.partialorder %v2044_v8, 8.507059e+37 }
 0x80d   :  { %v5435_v1 = vpop.eup %5434 }
 0x80e   :  { %v2262_v59 = vmul.f32 %v5435_v1, %v2260_v52  ;;  %v5437_v15 = vpop.eup %5436  ;;  %vm2267_vm6 = vweird.f32 %v5435_v1 }
 0x80f   :  { %v2036_v4 = vmul.f32 %v5437_v15, %v2034_v23  ;;  %vm2268_vm8 = vmor %vm2266_vm7, %vm2267_vm6  ;;  %vm2041_vm10 = vweird.f32 %v5437_v15 }
 0x810   :  { %v2263_v31 = vsub.f32 1.0, %v2262_v59  ;;  %vm2042_vm12 = vmor %vm2040_vm11, %vm2041_vm10  ;;  %v2047_v59 = vor.u32 1.1754944e-38, %v2046_v0 }
 0x811   :  { %v2037_v60 = vsub.f32 1.0, %v2036_v4 }
 0x812   :  { %v2264_v9 = vmul.f32 %v5435_v1, %v2263_v31 }
 0x813   :  { %v2038_v58 = vmul.f32 %v5437_v15, %v2037_v60 }
 0x814   :  { %v2265_v61 = vadd.f32 %v5435_v1, %v2264_v9 }
 0x815   :  { %v2039_v47 = vadd.f32 %v5437_v15, %v2038_v58 }
 0x816   :  { %v2269_v40 = vsel %vm2268_vm8, %v5435_v1, %v2265_v61 }
 0x817   :  { %v2274_v3 = vsel %vm2271_vm9, %v2273_v37, %v2269_v40  ;;  %v2043_v29 = vsel %vm2042_vm12, %v5437_v15, %v2039_v47 }
 0x818   :  { %v2048_v1 = vsel %vm2045_vm13, %v2047_v59, %v2043_v29  ;;  %v2277_v9 = vmul.f32 %v2274_v3, %v6101_v46 }
 0x819   :  { %v2051_v23 = vmul.f32 %v2048_v1, %v6096_v38 }
 0x85d   :  { %v2280_v54 = vpop.permute.xlu2 %2279 }
 0x85e   :  { %v2282_v51 = vmul.f32 %v2280_v54, %v2274_v3 }
 0x860   :  { %2284 = vrot.lane.b32.xlu1 %v2282_v51, %s5631_s26 }
 0x869   :  { %v2054_v52 = vpop.permute.xlu1 %2053 }
 0x86a   :  { %v2056_v31 = vmul.f32 %v2054_v52, %v2048_v1 }
 0x86c   :  { %2058 = vrot.lane.b32.xlu0 %v2056_v31, %s5631_s26 }
 0x8d2   :  { %v2285_v61 = vpop.permute.xlu1 %2284 }
 0x8d3   :  { %v6193_v4 = vadd.f32 %v2285_v61, %v2277_v9 }
 0x8d5   :  { %5438 = vtanh.f32 %v6193_v4 }
 0x8db   :  { %v5439_v53 = vpop.eup %5438 }
 0x8dc   :  { %2290 = vrot.lane.b32.xlu0 %v5439_v53, %s5631_s26  ;;  %v6724_v53 = vld [vmem:[#allocation22_spill] sm:$0xff] }
 0x8de   :  { %v2059_v15 = vpop.permute.xlu0 %2058 }
 0x8df   :  { %v6198_v39 = vadd.f32 %v2059_v15, %v2051_v23  ;;  %v6725_v23 = vld [vmem:[#allocation20_spill] sm:$0xff]  ;;  %v6726_v15 = vld [vmem:[#allocation27_spill] sm:$0xff] }
 0x8e1   :  { %5440 = vtanh.f32 %v6198_v39 }
 0x8e7   :  { %v5441_v40 = vpop.eup %5440 }
 0x8e8   :  { %2064 = vrot.lane.b32.xlu2 %v5441_v40, %s5631_s26  ;;  %v6727_v40 = vld [vmem:[#allocation23_spill] sm:$0xff] }
 0x942   :  { %v2065_v60 = vpop.permute.xlu2 %2064 }
 0x943   :  { %v2067_v46 = vmul.f32 %v2065_v60, %v2048_v1  ;;  %v6728_v60 = vld [vmem:[#allocation21_spill] sm:$0xff] }
 0x945   :  { %2295 = vrot.lane.b32.xlu1 %v2067_v46, %s5632_s27  ;;  %v6729_v46 = vld [vmem:[#allocation28_spill] sm:$0xff] }
 0x94e   :  { %v2291_v37 = vpop.permute.xlu0 %2290 }
 0x94f   :  { %v2293_v54 = vmul.f32 %v2291_v37, %v2274_v3  ;;  %v6730_v37 = vld [vmem:[#allocation24_spill] sm:$0xff] }
 0x951   :  { %2485 = vrot.lane.b32.xlu2 %v2293_v54, %s5632_s27  ;;  %v6731_v54 = vld [vmem:[#allocation29_spill] sm:$0xff] }
 0x9ab   :  { %v2486_v51 = vpop.permute.xlu2 %2485 }
 0x9ac   :  { %v2487_v58 = vsel %vm98_vm0, %v2486_v51, 0  ;;  %v6732_v51 = vld [vmem:[#allocation25_spill] sm:$0xff] }
 0x9ad   :  { %v6205_v38 = vand.u32 4294901760, %v2487_v58 }
 0x9af   :  { %v2510_v47 = vsub.f32 %v2487_v58, %v6205_v38 }
 0x9b1   :  { %v2511_v59 = vand.u32 4294901760, %v2510_v47 }
 0x9b3   :  { %v2512_v31 = vsub.f32 %v2510_v47, %v2511_v59 }
 0x9b5   :  { %v2513_v61 = vand.u32 4294901760, %v2512_v31 }
 0x9b7   :  { %v2296_v0 = vpop.permute.xlu1 %2295 }
 0x9b8   :  { %v2297_v8 = vsel %vm98_vm0, %v2296_v0, 0 }
 0x9b9   :  { %v2319_v29 = vand.u32 4294901760, %v2297_v8 }
 0x9bb   :  { %v2320_v52 = vsub.f32 %v2297_v8, %v2319_v29  ;;  %2365 = vmatmul.f32.vlgmr.msrb.gmra.mxu1 %v2319_v29 }
 0x9bc   :  { %2602 = vmatpush.msrb.mxu1 %v5797_v33 }
 0x9bd   :  { %v2321_v1 = vand.u32 4294901760, %v2320_v52  ;;  %2395 = vmatmul.f32.vlgmr.msrb.gmra.mxu2 %v2320_v52 }
 0x9be   :  { %2604 = vmatpush.msrb.mxu1 %v5816_v42  ;;  %2631 = vmatpush.msrb.mxu2 %v5834_v48 }
 0x9bf   :  { %v2322_v3 = vsub.f32 %v2320_v52, %v2321_v1  ;;  %2422 = vmatmul.f32.vlgmr.msrb.gmra.mxu3 %v2321_v1 }
 0x9c0   :  { %2606 = vmatpush.msrb.mxu1 %v5895_v11  ;;  %2635 = vmatpush.msrb.mxu2 %v5851_v55 }
 0x9c1   :  { %v2323_v9 = vand.u32 4294901760, %v2322_v3  ;;  %2662 = vmatpush.msrb.mxu3 %v5797_v33 }
 0x9c2   :  { %2608 = vmatpush.msrb.mxu1 %v5900_v25  ;;  %2639 = vmatpush.msrb.mxu2 %v5905_v28 }
 0x9c3   :  { %2324 = vmatmul.f32.vlgmr.msrb.gmra.mxu0 %v2323_v9  ;;  %2480 = vmatmul.f32.vlgmr.msra.gmra.mxu1 %v2319_v29 }
 0x9c4   :  { %2664 = vmatpush.msrb.mxu3 %v5816_v42  ;;  %2573 = vmatpush.msrb.mxu0 %v5814_v41 }
 0x9c5   :  { %2514 = vmatmul.f32.vlgmr.msra.gmra.mxu2 %v2513_v61  ;;  %2761 = vmatpush.msra.mxu1 %v5745_v26 }
 0x9c6   :  { %2643 = vmatpush.msrb.mxu2 %v5917_v34  ;;  %2666 = vmatpush.msrb.mxu3 %v5895_v11 }
 0x9c7   :  { %2555 = vmatmul.f32.vlgmr.msra.gmra.mxu3 %v6205_v38  ;;  %2576 = vmatpush.msrb.mxu0 %v5837_v49 }
 0x9c8   :  { %2668 = vmatpush.msrb.mxu3 %v5900_v25  ;;  %2767 = vmatpush.msra.mxu1 %v5748_v27 }
 0x9c9   :  { %2799 = vmatpush.msra.mxu2 %v5708_v12  ;;  %2579 = vmatpush.msrb.mxu0 %v5898_v24 }
 0x9ca   :  { %2773 = vmatpush.msra.mxu1 %v5757_v30  ;;  %2828 = vmatpush.msra.mxu3 %v5698_v5 }
 0x9cb   :  { %2455 = vmatmul.f32.vlgmr.msra.gmra.mxu0 %v2319_v29  ;;  %2612 = vmatmul.f32.vlgmr.msrb.gmra.mxu1 %v2511_v59 }
 0x9cc   :  { %2802 = vmatpush.msra.mxu2 %v5712_v13  ;;  %2582 = vmatpush.msrb.mxu0 %v5908_v63 }
 0x9cd   :  { %2645 = vmatmul.f32.vlgmr.msrb.gmra.mxu2 %v6205_v38  ;;  %2779 = vmatpush.msra.mxu1 %v5760_v32 }
 0x9ce   :  { %2805 = vmatpush.msra.mxu2 %v5716_v14  ;;  %2830 = vmatpush.msra.mxu3 %v5700_v6 }
 0x9cf   :  { %2670 = vmatmul.f32.vlgmr.msrb.gmra.mxu3 %v6205_v38  ;;  %2728 = vmatpush.msra.mxu0 %v5698_v5 }
 0x9d0   :  { %2808 = vmatpush.msra.mxu2 %v5719_v16  ;;  %2832 = vmatpush.msra.mxu3 %v5702_v7 }
 0x9d1   :  { %2888 = vmatpush.msrb.mxu1 %v5698_v5  ;;  %2730 = vmatpush.msra.mxu0 %v5700_v6 }
 0x9d2   :  { %2834 = vmatpush.msra.mxu3 %v5704_v10  ;;  %2956 = vmatpush.msrb.mxu2 %v5788_v19 }
 0x9d3   :  { %2585 = vmatmul.f32.vlgmr.msrb.gmra.mxu0 %v2510_v47  ;;  %2781 = vmatmul.f32.vlgmr.msra.gmra.mxu1 %v6205_v38 }
 0x9d4   :  { %2890 = vmatpush.msrb.mxu1 %v5700_v6  ;;  %2732 = vmatpush.msra.mxu0 %v5702_v7 }
 0x9d5   :  { %2811 = vmatmul.f32.vlgmr.msra.gmra.mxu2 %v2510_v47  ;;  %2989 = vmatpush.msrb.mxu3 %v5853_v56 }
 0x9d6   :  { %2892 = vmatpush.msrb.mxu1 %v5702_v7  ;;  %2734 = vmatpush.msra.mxu0 %v5704_v10 }
 0x9d7   :  { %2838 = vmatmul.f32.vlgmr.msra.gmra.mxu3 %v2511_v59  ;;  %2958 = vmatpush.msrb.mxu2 %v5790_v22 }
 0x9d8   :  { %2857 = vmatpush.msrb.mxu0 %v5724_v17  ;;  %2894 = vmatpush.msrb.mxu1 %v5704_v10 }
 0x9d9   :  { %2995 = vmatpush.msrb.mxu3 %v5855_v57  ;;  %2960 = vmatpush.msrb.mxu2 %v6714_v50 }
 0x9da   :  { %2861 = vmatpush.msrb.mxu0 %v5727_v18  ;;  %3056 = vmatpush.msra.mxu1 %v5788_v19 }
 0x9db   :  { %3001 = vmatpush.msrb.mxu3 %v5867_v62  ;;  %2740 = vmatmul.f32.vlgmr.msra.gmra.mxu0 %v2513_v61 }
 0x9dc   :  { %2896 = vmatmul.f32.vlgmr.msrb.gmra.mxu1 %v6205_v38  ;;  %2865 = vmatpush.msrb.mxu0 %v5730_v20 }
 0x9dd   :  { %3007 = vmatpush.msrb.mxu3 %v5875_v2  ;;  %3058 = vmatpush.msra.mxu1 %v5790_v22 }
 0x9de   :  { %2869 = vmatpush.msrb.mxu0 %v5734_v21  ;;  %2962 = vmatpush.msrb.mxu2 %v6715_v44 }
 0x9df   :  { %3116 = vmatpush.msra.mxu3 %v5788_v19  ;;  %3060 = vmatpush.msra.mxu1 %v6714_v50 }
 0x9e0   :  { %3027 = vmatpush.msra.mxu0 %v5801_v35  ;;  %3085 = vmatpush.msra.mxu2 %v6724_v53 }
 0x9e1   :  { %3118 = vmatpush.msra.mxu3 %v5790_v22  ;;  %3062 = vmatpush.msra.mxu1 %v6715_v44 }
 0x9e2   :  { %3030 = vmatpush.msra.mxu0 %v5804_v36  ;;  %3089 = vmatpush.msra.mxu2 %v6727_v40 }
 0x9e3   :  { %3120 = vmatpush.msra.mxu3 %v6714_v50  ;;  %3179 = vmatpush.msrb.mxu1 %v6716_v45 }
 0x9e4   :  { %2871 = vmatmul.f32.vlgmr.msrb.gmra.mxu0 %v6205_v38  ;;  %3093 = vmatpush.msra.mxu2 %v6730_v37 }
 0x9e5   :  { %3033 = vmatpush.msra.mxu0 %v6725_v23  ;;  %3122 = vmatpush.msra.mxu3 %v6715_v44 }
 0x9e6   :  { %3185 = vmatpush.msrb.mxu1 %v6726_v15  ;;  %3097 = vmatpush.msra.mxu2 %v6732_v51 }
 0x9e7   :  { %3036 = vmatpush.msra.mxu0 %v6728_v60 }
 0x9e8   :  { %3191 = vmatpush.msrb.mxu1 %v6729_v46 }
 0x9e9   :  { %3146 = vmatpush.msrb.mxu0 %v5797_v33 }
 0x9ea   :  { %3197 = vmatpush.msrb.mxu1 %v6731_v54 }
 0x9eb   :  { %3148 = vmatpush.msrb.mxu0 %v5816_v42 }
 0x9ed   :  { %3150 = vmatpush.msrb.mxu0 %v5895_v11 }
 0x9ef   :  { %3152 = vmatpush.msrb.mxu0 %v5900_v25 }
 0xa38   :  { %v2366_v58 = vpop.f32.mrf.mxu1 }
 0xa40   :  { %v2325_v38 = vpop.f32.mrf.mxu0  ;;  %v2396_v47 = vpop.f32.mrf.mxu2 }
 0xa41   :  { %v2367_v0 = vadd.f32 %v2366_v58, %v2325_v38  ;;  %v2481_v59 = vpop.f32.mrf.mxu1 }
 0xa42   :  { %v2423_v8 = vpop.f32.mrf.mxu3 }
 0xa43   :  { %v2397_v29 = vadd.f32 %v2396_v47, %v2367_v0  ;;  %v6290_v47 = vld [vmem:[%s6659_s5] ss:$0 sm:$0xff] }
 0xa45   :  { %v2424_v52 = vadd.f32 %v2423_v8, %v2397_v29 }
 0xa48   :  { %v2456_v1 = vpop.f32.mrf.mxu0  ;;  %v2515_v3 = vpop.f32.mrf.mxu2 }
 0xa49   :  { %v2457_v31 = vadd.f32 %v2456_v1, %v2424_v52  ;;  %v2613_v51 = vpop.f32.mrf.mxu1  ;;  %v2713_v52 = vld [vmem:[#allocation7 + $0x20] sm:$0xff] }
 0xa4a   :  { %v2556_v9 = vpop.f32.mrf.mxu3 }
 0xa4b   :  { %v2482_v61 = vadd.f32 %v2481_v59, %v2457_v31 }
 0xa4d   :  { %v2516_v54 = vadd.f32 %v2515_v3, %v2482_v61 }
 0xa4f   :  { %v2557_v46 = vadd.f32 %v2556_v9, %v2516_v54 }
 0xa50   :  { %v2586_v37 = vpop.f32.mrf.mxu0  ;;  %v2646_v15 = vpop.f32.mrf.mxu2 }
 0xa51   :  { %v2587_v40 = vadd.f32 %v2586_v37, %v2557_v46  ;;  %v2782_v58 = vpop.f32.mrf.mxu1 }
 0xa52   :  { %v2671_v53 = vpop.f32.mrf.mxu3 }
 0xa53   :  { %v2614_v45 = vadd.f32 %v2613_v51, %v2587_v40 }
 0xa55   :  { %v2647_v60 = vadd.f32 %v2646_v15, %v2614_v45  ;;  %v2714_v45 = vadd.f32 %v6185_v43, %v2713_v52 }
 0xa57   :  { %v2672_v44 = vadd.f32 %v2671_v53, %v2647_v60 }
 0xa58   :  { %v2741_v38 = vpop.f32.mrf.mxu0  ;;  %v2812_v29 = vpop.f32.mrf.mxu2 }
 0xa59   :  { %v2674_v0 = vadd.f32 %v6290_v47, %v2672_v44  ;;  %v2783_v8 = vadd.f32 %v2782_v58, %v2741_v38  ;;  %v2897_v15 = vpop.f32.mrf.mxu1 }
 0xa5a   :  { %v2839_v59 = vpop.f32.mrf.mxu3 }
 0xa5b   :  { %5442 = vtanh.f32 %v2674_v0  ;;  %v2813_v54 = vadd.f32 %v2812_v29, %v2783_v8  ;;  %v5362_v44 = vmul.f32 -1.442695, %v2674_v0 }
 0xa5d   :  { %v2840_v46 = vadd.f32 %v2839_v59, %v2813_v54 }
 0xa61   :  { %v2872_v40 = vpop.f32.mrf.mxu0  ;;  %v5443_v37 = vpop.eup %5442 }
 0xa62   :  { %v2873_v53 = vadd.f32 %v2872_v40, %v2840_v46  ;;  %2697 = vrot.lane.b32.xlu0 %v5443_v37, %s5631_s26 }
 0xa64   :  { %v2898_v60 = vadd.f32 %v2897_v15, %v2873_v53 }
 0xa66   :  { %v2900_v51 = vadd.f32 %v2898_v60, %v2714_v45 }
 0xa68   :  { %5444 = vtanh.f32 %v2900_v51  ;;  %v5363_v31 = vmul.f32 -1.442695, %v2900_v51 }
 0xa69   :  { %5446 = vpow2.f32 %v5362_v44 }
 0xa6a   :  { %5448 = vpow2.f32 %v5363_v31 }
 0xa6e   :  { %v5445_v1 = vpop.eup %5444 }
 0xa6f   :  { %2923 = vrot.lane.b32.xlu1 %v5445_v1, %s5631_s26  ;;  %v5447_v3 = vpop.eup %5446 }
 0xa70   :  { %v2678_v9 = vadd.f32 1.0, %v5447_v3  ;;  %v5449_v61 = vpop.eup %5448 }
 0xa71   :  { %v2904_v38 = vadd.f32 1.0, %v5449_v61 }
 0xa72   :  { %5450 = vrcp.f32 %v2678_v9  ;;  %v2690_v40 = vand.u32 2147483648, %v2678_v9  ;;  %vm2684_vm15 = vweird.f32 %v2678_v9  ;;  %v2688_v0 = vand.u32 2147483647, %v2678_v9 }
 0xa73   :  { %5452 = vrcp.f32 %v2904_v38  ;;  %v2916_v3 = vand.u32 2147483648, %v2904_v38  ;;  %vm2910_vm4 = vweird.f32 %v2904_v38  ;;  %v2914_v31 = vand.u32 2147483647, %v2904_v38 }
 0xa74   :  { %v2691_v53 = vor.u32 1.1754944e-38, %v2690_v40  ;;  %vm2689_vm2 = vcmp.eq.f32.partialorder %v2688_v0, 8.507059e+37 }
 0xa75   :  { %vm2915_vm6 = vcmp.eq.f32.partialorder %v2914_v31, 8.507059e+37 }
 0xa78   :  { %v5451_v58 = vpop.eup %5450 }
 0xa79   :  { %v2680_v8 = vmul.f32 %v5451_v58, %v2678_v9  ;;  %v5453_v59 = vpop.eup %5452  ;;  %vm2685_vm14 = vweird.f32 %v5451_v58 }
 0xa7a   :  { %v2906_v46 = vmul.f32 %v5453_v59, %v2904_v38  ;;  %vm2686_vm1 = vmor %vm2684_vm15, %vm2685_vm14  ;;  %vm2911_vm3 = vweird.f32 %v5453_v59 }
 0xa7b   :  { %v2681_v29 = vsub.f32 1.0, %v2680_v8  ;;  %vm2912_vm5 = vmor %vm2910_vm4, %vm2911_vm3  ;;  %v2917_v8 = vor.u32 1.1754944e-38, %v2916_v3 }
 0xa7c   :  { %v2907_v45 = vsub.f32 1.0, %v2906_v46 }
 0xa7d   :  { %v2682_v54 = vmul.f32 %v5451_v58, %v2681_v29 }
 0xa7e   :  { %v2908_v1 = vmul.f32 %v5453_v59, %v2907_v45 }
 0xa7f   :  { %v2683_v52 = vadd.f32 %v5451_v58, %v2682_v54 }
 0xa80   :  { %v2909_v44 = vadd.f32 %v5453_v59, %v2908_v1 }
 0xa81   :  { %v2687_v37 = vsel %vm2686_vm1, %v5451_v58, %v2683_v52 }
 0xa82   :  { %v2692_v60 = vsel %vm2689_vm2, %v2691_v53, %v2687_v37  ;;  %v2913_v61 = vsel %vm2912_vm5, %v5453_v59, %v2909_v44 }
 0xa83   :  { %v2918_v58 = vsel %vm2915_vm6, %v2917_v8, %v2913_v61  ;;  %v2695_v54 = vmul.f32 %v2692_v60, %v6198_v39 }
 0xa84   :  { %v2921_v38 = vmul.f32 %v2918_v58, %v6193_v4 }
 0xad4   :  { %v2698_v15 = vpop.permute.xlu0 %2697 }
 0xad5   :  { %v2700_v51 = vmul.f32 %v2698_v15, %v2692_v60 }
 0xad7   :  { %2702 = vrot.lane.b32.xlu2 %v2700_v51, %s5631_s26 }
 0xae1   :  { %v2924_v9 = vpop.permute.xlu1 %2923 }
 0xae2   :  { %v2926_v29 = vmul.f32 %v2924_v9, %v2918_v58 }
 0xae4   :  { %2928 = vrot.lane.b32.xlu0 %v2926_v29, %s5631_s26 }
 0xb31   :  { %v2703_v52 = vpop.permute.xlu2 %2702 }
 0xb32   :  { %v6299_v46 = vadd.f32 %v2703_v52, %v2695_v54 }
 0xb34   :  { %5454 = vtanh.f32 %v6299_v46 }
 0xb3a   :  { %v5455_v40 = vpop.eup %5454 }
 0xb3b   :  { %2708 = vrot.lane.b32.xlu1 %v5455_v40, %s5631_s26  ;;  %v6733_v40 = vld [vmem:[#allocation19_spill] sm:$0xff] }
 0xb56   :  { %v2929_v59 = vpop.permute.xlu0 %2928 }
 0xb57   :  { %v6304_v0 = vadd.f32 %v2929_v59, %v2921_v38  ;;  %v6734_v38 = vld [vmem:[#allocation21_spill] sm:$0xff]  ;;  %v6735_v59 = vld [vmem:[#allocation22_spill] sm:$0xff] }
 0xb59   :  { %5456 = vtanh.f32 %v6304_v0 }
 0xb5f   :  { %v5457_v37 = vpop.eup %5456 }
 0xb60   :  { %2934 = vrot.lane.b32.xlu2 %v5457_v37, %s5631_s26  ;;  %v6736_v37 = vld [vmem:[#allocation26_spill] sm:$0xff] }
 0xbad   :  { %v2709_v45 = vpop.permute.xlu1 %2708 }
 0xbae   :  { %v2711_v39 = vmul.f32 %v2709_v45, %v2692_v60  ;;  %v6737_v45 = vld [vmem:[#allocation23_spill] sm:$0xff] }
 0xbb0   :  { %2939 = vrot.lane.b32.xlu0 %v2711_v39, %s5632_s27  ;;  %v6738_v39 = vld [vmem:[#allocation27_spill] sm:$0xff] }
 0xbba   :  { %v2935_v53 = vpop.permute.xlu2 %2934 }
 0xbbb   :  { %v2937_v15 = vmul.f32 %v2935_v53, %v2918_v58  ;;  %v6739_v53 = vld [vmem:[#allocation24_spill] sm:$0xff] }
 0xbbd   :  { %3129 = vrot.lane.b32.xlu1 %v2937_v15, %s5632_s27  ;;  %v6740_v15 = vld [vmem:[#allocation28_spill] sm:$0xff] }
 0xc22   :  { %v2940_v51 = vpop.permute.xlu0 %2939 }
 0xc23   :  { %v2941_v1 = vsel %vm98_vm0, %v2940_v51, 0  ;;  %v6741_v51 = vld [vmem:[#allocation25_spill] sm:$0xff] }
 0xc24   :  { %v2963_v4 = vand.u32 4294901760, %v2941_v1 }
 0xc26   :  { %v2964_v44 = vsub.f32 %v2941_v1, %v2963_v4  ;;  %3009 = vmatmul.f32.vlgmr.msrb.gmra.mxu3 %v2963_v4  ;;  %v6742_v1 = vld [vmem:[#allocation29_spill] sm:$0xff] }
 0xc27   :  { %3246 = vmatpush.msrb.mxu3 %v5797_v33 }
 0xc28   :  { %v2965_v3 = vand.u32 4294901760, %v2964_v44  ;;  %3039 = vmatmul.f32.vlgmr.msra.gmra.mxu0 %v2964_v44 }
 0xc29   :  { %3248 = vmatpush.msrb.mxu3 %v5816_v42  ;;  %3275 = vmatpush.msra.mxu0 %v5834_v48 }
 0xc2a   :  { %v2966_v60 = vsub.f32 %v2964_v44, %v2965_v3  ;;  %3066 = vmatmul.f32.vlgmr.msra.gmra.mxu1 %v2965_v3 }
 0xc2b   :  { %3250 = vmatpush.msrb.mxu3 %v5895_v11  ;;  %3306 = vmatpush.msra.mxu1 %v5797_v33 }
 0xc2c   :  { %v2967_v31 = vand.u32 4294901760, %v2966_v60  ;;  %3279 = vmatpush.msra.mxu0 %v5851_v55 }
 0xc2d   :  { %3252 = vmatpush.msrb.mxu3 %v5900_v25  ;;  %3308 = vmatpush.msra.mxu1 %v5816_v42 }
 0xc2e   :  { %2968 = vmatmul.f32.vlgmr.msrb.gmra.mxu2 %v2967_v31  ;;  %3124 = vmatmul.f32.vlgmr.msra.gmra.mxu3 %v2963_v4 }
 0xc2f   :  { %v3130_v61 = vpop.permute.xlu1 %3129  ;;  %3217 = vmatpush.msrb.mxu2 %v5814_v41  ;;  %3310 = vmatpush.msra.mxu1 %v5895_v11 }
 0xc30   :  { %v3131_v8 = vsel %vm98_vm0, %v3130_v61, 0  ;;  %3405 = vmatpush.msra.mxu3 %v5745_v26  ;;  %3283 = vmatpush.msra.mxu0 %v5905_v28 }
 0xc31   :  { %v6322_v9 = vand.u32 4294901760, %v3131_v8  ;;  %3220 = vmatpush.msrb.mxu2 %v5837_v49  ;;  %3312 = vmatpush.msra.mxu1 %v5900_v25 }
 0xc32   :  { %3411 = vmatpush.msra.mxu3 %v5748_v27  ;;  %3287 = vmatpush.msra.mxu0 %v5917_v34 }
 0xc33   :  { %v3154_v58 = vsub.f32 %v3131_v8, %v6322_v9  ;;  %3199 = vmatmul.f32.vlgmr.msrb.gmra.mxu1 %v6322_v9  ;;  %3223 = vmatpush.msrb.mxu2 %v5898_v24 }
 0xc34   :  { %3472 = vmatpush.msrb.mxu1 %v5698_v5  ;;  %3417 = vmatpush.msra.mxu3 %v5757_v30 }
 0xc35   :  { %v3155_v29 = vand.u32 4294901760, %v3154_v58  ;;  %3226 = vmatpush.msrb.mxu2 %v5908_v63 }
 0xc36   :  { %3474 = vmatpush.msrb.mxu1 %v5700_v6  ;;  %3099 = vmatmul.f32.vlgmr.msra.gmra.mxu2 %v2963_v4 }
 0xc37   :  { %3256 = vmatmul.f32.vlgmr.msrb.gmra.mxu3 %v3155_v29  ;;  %v3156_v54 = vsub.f32 %v3154_v58, %v3155_v29  ;;  %3372 = vmatpush.msra.mxu2 %v5698_v5 }
 0xc38   :  { %3423 = vmatpush.msra.mxu3 %v5760_v32  ;;  %3476 = vmatpush.msrb.mxu1 %v5702_v7 }
 0xc39   :  { %v3157_v52 = vand.u32 4294901760, %v3156_v54  ;;  %3374 = vmatpush.msra.mxu2 %v5700_v6 }
 0xc3a   :  { %3532 = vmatpush.msrb.mxu3 %v5698_v5  ;;  %3478 = vmatpush.msrb.mxu1 %v5704_v10 }
 0xc3b   :  { %3158 = vmatmul.f32.vlgmr.msrb.gmra.mxu0 %v3157_v52  ;;  %3314 = vmatmul.f32.vlgmr.msra.gmra.mxu1 %v6322_v9 }
 0xc3c   :  { %3534 = vmatpush.msrb.mxu3 %v5700_v6  ;;  %3376 = vmatpush.msra.mxu2 %v5702_v7 }
 0xc3d   :  { %3443 = vmatpush.msrb.mxu0 %v5708_v12  ;;  %3633 = vmatpush.msra.mxu1 %v5853_v56 }
 0xc3e   :  { %3536 = vmatpush.msrb.mxu3 %v5702_v7  ;;  %3229 = vmatmul.f32.vlgmr.msrb.gmra.mxu2 %v3154_v58 }
 0xc3f   :  { %3425 = vmatmul.f32.vlgmr.msra.gmra.mxu3 %v6322_v9  ;;  %3378 = vmatpush.msra.mxu2 %v5704_v10 }
 0xc40   :  { %3446 = vmatpush.msrb.mxu0 %v5712_v13  ;;  %3538 = vmatpush.msrb.mxu3 %v5704_v10 }
 0xc41   :  { %3501 = vmatpush.msrb.mxu2 %v5724_v17  ;;  %3639 = vmatpush.msra.mxu1 %v5855_v57 }
 0xc42   :  { %3449 = vmatpush.msrb.mxu0 %v5716_v14  ;;  %3700 = vmatpush.msra.mxu3 %v5788_v19 }
 0xc43   :  { %3289 = vmatmul.f32.vlgmr.msra.gmra.mxu0 %v6322_v9  ;;  %3482 = vmatmul.f32.vlgmr.msrb.gmra.mxu1 %v3155_v29 }
 0xc44   :  { %3505 = vmatpush.msrb.mxu2 %v5727_v18  ;;  %3452 = vmatpush.msrb.mxu0 %v5719_v16 }
 0xc45   :  { %3645 = vmatpush.msra.mxu1 %v5867_v62  ;;  %3702 = vmatpush.msra.mxu3 %v5790_v22 }
 0xc46   :  { %3509 = vmatpush.msrb.mxu2 %v5730_v20  ;;  %3600 = vmatpush.msra.mxu0 %v5788_v19 }
 0xc47   :  { %3384 = vmatmul.f32.vlgmr.msra.gmra.mxu2 %v3157_v52  ;;  %3540 = vmatmul.f32.vlgmr.msrb.gmra.mxu3 %v6322_v9 }
 0xc48   :  { %3513 = vmatpush.msrb.mxu2 %v5734_v21  ;;  %3651 = vmatpush.msra.mxu1 %v5875_v2 }
 0xc49   :  { %3602 = vmatpush.msra.mxu0 %v5790_v22  ;;  %3704 = vmatpush.msra.mxu3 %v6714_v50 }
 0xc4a   :  { %3671 = vmatpush.msra.mxu2 %v5801_v35  ;;  %3760 = vmatpush.msrb.mxu1 %v5788_v19 }
 0xc4b   :  { %3455 = vmatmul.f32.vlgmr.msrb.gmra.mxu0 %v3154_v58  ;;  %3706 = vmatpush.msra.mxu3 %v6733_v40 }
 0xc4c   :  { %3674 = vmatpush.msra.mxu2 %v5804_v36  ;;  %3762 = vmatpush.msrb.mxu1 %v5790_v22 }
 0xc4d   :  { %3604 = vmatpush.msra.mxu0 %v6714_v50  ;;  %3823 = vmatpush.msrb.mxu3 %v6736_v37 }
 0xc4e   :  { %3677 = vmatpush.msra.mxu2 %v6725_v23  ;;  %3764 = vmatpush.msrb.mxu1 %v6714_v50 }
 0xc4f   :  { %3515 = vmatmul.f32.vlgmr.msrb.gmra.mxu2 %v6322_v9  ;;  %3606 = vmatpush.msra.mxu0 %v6733_v40 }
 0xc50   :  { %3680 = vmatpush.msra.mxu2 %v6734_v38  ;;  %3766 = vmatpush.msrb.mxu1 %v6733_v40 }
 0xc51   :  { %3729 = vmatpush.msrb.mxu0 %v6735_v59  ;;  %3829 = vmatpush.msrb.mxu3 %v6738_v39 }
 0xc52   :  { %3790 = vmatpush.msrb.mxu2 %v5797_v33 }
 0xc53   :  { %3733 = vmatpush.msrb.mxu0 %v6737_v45  ;;  %3835 = vmatpush.msrb.mxu3 %v6740_v15 }
 0xc54   :  { %3792 = vmatpush.msrb.mxu2 %v5816_v42 }
 0xc55   :  { %3737 = vmatpush.msrb.mxu0 %v6739_v53  ;;  %3841 = vmatpush.msrb.mxu3 %v6742_v1 }
 0xc56   :  { %3794 = vmatpush.msrb.mxu2 %v5895_v11 }
 0xc57   :  { %3741 = vmatpush.msrb.mxu0 %v6741_v51 }
 0xc58   :  { %3796 = vmatpush.msrb.mxu2 %v5900_v25 }
 0xca5   :  { %v3040_v44 = vpop.f32.mrf.mxu0 }
 0xca7   :  { %v3067_v3 = vpop.f32.mrf.mxu1 }
 0xca9   :  { %v3010_v4 = vpop.f32.mrf.mxu3 }
 0xcb0   :  { %v3200_v52 = vpop.f32.mrf.mxu1 }
 0xcb1   :  { %v2969_v60 = vpop.f32.mrf.mxu2  ;;  %v3125_v8 = vpop.f32.mrf.mxu3 }
 0xcb2   :  { %v3011_v31 = vadd.f32 %v3010_v4, %v2969_v60 }
 0xcb4   :  { %v3041_v61 = vadd.f32 %v3040_v44, %v3011_v31 }
 0xcb6   :  { %v3068_v58 = vadd.f32 %v3067_v3, %v3041_v61 }
 0xcb8   :  { %v3159_v9 = vpop.f32.mrf.mxu0  ;;  %v3315_v40 = vpop.f32.mrf.mxu1 }
 0xcb9   :  { %v3100_v29 = vpop.f32.mrf.mxu2 }
 0xcba   :  { %v3101_v54 = vadd.f32 %v3100_v29, %v3068_v58  ;;  %v3257_v15 = vpop.f32.mrf.mxu3 }
 0xcbc   :  { %v3126_v53 = vadd.f32 %v3125_v8, %v3101_v54  ;;  %v3357_v8 = vld [vmem:[#allocation7 + $0x28] sm:$0xff] }
 0xcbd   :  { %v3358_v58 = vadd.f32 %v6185_v43, %v3357_v8 }
 0xcbe   :  { %v3160_v45 = vadd.f32 %v3159_v9, %v3126_v53 }
 0xcc0   :  { %v3201_v51 = vadd.f32 %v3200_v52, %v3160_v45  ;;  %v3290_v59 = vpop.f32.mrf.mxu0  ;;  %v3483_v61 = vpop.f32.mrf.mxu1 }
 0xcc1   :  { %v3230_v1 = vpop.f32.mrf.mxu2 }
 0xcc2   :  { %v3231_v39 = vadd.f32 %v3230_v1, %v3201_v51  ;;  %v3426_v22 = vpop.f32.mrf.mxu3 }
 0xcc4   :  { %v3258_v37 = vadd.f32 %v3257_v15, %v3231_v39 }
 0xcc6   :  { %v3291_v50 = vadd.f32 %v3290_v59, %v3258_v37 }
 0xcc8   :  { %v3316_v38 = vadd.f32 %v3315_v40, %v3291_v50  ;;  %v3456_v3 = vpop.f32.mrf.mxu0 }
 0xcca   :  { %v3385_v4 = vpop.f32.mrf.mxu2  ;;  %v3318_v44 = vadd.f32 %v6290_v47, %v3316_v38  ;;  %v3541_v39 = vpop.f32.mrf.mxu3 }
 0xccb   :  { %v3427_v60 = vadd.f32 %v3426_v22, %v3385_v4 }
 0xccc   :  { %5458 = vtanh.f32 %v3318_v44  ;;  %v5364_v22 = vmul.f32 -1.442695, %v3318_v44 }
 0xccd   :  { %v3457_v31 = vadd.f32 %v3456_v3, %v3427_v60 }
 0xccf   :  { %v3484_v53 = vadd.f32 %v3483_v61, %v3457_v31 }
 0xcd2   :  { %v3516_v9 = vpop.f32.mrf.mxu2  ;;  %v5459_v45 = vpop.eup %5458 }
 0xcd3   :  { %v3517_v51 = vadd.f32 %v3516_v9, %v3484_v53  ;;  %3341 = vrot.lane.b32.xlu2 %v5459_v45, %s5631_s26 }
 0xcd5   :  { %v3542_v50 = vadd.f32 %v3541_v39, %v3517_v51 }
 0xcd7   :  { %v3544_v40 = vadd.f32 %v3542_v50, %v3358_v58 }
 0xcd9   :  { %5460 = vtanh.f32 %v3544_v40  ;;  %v5365_v43 = vmul.f32 -1.442695, %v3544_v40 }
 0xcda   :  { %5462 = vpow2.f32 %v5364_v22 }
 0xcdf   :  { %v5461_v59 = vpop.eup %5460 }
 0xce0   :  { %3567 = vrot.lane.b32.xlu0 %v5461_v59, %s5631_s26  ;;  %v5463_v38 = vpop.eup %5462 }
 0xce1   :  { %v3322_v37 = vadd.f32 1.0, %v5463_v38 }
 0xce3   :  { %5464 = vrcp.f32 %v3322_v37  ;;  %v3334_v4 = vand.u32 2147483648, %v3322_v37  ;;  %vm3328_vm8 = vweird.f32 %v3322_v37  ;;  %v3332_v60 = vand.u32 2147483647, %v3322_v37 }
 0xce4   :  { %5466 = vpow2.f32 %v5365_v43 }
 0xce5   :  { %v3335_v31 = vor.u32 1.1754944e-38, %v3334_v4  ;;  %vm3333_vm10 = vcmp.eq.f32.partialorder %v3332_v60, 8.507059e+37 }
 0xce9   :  { %v5465_v15 = vpop.eup %5464 }
 0xcea   :  { %v3324_v1 = vmul.f32 %v5465_v15, %v3322_v37  ;;  %vm3329_vm7 = vweird.f32 %v5465_v15  ;;  %v5467_v8 = vpop.eup %5466 }
 0xceb   :  { %vm3330_vm9 = vmor %vm3328_vm8, %vm3329_vm7  ;;  %v3548_v9 = vadd.f32 1.0, %v5467_v8 }
 0xcec   :  { %v3325_v29 = vsub.f32 1.0, %v3324_v1 }
 0xced   :  { %5468 = vrcp.f32 %v3548_v9  ;;  %v3560_v40 = vand.u32 2147483648, %v3548_v9  ;;  %vm3554_vm12 = vweird.f32 %v3548_v9  ;;  %v3558_v59 = vand.u32 2147483647, %v3548_v9 }
 0xcee   :  { %v3326_v54 = vmul.f32 %v5465_v15, %v3325_v29 }
 0xcef   :  { %v3561_v38 = vor.u32 1.1754944e-38, %v3560_v40  ;;  %vm3559_vm14 = vcmp.eq.f32.partialorder %v3558_v59, 8.507059e+37 }
 0xcf0   :  { %v3327_v52 = vadd.f32 %v5465_v15, %v3326_v54 }
 0xcf2   :  { %v3331_v3 = vsel %vm3330_vm9, %v5465_v15, %v3327_v52 }
 0xcf3   :  { %v3336_v61 = vsel %vm3333_vm10, %v3335_v31, %v3331_v3  ;;  %v5469_v45 = vpop.eup %5468 }
 0xcf4   :  { %v3550_v58 = vmul.f32 %v5469_v45, %v3548_v9  ;;  %vm3555_vm11 = vweird.f32 %v5469_v45  ;;  %v3339_v29 = vmul.f32 %v3336_v61, %v6299_v46 }
 0xcf5   :  { %vm3556_vm13 = vmor %vm3554_vm12, %vm3555_vm11 }
 0xcf6   :  { %v3551_v51 = vsub.f32 1.0, %v3550_v58 }
 0xcf8   :  { %v3552_v39 = vmul.f32 %v5469_v45, %v3551_v51 }
 0xcfa   :  { %v3553_v50 = vadd.f32 %v5469_v45, %v3552_v39 }
 0xcfc   :  { %v3557_v22 = vsel %vm3556_vm13, %v5469_v45, %v3553_v50 }
 0xcfd   :  { %v3562_v15 = vsel %vm3559_vm14, %v3561_v38, %v3557_v22 }
 0xcfe   :  { %v3565_v4 = vmul.f32 %v3562_v15, %v6304_v0 }
 0xd2d   :  { %v3342_v44 = vpop.permute.xlu2 %3341 }
 0xd2e   :  { %v3344_v53 = vmul.f32 %v3342_v44, %v3336_v61 }
 0xd30   :  { %3346 = vrot.lane.b32.xlu1 %v3344_v53, %s5631_s26 }
 0xd52   :  { %v3568_v37 = vpop.permute.xlu0 %3567 }
 0xd53   :  { %v3570_v1 = vmul.f32 %v3568_v37, %v3562_v15 }
 0xd55   :  { %3572 = vrot.lane.b32.xlu2 %v3570_v1, %s5631_s26  ;;  %v6743_v1 = vld [vmem:[#allocation17_spill] sm:$0xff] }
 0xda2   :  { %v3347_v54 = vpop.permute.xlu1 %3346 }
 0xda3   :  { %v6400_v43 = vadd.f32 %v3347_v54, %v3339_v29  ;;  %v6744_v29 = vld [vmem:[#allocation21_spill] sm:$0xff]  ;;  %v6745_v54 = vld [vmem:[#allocation18_spill] sm:$0xff] }
 0xda5   :  { %5470 = vtanh.f32 %v6400_v43 }
 0xdab   :  { %v5471_v52 = vpop.eup %5470 }
 0xdac   :  { %3352 = vrot.lane.b32.xlu0 %v5471_v52, %s5631_s26  ;;  %v6746_v52 = vld [vmem:[#allocation19_spill] sm:$0xff] }
 0xdaf   :  { %v3573_v60 = vpop.permute.xlu2 %3572 }
 0xdb0   :  { %v6405_v3 = vadd.f32 %v3573_v60, %v3565_v4  ;;  %v6747_v4 = vld [vmem:[#allocation26_spill] sm:$0xff]  ;;  %v6748_v60 = vld [vmem:[#allocation27_spill] sm:$0xff] }
 0xdb2   :  { %5472 = vtanh.f32 %v6405_v3 }
 0xdb8   :  { %v5473_v31 = vpop.eup %5472 }
 0xdb9   :  { %3578 = vrot.lane.b32.xlu1 %v5473_v31, %s5631_s26  ;;  %v6749_v31 = vld [vmem:[#allocation22_spill] sm:$0xff] }
 0xe1e   :  { %v3353_v44 = vpop.permute.xlu0 %3352 }
 0xe1f   :  { %v3355_v46 = vmul.f32 %v3353_v44, %v3336_v61  ;;  %v6750_v44 = vld [vmem:[#allocation28_spill] sm:$0xff] }
 0xe21   :  { %3583 = vrot.lane.b32.xlu2 %v3355_v46, %s5632_s27  ;;  %v6751_v46 = vld [vmem:[#allocation23_spill] sm:$0xff] }
 0xe2b   :  { %v3579_v8 = vpop.permute.xlu1 %3578 }
 0xe2c   :  { %v3581_v53 = vmul.f32 %v3579_v8, %v3562_v15  ;;  %v6752_v8 = vld [vmem:[#allocation29_spill] sm:$0xff] }
 0xe2e   :  { %3773 = vrot.lane.b32.xlu0 %v3581_v53, %s5632_s27  ;;  %v6753_v53 = vld [vmem:[#allocation24_spill] sm:$0xff] }
 0xe7b   :  { %v3584_v9 = vpop.permute.xlu2 %3583 }
 0xe7c   :  { %v3585_v45 = vsel %vm98_vm0, %v3584_v9, 0  ;;  %v6754_v9 = vld [vmem:[#allocation25_spill] sm:$0xff] }
 0xe7d   :  { %v3607_v0 = vand.u32 4294901760, %v3585_v45 }
 0xe7f   :  { %v3608_v58 = vsub.f32 %v3585_v45, %v3607_v0  ;;  %3653 = vmatmul.f32.vlgmr.msra.gmra.mxu1 %v3607_v0 }
 0xe80   :  { %3890 = vmatpush.msra.mxu1 %v5797_v33 }
 0xe81   :  { %v3609_v51 = vand.u32 4294901760, %v3608_v58  ;;  %3683 = vmatmul.f32.vlgmr.msra.gmra.mxu2 %v3608_v58 }
 0xe82   :  { %3892 = vmatpush.msra.mxu1 %v5816_v42  ;;  %3919 = vmatpush.msra.mxu2 %v5834_v48 }
 0xe83   :  { %v3610_v61 = vsub.f32 %v3608_v58, %v3609_v51  ;;  %3710 = vmatmul.f32.vlgmr.msra.gmra.mxu3 %v3609_v51 }
 0xe84   :  { %3894 = vmatpush.msra.mxu1 %v5895_v11  ;;  %3950 = vmatpush.msra.mxu3 %v5797_v33 }
 0xe85   :  { %v3611_v39 = vand.u32 4294901760, %v3610_v61  ;;  %3923 = vmatpush.msra.mxu2 %v5851_v55 }
 0xe86   :  { %3896 = vmatpush.msra.mxu1 %v5900_v25  ;;  %3952 = vmatpush.msra.mxu3 %v5816_v42 }
 0xe87   :  { %3612 = vmatmul.f32.vlgmr.msra.gmra.mxu0 %v3611_v39  ;;  %3768 = vmatmul.f32.vlgmr.msrb.gmra.mxu1 %v3607_v0 }
 0xe88   :  { %3861 = vmatpush.msra.mxu0 %v5814_v41  ;;  %3954 = vmatpush.msra.mxu3 %v5895_v11 }
 0xe89   :  { %4049 = vmatpush.msrb.mxu1 %v5745_v26  ;;  %3927 = vmatpush.msra.mxu2 %v5905_v28 }
 0xe8a   :  { %3864 = vmatpush.msra.mxu0 %v5837_v49  ;;  %3956 = vmatpush.msra.mxu3 %v5900_v25 }
 0xe8b   :  { %4055 = vmatpush.msrb.mxu1 %v5748_v27  ;;  %3931 = vmatpush.msra.mxu2 %v5917_v34 }
 0xe8c   :  { %3867 = vmatpush.msra.mxu0 %v5898_v24 }
 0xe8d   :  { %4061 = vmatpush.msrb.mxu1 %v5757_v30 }
 0xe8e   :  { %3870 = vmatpush.msra.mxu0 %v5908_v63 }
 0xe8f   :  { %3743 = vmatmul.f32.vlgmr.msrb.gmra.mxu0 %v3607_v0  ;;  %4067 = vmatpush.msrb.mxu1 %v5760_v32 }
 0xe90   :  { %4016 = vmatpush.msrb.mxu0 %v5698_v5 }
 0xe92   :  { %4018 = vmatpush.msrb.mxu0 %v5700_v6 }
 0xe94   :  { %4020 = vmatpush.msrb.mxu0 %v5702_v7 }
 0xe96   :  { %4022 = vmatpush.msrb.mxu0 %v5704_v10 }
 0xea0   :  { %v3774_v50 = vpop.permute.xlu0 %3773 }
 0xea1   :  { %v3775_v40 = vsel %vm98_vm0, %v3774_v50, 0 }
 0xea2   :  { %v3797_v59 = vand.u32 4294901760, %v3775_v40 }
 0xea4   :  { %v3798_v22 = vsub.f32 %v3775_v40, %v3797_v59  ;;  %3843 = vmatmul.f32.vlgmr.msrb.gmra.mxu3 %v3797_v59 }
 0xea5   :  { %4116 = vmatpush.msrb.mxu3 %v5698_v5 }
 0xea6   :  { %v3799_v38 = vand.u32 4294901760, %v3798_v22  ;;  %3873 = vmatmul.f32.vlgmr.msra.gmra.mxu0 %v3798_v22 }
 0xea7   :  { %4118 = vmatpush.msrb.mxu3 %v5700_v6  ;;  %4145 = vmatpush.msra.mxu0 %v5724_v17 }
 0xea8   :  { %v3800_v37 = vsub.f32 %v3798_v22, %v3799_v38  ;;  %3900 = vmatmul.f32.vlgmr.msra.gmra.mxu1 %v3799_v38 }
 0xea9   :  { %4120 = vmatpush.msrb.mxu3 %v5702_v7  ;;  %4149 = vmatpush.msra.mxu0 %v5727_v18 }
 0xeaa   :  { %v3801_v15 = vand.u32 4294901760, %v3800_v37  ;;  %4176 = vmatpush.msra.mxu1 %v5698_v5 }
 0xeab   :  { %4122 = vmatpush.msrb.mxu3 %v5704_v10  ;;  %4153 = vmatpush.msra.mxu0 %v5730_v20 }
 0xeac   :  { %3802 = vmatmul.f32.vlgmr.msrb.gmra.mxu2 %v3801_v15  ;;  %3958 = vmatmul.f32.vlgmr.msra.gmra.mxu3 %v3797_v59 }
 0xead   :  { %4178 = vmatpush.msra.mxu1 %v5700_v6  ;;  %4087 = vmatpush.msrb.mxu2 %v5708_v12 }
 0xeae   :  { %4028 = vmatmul.f32.vlgmr.msrb.gmra.mxu0 %v3801_v15  ;;  %4277 = vmatpush.msra.mxu3 %v5853_v56 }
 0xeaf   :  { %4157 = vmatpush.msra.mxu0 %v5734_v21  ;;  %4180 = vmatpush.msra.mxu1 %v5702_v7 }
 0xeb0   :  { %4069 = vmatmul.f32.vlgmr.msrb.gmra.mxu1 %v3797_v59  ;;  %4090 = vmatpush.msrb.mxu2 %v5712_v13 }
 0xeb1   :  { %4182 = vmatpush.msra.mxu1 %v5704_v10  ;;  %4283 = vmatpush.msra.mxu3 %v5855_v57 }
 0xeb2   :  { %4093 = vmatpush.msrb.mxu2 %v5716_v14  ;;  %4315 = vmatpush.msrb.mxu0 %v5801_v35 }
 0xeb3   :  { %4289 = vmatpush.msra.mxu3 %v5867_v62  ;;  %4344 = vmatpush.msrb.mxu1 %v5788_v19 }
 0xeb4   :  { %3933 = vmatmul.f32.vlgmr.msra.gmra.mxu2 %v3797_v59  ;;  %4126 = vmatmul.f32.vlgmr.msrb.gmra.mxu3 %v3799_v38 }
 0xeb5   :  { %4096 = vmatpush.msrb.mxu2 %v5719_v16  ;;  %4318 = vmatpush.msrb.mxu0 %v5804_v36 }
 0xeb6   :  { %4159 = vmatmul.f32.vlgmr.msra.gmra.mxu0 %v3797_v59  ;;  %4295 = vmatpush.msra.mxu3 %v5875_v2 }
 0xeb7   :  { %4321 = vmatpush.msrb.mxu0 %v6725_v23  ;;  %4346 = vmatpush.msrb.mxu1 %v6743_v1 }
 0xeb8   :  { %4184 = vmatmul.f32.vlgmr.msra.gmra.mxu1 %v3797_v59  ;;  %4244 = vmatpush.msra.mxu2 %v5788_v19 }
 0xeb9   :  { %4324 = vmatpush.msrb.mxu0 %v6744_v29  ;;  %4348 = vmatpush.msrb.mxu1 %v6745_v54 }
 0xeba   :  { %4404 = vmatpush.msrb.mxu3 %v5788_v19  ;;  %4246 = vmatpush.msra.mxu2 %v6743_v1 }
 0xebb   :  { %4350 = vmatpush.msrb.mxu1 %v6746_v52  ;;  %4434 = vmatpush.msra.mxu0 %v5797_v33 }
 0xebc   :  { %4099 = vmatmul.f32.vlgmr.msrb.gmra.mxu2 %v3798_v22  ;;  %4406 = vmatpush.msrb.mxu3 %v6743_v1 }
 0xebd   :  { %4248 = vmatpush.msra.mxu2 %v6745_v54  ;;  %4436 = vmatpush.msra.mxu0 %v5816_v42 }
 0xebe   :  { %4408 = vmatpush.msrb.mxu3 %v6745_v54  ;;  %4467 = vmatpush.msra.mxu1 %v6747_v4 }
 0xebf   :  { %4250 = vmatpush.msra.mxu2 %v6746_v52  ;;  %4438 = vmatpush.msra.mxu0 %v5895_v11 }
 0xec0   :  { %4410 = vmatpush.msrb.mxu3 %v6746_v52  ;;  %4473 = vmatpush.msra.mxu1 %v6748_v60 }
 0xec1   :  { %4373 = vmatpush.msrb.mxu2 %v6749_v31  ;;  %4440 = vmatpush.msra.mxu0 %v5900_v25 }
 0xec2   :  { %4479 = vmatpush.msra.mxu1 %v6750_v44 }
 0xec3   :  { %4377 = vmatpush.msrb.mxu2 %v6751_v46 }
 0xec4   :  { %4485 = vmatpush.msra.mxu1 %v6752_v8 }
 0xec5   :  { %4381 = vmatpush.msrb.mxu2 %v6753_v53 }
 0xec7   :  { %4385 = vmatpush.msrb.mxu2 %v6754_v9 }
 0xefc   :  { %v3654_v0 = vpop.f32.mrf.mxu1 }
 0xf04   :  { %v3613_v45 = vpop.f32.mrf.mxu0  ;;  %v3684_v51 = vpop.f32.mrf.mxu2 }
 0xf05   :  { %v3655_v58 = vadd.f32 %v3654_v0, %v3613_v45  ;;  %v3769_v59 = vpop.f32.mrf.mxu1 }
 0xf06   :  { %v3711_v39 = vpop.f32.mrf.mxu3 }
 0xf07   :  { %v3685_v61 = vadd.f32 %v3684_v51, %v3655_v58 }
 0xf09   :  { %v3712_v40 = vadd.f32 %v3711_v39, %v3685_v61 }
 0xf0c   :  { %v3744_v50 = vpop.f32.mrf.mxu0 }
 0xf0d   :  { %v3745_v22 = vadd.f32 %v3744_v50, %v3712_v40 }
 0xf0f   :  { %v3770_v37 = vadd.f32 %v3769_v59, %v3745_v22  ;;  %v4001_v59 = vld [vmem:[#allocation7 + $0x30] sm:$0xff] }
 0xf23   :  { %v3874_v15 = vpop.f32.mrf.mxu0 }
 0xf25   :  { %v3901_v8 = vpop.f32.mrf.mxu1 }
 0xf27   :  { %v3844_v38 = vpop.f32.mrf.mxu3 }
 0xf2b   :  { %v4029_v45 = vpop.f32.mrf.mxu0 }
 0xf2d   :  { %v4070_v58 = vpop.f32.mrf.mxu1 }
 0xf2e   :  { %v4071_v61 = vadd.f32 %v4070_v58, %v4029_v45 }
 0xf2f   :  { %v3803_v44 = vpop.f32.mrf.mxu2  ;;  %v3959_v9 = vpop.f32.mrf.mxu3 }
 0xf30   :  { %v3804_v29 = vadd.f32 %v3803_v44, %v3770_v37 }
 0xf32   :  { %v3845_v46 = vadd.f32 %v3844_v38, %v3804_v29  ;;  %v6489_v29 = vld [vmem:[%s6658_s4] ss:$0 sm:$0xff] }
 0xf33   :  { %v4160_v44 = vpop.f32.mrf.mxu0 }
 0xf34   :  { %v3875_v53 = vadd.f32 %v3874_v15, %v3845_v46 }
 0xf36   :  { %v3902_v60 = vadd.f32 %v3901_v8, %v3875_v53 }
 0xf37   :  { %v3934_v23 = vpop.f32.mrf.mxu2  ;;  %v4127_v40 = vpop.f32.mrf.mxu3 }
 0xf38   :  { %v3935_v31 = vadd.f32 %v3934_v23, %v3902_v60  ;;  %v4002_v23 = vadd.f32 %v6489_v29, %v4001_v59 }
 0xf3a   :  { %v3960_v0 = vadd.f32 %v3959_v9, %v3935_v31  ;;  %v4185_v31 = vpop.f32.mrf.mxu1 }
 0xf3c   :  { %v3962_v51 = vadd.f32 %v6290_v47, %v3960_v0 }
 0xf3e   :  { %5474 = vtanh.f32 %v3962_v51  ;;  %v5366_v38 = vmul.f32 -1.442695, %v3962_v51 }
 0xf3f   :  { %v4100_v39 = vpop.f32.mrf.mxu2 }
 0xf40   :  { %v4101_v50 = vadd.f32 %v4100_v39, %v4071_v61 }
 0xf42   :  { %v4128_v22 = vadd.f32 %v4127_v40, %v4101_v50 }
 0xf44   :  { %v5475_v37 = vpop.eup %5474  ;;  %v4161_v60 = vadd.f32 %v4160_v44, %v4128_v22 }
 0xf45   :  { %3985 = vrot.lane.b32.xlu1 %v5475_v37, %s5631_s26 }
 0xf46   :  { %v4186_v47 = vadd.f32 %v4185_v31, %v4161_v60 }
 0xf48   :  { %v4188_v46 = vadd.f32 %v4186_v47, %v4002_v23 }
 0xf4a   :  { %5476 = vtanh.f32 %v4188_v46  ;;  %v5367_v53 = vmul.f32 -1.442695, %v4188_v46 }
 0xf4c   :  { %5478 = vpow2.f32 %v5367_v53 }
 0xf4d   :  { %5480 = vpow2.f32 %v5366_v38 }
 0xf50   :  { %v5477_v8 = vpop.eup %5476 }
 0xf51   :  { %4211 = vrot.lane.b32.xlu2 %v5477_v8, %s5631_s26 }
 0xf52   :  { %v5479_v9 = vpop.eup %5478 }
 0xf53   :  { %v4192_v15 = vadd.f32 1.0, %v5479_v9  ;;  %v5481_v45 = vpop.eup %5480 }
 0xf54   :  { %v3966_v58 = vadd.f32 1.0, %v5481_v45 }
 0xf55   :  { %5482 = vrcp.f32 %v4192_v15  ;;  %v4204_v44 = vand.u32 2147483648, %v4192_v15  ;;  %vm4198_vm1 = vweird.f32 %v4192_v15  ;;  %v4202_v37 = vand.u32 2147483647, %v4192_v15 }
 0xf56   :  { %5484 = vrcp.f32 %v3966_v58  ;;  %v3978_v9 = vand.u32 2147483648, %v3966_v58  ;;  %vm3972_vm5 = vweird.f32 %v3966_v58  ;;  %v3976_v38 = vand.u32 2147483647, %v3966_v58 }
 0xf57   :  { %v4205_v60 = vor.u32 1.1754944e-38, %v4204_v44  ;;  %vm4203_vm3 = vcmp.eq.f32.partialorder %v4202_v37, 8.507059e+37 }
 0xf58   :  { %vm3977_vm7 = vcmp.eq.f32.partialorder %v3976_v38, 8.507059e+37 }
 0xf5b   :  { %v5483_v0 = vpop.eup %5482 }
 0xf5c   :  { %v4194_v61 = vmul.f32 %v5483_v0, %v4192_v15  ;;  %v5485_v40 = vpop.eup %5484  ;;  %vm4199_vm15 = vweird.f32 %v5483_v0 }
 0xf5d   :  { %v3968_v22 = vmul.f32 %v5485_v40, %v3966_v58  ;;  %vm4200_vm2 = vmor %vm4198_vm1, %vm4199_vm15  ;;  %vm3973_vm4 = vweird.f32 %v5485_v40 }
 0xf5e   :  { %v4195_v39 = vsub.f32 1.0, %v4194_v61  ;;  %vm3974_vm6 = vmor %vm3972_vm5, %vm3973_vm4  ;;  %v3979_v61 = vor.u32 1.1754944e-38, %v3978_v9 }
 0xf5f   :  { %v3969_v51 = vsub.f32 1.0, %v3968_v22 }
 0xf60   :  { %v4196_v50 = vmul.f32 %v5483_v0, %v4195_v39 }
 0xf61   :  { %v3970_v8 = vmul.f32 %v5485_v40, %v3969_v51 }
 0xf62   :  { %v4197_v59 = vadd.f32 %v5483_v0, %v4196_v50 }
 0xf63   :  { %v3971_v53 = vadd.f32 %v5485_v40, %v3970_v8 }
 0xf64   :  { %v4201_v23 = vsel %vm4200_vm2, %v5483_v0, %v4197_v59 }
 0xf65   :  { %v4206_v47 = vsel %vm4203_vm3, %v4205_v60, %v4201_v23  ;;  %v3975_v45 = vsel %vm3974_vm6, %v5485_v40, %v3971_v53 }
 0xf66   :  { %v3980_v0 = vsel %vm3977_vm7, %v3979_v61, %v3975_v45  ;;  %v4209_v50 = vmul.f32 %v4206_v47, %v6405_v3  ;;  %vm5346_vm7 = vcmask 7168  }
 0xf67   :  { %v3983_v58 = vmul.f32 %v3980_v0, %v6400_v43 }
 0xfab   :  { %v4212_v31 = vpop.permute.xlu2 %4211 }
 0xfac   :  { %v4214_v46 = vmul.f32 %v4212_v31, %v4206_v47 }
 0xfae   :  { %4216 = vrot.lane.b32.xlu1 %v4214_v46, %s5631_s26 }
 0xfb7   :  { %v3986_v15 = vpop.permute.xlu1 %3985 }
 0xfb8   :  { %v3988_v39 = vmul.f32 %v3986_v15, %v3980_v0 }
 0xfba   :  { %3990 = vrot.lane.b32.xlu0 %v3988_v39, %s5631_s26 }
0x1020   :  { %v4217_v59 = vpop.permute.xlu1 %4216 }
0x1021   :  { %v6497_v22 = vadd.f32 %v4217_v59, %v4209_v50 }
0x1023   :  { %5486 = vtanh.f32 %v6497_v22 }
0x1029   :  { %v5487_v44 = vpop.eup %5486 }
0x102a   :  { %4222 = vrot.lane.b32.xlu0 %v5487_v44, %s5631_s26 }
0x102c   :  { %v3991_v40 = vpop.permute.xlu0 %3990 }
0x102d   :  { %v6502_v37 = vadd.f32 %v3991_v40, %v3983_v58 }
0x102f   :  { %5488 = vtanh.f32 %v6502_v37 }
0x1035   :  { %v5489_v23 = vpop.eup %5488 }
0x1036   :  { %3996 = vrot.lane.b32.xlu2 %v5489_v23, %s5631_s26 }
0x1090   :  { %v3997_v51 = vpop.permute.xlu2 %3996 }
0x1091   :  { %v3999_v3 = vmul.f32 %v3997_v51, %v3980_v0 }
0x1093   :  { %4227 = vrot.lane.b32.xlu1 %v3999_v3, %s5632_s27 }
0x109c   :  { %v4223_v60 = vpop.permute.xlu0 %4222 }
0x109d   :  { %v4225_v31 = vmul.f32 %v4223_v60, %v4206_v47 }
0x109f   :  { %4417 = vrot.lane.b32.xlu2 %v4225_v31, %s5632_s27  ;;  %v6594_v31 = vld [vmem:[%s6659_s5] ss:$0 sm:$0xff] }
0x10f9   :  { %v4418_v46 = vpop.permute.xlu2 %4417 }
0x10fa   :  { %v4419_v8 = vsel %vm98_vm0, %v4418_v46, 0 }
0x10fb   :  { %v6509_v43 = vand.u32 4294901760, %v4419_v8 }
0x10fd   :  { %v4442_v53 = vsub.f32 %v4419_v8, %v6509_v43 }
0x10ff   :  { %v4443_v61 = vand.u32 4294901760, %v4442_v53 }
0x1101   :  { %v4444_v47 = vsub.f32 %v4442_v53, %v4443_v61 }
0x1103   :  { %v4445_v59 = vand.u32 4294901760, %v4444_v47 }
0x1105   :  { %v4228_v9 = vpop.permute.xlu1 %4227 }
0x1106   :  { %v4229_v38 = vsel %vm98_vm0, %v4228_v9, 0 }
0x1107   :  { %v4251_v45 = vand.u32 4294901760, %v4229_v38 }
0x1109   :  { %v4252_v15 = vsub.f32 %v4229_v38, %v4251_v45  ;;  %4297 = vmatmul.f32.vlgmr.msra.gmra.mxu3 %v4251_v45  ;;  %v4645_v38 = vld [vmem:[#allocation7 + $0x38] sm:$0xff] }
0x110a   :  { %4534 = vmatpush.msra.mxu3 %v5797_v33 }
0x110b   :  { %v4253_v0 = vand.u32 4294901760, %v4252_v15  ;;  %4327 = vmatmul.f32.vlgmr.msrb.gmra.mxu0 %v4252_v15 }
0x110c   :  { %4536 = vmatpush.msra.mxu3 %v5816_v42  ;;  %4563 = vmatpush.msrb.mxu0 %v5834_v48 }
0x110d   :  { %v4254_v39 = vsub.f32 %v4252_v15, %v4253_v0  ;;  %4354 = vmatmul.f32.vlgmr.msrb.gmra.mxu1 %v4253_v0  ;;  %v4646_v0 = vadd.f32 %v6489_v29, %v4645_v38 }
0x110e   :  { %4538 = vmatpush.msra.mxu3 %v5895_v11  ;;  %4567 = vmatpush.msrb.mxu0 %v5851_v55 }
0x110f   :  { %v4255_v50 = vand.u32 4294901760, %v4254_v39  ;;  %4594 = vmatpush.msrb.mxu1 %v5797_v33 }
0x1110   :  { %4540 = vmatpush.msra.mxu3 %v5900_v25  ;;  %4571 = vmatpush.msrb.mxu0 %v5905_v28 }
0x1111   :  { %4256 = vmatmul.f32.vlgmr.msra.gmra.mxu2 %v4255_v50  ;;  %4412 = vmatmul.f32.vlgmr.msrb.gmra.mxu3 %v4251_v45 }
0x1112   :  { %4596 = vmatpush.msrb.mxu1 %v5816_v42  ;;  %4505 = vmatpush.msra.mxu2 %v5814_v41 }
0x1113   :  { %4446 = vmatmul.f32.vlgmr.msra.gmra.mxu0 %v4445_v59  ;;  %4693 = vmatpush.msrb.mxu3 %v5745_v26 }
0x1114   :  { %4575 = vmatpush.msrb.mxu0 %v5917_v34  ;;  %4598 = vmatpush.msrb.mxu1 %v5895_v11 }
0x1115   :  { %4487 = vmatmul.f32.vlgmr.msra.gmra.mxu1 %v6509_v43  ;;  %4508 = vmatpush.msra.mxu2 %v5837_v49 }
0x1116   :  { %4600 = vmatpush.msrb.mxu1 %v5900_v25  ;;  %4699 = vmatpush.msrb.mxu3 %v5748_v27 }
0x1117   :  { %4731 = vmatpush.msra.mxu0 %v5708_v12  ;;  %4511 = vmatpush.msra.mxu2 %v5898_v24  ;;  %v6759_v12 = vld [vmem:[#allocation21_spill] sm:$0xff] }
0x1118   :  { %4705 = vmatpush.msrb.mxu3 %v5757_v30  ;;  %4760 = vmatpush.msra.mxu1 %v5698_v5 }
0x1119   :  { %4387 = vmatmul.f32.vlgmr.msrb.gmra.mxu2 %v4251_v45  ;;  %4544 = vmatmul.f32.vlgmr.msra.gmra.mxu3 %v4443_v61 }
0x111a   :  { %4734 = vmatpush.msra.mxu0 %v5712_v13  ;;  %4514 = vmatpush.msra.mxu2 %v5908_v63  ;;  %v6760_v13 = vld [vmem:[#allocation28_spill] sm:$0xff] }
0x111b   :  { %4577 = vmatmul.f32.vlgmr.msrb.gmra.mxu0 %v6509_v43  ;;  %4711 = vmatpush.msrb.mxu3 %v5760_v32 }
0x111c   :  { %4737 = vmatpush.msra.mxu0 %v5716_v14  ;;  %4762 = vmatpush.msra.mxu1 %v5700_v6  ;;  %v6761_v14 = vld [vmem:[#allocation24_spill] sm:$0xff] }
0x111d   :  { %4602 = vmatmul.f32.vlgmr.msrb.gmra.mxu1 %v6509_v43  ;;  %4660 = vmatpush.msrb.mxu2 %v5698_v5 }
0x111e   :  { %4740 = vmatpush.msra.mxu0 %v5719_v16  ;;  %4764 = vmatpush.msra.mxu1 %v5702_v7  ;;  %v6762_v16 = vld [vmem:[#allocation29_spill] sm:$0xff] }
0x111f   :  { %4820 = vmatpush.msra.mxu3 %v5698_v5  ;;  %4662 = vmatpush.msrb.mxu2 %v5700_v6  ;;  %v6755_v5 = vld [vmem:[#allocation22_spill] sm:$0xff] }
0x1120   :  { %4766 = vmatpush.msra.mxu1 %v5704_v10  ;;  %4888 = vmatpush.msrb.mxu0 %v5788_v19 }
0x1121   :  { %4517 = vmatmul.f32.vlgmr.msra.gmra.mxu2 %v4442_v53  ;;  %4713 = vmatmul.f32.vlgmr.msrb.gmra.mxu3 %v6509_v43 }
0x1122   :  { %4822 = vmatpush.msra.mxu3 %v5700_v6  ;;  %4664 = vmatpush.msrb.mxu2 %v5702_v7  ;;  %v6756_v6 = vld [vmem:[#allocation20_spill] sm:$0xff] }
0x1123   :  { %4743 = vmatmul.f32.vlgmr.msra.gmra.mxu0 %v4442_v53  ;;  %4921 = vmatpush.msrb.mxu1 %v5853_v56 }
0x1124   :  { %4824 = vmatpush.msra.mxu3 %v5702_v7  ;;  %4666 = vmatpush.msrb.mxu2 %v5704_v10  ;;  %v6757_v7 = vld [vmem:[#allocation27_spill] sm:$0xff] }
0x1125   :  { %4770 = vmatmul.f32.vlgmr.msra.gmra.mxu1 %v4443_v61  ;;  %4890 = vmatpush.msrb.mxu0 %v6743_v1 }
0x1126   :  { %4789 = vmatpush.msra.mxu2 %v5724_v17  ;;  %4826 = vmatpush.msra.mxu3 %v5704_v10  ;;  %v6758_v10 = vld [vmem:[#allocation23_spill] sm:$0xff]  ;;  %v6763_v17 = vld [vmem:[#allocation25_spill] sm:$0xff] }
0x1127   :  { %4927 = vmatpush.msrb.mxu1 %v5855_v57  ;;  %4892 = vmatpush.msrb.mxu0 %v6745_v54 }
0x1128   :  { %4793 = vmatpush.msra.mxu2 %v5727_v18  ;;  %4988 = vmatpush.msrb.mxu3 %v5788_v19 }
0x1129   :  { %4933 = vmatpush.msrb.mxu1 %v5867_v62  ;;  %4672 = vmatmul.f32.vlgmr.msrb.gmra.mxu2 %v4445_v59 }
0x112a   :  { %4828 = vmatmul.f32.vlgmr.msra.gmra.mxu3 %v6509_v43  ;;  %4797 = vmatpush.msra.mxu2 %v5730_v20 }
0x112b   :  { %4939 = vmatpush.msrb.mxu1 %v5875_v2  ;;  %4990 = vmatpush.msrb.mxu3 %v6743_v1 }
0x112c   :  { %4801 = vmatpush.msra.mxu2 %v5734_v21  ;;  %4894 = vmatpush.msrb.mxu0 %v6746_v52 }
0x112d   :  { %5048 = vmatpush.msra.mxu1 %v5788_v19  ;;  %4992 = vmatpush.msrb.mxu3 %v6745_v54 }
0x112e   :  { %4959 = vmatpush.msrb.mxu2 %v5801_v35  ;;  %5017 = vmatpush.msra.mxu0 %v6755_v5 }
0x112f   :  { %5050 = vmatpush.msra.mxu1 %v6743_v1  ;;  %4994 = vmatpush.msrb.mxu3 %v6746_v52 }
0x1130   :  { %4962 = vmatpush.msrb.mxu2 %v5804_v36  ;;  %5021 = vmatpush.msra.mxu0 %v6758_v10 }
0x1131   :  { %5052 = vmatpush.msra.mxu1 %v6745_v54  ;;  %5111 = vmatpush.msra.mxu3 %v6747_v4 }
0x1132   :  { %4803 = vmatmul.f32.vlgmr.msra.gmra.mxu2 %v6509_v43  ;;  %5025 = vmatpush.msra.mxu0 %v6761_v14 }
0x1133   :  { %4965 = vmatpush.msrb.mxu2 %v6756_v6  ;;  %5054 = vmatpush.msra.mxu1 %v6746_v52 }
0x1134   :  { %5117 = vmatpush.msra.mxu3 %v6757_v7  ;;  %5029 = vmatpush.msra.mxu0 %v6763_v17 }
0x1135   :  { %4968 = vmatpush.msrb.mxu2 %v6759_v12 }
0x1136   :  { %5123 = vmatpush.msra.mxu3 %v6760_v13 }
0x1137   :  { %5078 = vmatpush.msra.mxu2 %v5797_v33 }
0x1138   :  { %5129 = vmatpush.msra.mxu3 %v6762_v16 }
0x1139   :  { %5080 = vmatpush.msra.mxu2 %v5816_v42 }
0x113b   :  { %5082 = vmatpush.msra.mxu2 %v5895_v11 }
0x113d   :  { %5084 = vmatpush.msra.mxu2 %v5900_v25 }
0x1188   :  { %v4328_v20 = vpop.f32.mrf.mxu0 }
0x118a   :  { %v4355_v21 = vpop.f32.mrf.mxu1 }
0x118c   :  { %v4298_v18 = vpop.f32.mrf.mxu3 }
0x1190   :  { %v4447_v19 = vpop.f32.mrf.mxu0 }
0x1192   :  { %v4488_v57 = vpop.f32.mrf.mxu1 }
0x1194   :  { %v4257_v26 = vpop.f32.mrf.mxu2  ;;  %v4413_v32 = vpop.f32.mrf.mxu3 }
0x1195   :  { %v4299_v27 = vadd.f32 %v4298_v18, %v4257_v26 }
0x1197   :  { %v4329_v30 = vadd.f32 %v4328_v20, %v4299_v27 }
0x1198   :  { %v4578_v52 = vpop.f32.mrf.mxu0 }
0x1199   :  { %v4356_v35 = vadd.f32 %v4355_v21, %v4329_v30 }
0x119a   :  { %v4603_v40 = vpop.f32.mrf.mxu1 }
0x119c   :  { %v4388_v36 = vpop.f32.mrf.mxu2  ;;  %v4545_v1 = vpop.f32.mrf.mxu3 }
0x119d   :  { %v4389_v56 = vadd.f32 %v4388_v36, %v4356_v35 }
0x119f   :  { %v4414_v62 = vadd.f32 %v4413_v32, %v4389_v56 }
0x11a0   :  { %v4744_v43 = vpop.f32.mrf.mxu0 }
0x11a1   :  { %v4448_v2 = vadd.f32 %v4447_v19, %v4414_v62 }
0x11a2   :  { %v4771_v9 = vpop.f32.mrf.mxu1 }
0x11a3   :  { %v4489_v54 = vadd.f32 %v4488_v57, %v4448_v2 }
0x11a4   :  { %v4518_v4 = vpop.f32.mrf.mxu2  ;;  %v4714_v3 = vpop.f32.mrf.mxu3 }
0x11a5   :  { %v4519_v44 = vadd.f32 %v4518_v4, %v4489_v54 }
0x11a7   :  { %v4546_v58 = vadd.f32 %v4545_v1, %v4519_v44 }
0x11a9   :  { %v4579_v23 = vadd.f32 %v4578_v52, %v4546_v58 }
0x11ab   :  { %v4604_v51 = vadd.f32 %v4603_v40, %v4579_v23 }
0x11ac   :  { %v4673_v60 = vpop.f32.mrf.mxu2 }
0x11ad   :  { %v4606_v46 = vadd.f32 %v6594_v31, %v4604_v51  ;;  %v4715_v8 = vadd.f32 %v4714_v3, %v4673_v60  ;;  %v4829_v39 = vpop.f32.mrf.mxu3 }
0x11af   :  { %5490 = vtanh.f32 %v4606_v46  ;;  %v4745_v53 = vadd.f32 %v4744_v43, %v4715_v8  ;;  %v5368_v6 = vmul.f32 -1.442695, %v4606_v46 }
0x11b1   :  { %v4772_v45 = vadd.f32 %v4771_v9, %v4745_v53 }
0x11b5   :  { %v4804_v61 = vpop.f32.mrf.mxu2  ;;  %v5491_v15 = vpop.eup %5490 }
0x11b6   :  { %v4805_v47 = vadd.f32 %v4804_v61, %v4772_v45  ;;  %4629 = vrot.lane.b32.xlu0 %v5491_v15, %s5631_s26 }
0x11b8   :  { %v4830_v50 = vadd.f32 %v4829_v39, %v4805_v47 }
0x11ba   :  { %v4832_v59 = vadd.f32 %v4830_v50, %v4646_v0 }
0x11bc   :  { %5492 = vtanh.f32 %v4832_v59  ;;  %v5369_v10 = vmul.f32 -1.442695, %v4832_v59 }
0x11bd   :  { %5494 = vpow2.f32 %v5368_v6 }
0x11be   :  { %5496 = vpow2.f32 %v5369_v10 }
0x11c2   :  { %v5493_v5 = vpop.eup %5492 }
0x11c3   :  { %4855 = vrot.lane.b32.xlu1 %v5493_v5, %s5631_s26  ;;  %v5495_v7 = vpop.eup %5494 }
0x11c4   :  { %v4610_v12 = vadd.f32 1.0, %v5495_v7  ;;  %v5497_v13 = vpop.eup %5496 }
0x11c5   :  { %v4836_v29 = vadd.f32 1.0, %v5497_v13 }
0x11c6   :  { %5498 = vrcp.f32 %v4610_v12  ;;  %v4622_v27 = vand.u32 2147483648, %v4610_v12  ;;  %vm4616_vm9 = vweird.f32 %v4610_v12  ;;  %v4620_v30 = vand.u32 2147483647, %v4610_v12 }
0x11c7   :  { %5500 = vrcp.f32 %v4836_v29  ;;  %v4848_v1 = vand.u32 2147483648, %v4836_v29  ;;  %vm4842_vm13 = vweird.f32 %v4836_v29  ;;  %v4846_v54 = vand.u32 2147483647, %v4836_v29 }
0x11c8   :  { %v4623_v35 = vor.u32 1.1754944e-38, %v4622_v27  ;;  %vm4621_vm11 = vcmp.eq.f32.partialorder %v4620_v30, 8.507059e+37 }
0x11c9   :  { %v4849_v4 = vor.u32 1.1754944e-38, %v4848_v1  ;;  %vm4847_vm15 = vcmp.eq.f32.partialorder %v4846_v54, 8.507059e+37 }
0x11cc   :  { %v5499_v14 = vpop.eup %5498 }
0x11cd   :  { %v4612_v16 = vmul.f32 %v5499_v14, %v4610_v12  ;;  %v5501_v20 = vpop.eup %5500  ;;  %vm4617_vm8 = vweird.f32 %v5499_v14 }
0x11ce   :  { %v4838_v26 = vmul.f32 %v5501_v20, %v4836_v29  ;;  %vm4618_vm10 = vmor %vm4616_vm9, %vm4617_vm8  ;;  %vm4843_vm12 = vweird.f32 %v5501_v20 }
0x11cf   :  { %v4613_v17 = vsub.f32 1.0, %v4612_v16  ;;  %vm4844_vm14 = vmor %vm4842_vm13, %vm4843_vm12 }
0x11d0   :  { %v4839_v19 = vsub.f32 1.0, %v4838_v26 }
0x11d1   :  { %v4614_v18 = vmul.f32 %v5499_v14, %v4613_v17 }
0x11d2   :  { %v4840_v62 = vmul.f32 %v5501_v20, %v4839_v19 }
0x11d3   :  { %v4615_v21 = vadd.f32 %v5499_v14, %v4614_v18 }
0x11d4   :  { %v4841_v2 = vadd.f32 %v5501_v20, %v4840_v62 }
0x11d5   :  { %v4619_v32 = vsel %vm4618_vm10, %v5499_v14, %v4615_v21 }
0x11d6   :  { %v4624_v56 = vsel %vm4621_vm11, %v4623_v35, %v4619_v32  ;;  %v4845_v52 = vsel %vm4844_vm14, %v5501_v20, %v4841_v2 }
0x11d7   :  { %v4850_v58 = vsel %vm4847_vm15, %v4849_v4, %v4845_v52  ;;  %v4627_v23 = vmul.f32 %v4624_v56, %v6502_v37 }
0x11d8   :  { %v4853_v46 = vmul.f32 %v4850_v58, %v6497_v22 }
0x1228   :  { %v4630_v36 = vpop.permute.xlu0 %4629 }
0x1229   :  { %v4632_v57 = vmul.f32 %v4630_v36, %v4624_v56  ;;  %v5384_v36 = vld [vmem:[%s6660_s6] ss:$0 sm:$0xff] }
0x122b   :  { %4634 = vrot.lane.b32.xlu2 %v4632_v57, %s5631_s26 }
0x1235   :  { %v4856_v44 = vpop.permute.xlu1 %4855 }
0x1236   :  { %v4858_v40 = vmul.f32 %v4856_v44, %v4850_v58 }
0x1238   :  { %4860 = vrot.lane.b32.xlu0 %v4858_v40, %s5631_s26 }
0x1285   :  { %v4635_v51 = vpop.permute.xlu2 %4634 }
0x1286   :  { %v6603_v3 = vadd.f32 %v4635_v51, %v4627_v23 }
0x1288   :  { %5502 = vtanh.f32 %v6603_v3 }
0x128e   :  { %v5503_v60 = vpop.eup %5502 }
0x128f   :  { %4640 = vrot.lane.b32.xlu1 %v5503_v60, %s5631_s26 }
0x12aa   :  { %v4861_v8 = vpop.permute.xlu0 %4860 }
0x12ab   :  { %v6608_v43 = vadd.f32 %v4861_v8, %v4853_v46 }
0x12ad   :  { %5504 = vtanh.f32 %v6608_v43 }
0x12b3   :  { %v5505_v53 = vpop.eup %5504 }
0x12b4   :  { %4866 = vrot.lane.b32.xlu2 %v5505_v53, %s5631_s26 }
0x1301   :  { %v4641_v9 = vpop.permute.xlu1 %4640 }
0x1302   :  { %v4643_v37 = vmul.f32 %v4641_v9, %v4624_v56 }
0x1304   :  { %4871 = vrot.lane.b32.xlu0 %v4643_v37, %s5632_s27 }
0x130e   :  { %v4867_v38 = vpop.permute.xlu2 %4866 }
0x130f   :  { %v4869_v45 = vmul.f32 %v4867_v38, %v4850_v58 }
0x1311   :  { %5061 = vrot.lane.b32.xlu1 %v4869_v45, %s5632_s27 }
0x1376   :  { %v4872_v61 = vpop.permute.xlu0 %4871 }
0x1377   :  { %v4873_v15 = vsel %vm98_vm0, %v4872_v61, 0 }
0x1378   :  { %v4895_v22 = vand.u32 4294901760, %v4873_v15 }
0x137a   :  { %v4896_v0 = vsub.f32 %v4873_v15, %v4895_v22  ;;  %4941 = vmatmul.f32.vlgmr.msrb.gmra.mxu1 %v4895_v22 }
0x137b   :  { %5178 = vmatpush.msrb.mxu1 %v5797_v33 }
0x137c   :  { %v4897_v47 = vand.u32 4294901760, %v4896_v0  ;;  %4971 = vmatmul.f32.vlgmr.msrb.gmra.mxu2 %v4896_v0 }
0x137d   :  { %5180 = vmatpush.msrb.mxu1 %v5816_v42  ;;  %5207 = vmatpush.msrb.mxu2 %v5834_v48 }
0x137e   :  { %v4898_v39 = vsub.f32 %v4896_v0, %v4897_v47  ;;  %4998 = vmatmul.f32.vlgmr.msrb.gmra.mxu3 %v4897_v47  ;;  %v5385_v47 = vld [vmem:[#allocation6] ss:$0 sm:$0xff] }
0x137f   :  { %5182 = vmatpush.msrb.mxu1 %v5895_v11  ;;  %5238 = vmatpush.msrb.mxu3 %v5797_v33 }
0x1380   :  { %v4899_v50 = vand.u32 4294901760, %v4898_v39  ;;  %5211 = vmatpush.msrb.mxu2 %v5851_v55 }
0x1381   :  { %5184 = vmatpush.msrb.mxu1 %v5900_v25  ;;  %5240 = vmatpush.msrb.mxu3 %v5816_v42 }
0x1382   :  { %4900 = vmatmul.f32.vlgmr.msrb.gmra.mxu0 %v4899_v50  ;;  %5056 = vmatmul.f32.vlgmr.msra.gmra.mxu1 %v4895_v22 }
0x1383   :  { %v5062_v59 = vpop.permute.xlu1 %5061  ;;  %5149 = vmatpush.msrb.mxu0 %v5814_v41  ;;  %5242 = vmatpush.msrb.mxu3 %v5895_v11 }
0x1384   :  { %v5063_v5 = vsel %vm98_vm0, %v5062_v59, 0  ;;  %5289 = vst.msk [vmem:[#allocation2] sm:$0xff] %vm98_vm0, %v5062_v59  ;;  %5215 = vmatpush.msrb.mxu2 %v5905_v28 }
0x1385   :  { %v5085_v48 = vand.u32 4294901760, %v5063_v5  ;;  %5152 = vmatpush.msrb.mxu0 %v5837_v49  ;;  %5244 = vmatpush.msrb.mxu3 %v5900_v25 }
0x1386   :  { %5219 = vmatpush.msrb.mxu2 %v5917_v34 }
0x1387   :  { %v5086_v33 = vsub.f32 %v5063_v5, %v5085_v48  ;;  %5131 = vmatmul.f32.vlgmr.msra.gmra.mxu3 %v5085_v48  ;;  %5155 = vmatpush.msrb.mxu0 %v5898_v24 }
0x1389   :  { %v5087_v42 = vand.u32 4294901760, %v5086_v33  ;;  %5158 = vmatpush.msrb.mxu0 %v5908_v63 }
0x138a   :  { %5031 = vmatmul.f32.vlgmr.msra.gmra.mxu0 %v4895_v22 }
0x138b   :  { %v5088_v55 = vsub.f32 %v5086_v33, %v5087_v42  ;;  %5188 = vmatmul.f32.vlgmr.msrb.gmra.mxu1 %v5087_v42 }
0x138d   :  { %v5089_v41 = vand.u32 4294901760, %v5088_v55 }
0x138f   :  { %5090 = vmatmul.f32.vlgmr.msra.gmra.mxu2 %v5089_v41  ;;  %5246 = vmatmul.f32.vlgmr.msrb.gmra.mxu3 %v5085_v48 }
0x1392   :  { %5161 = vmatmul.f32.vlgmr.msrb.gmra.mxu0 %v5086_v33 }
0x1397   :  { %5221 = vmatmul.f32.vlgmr.msrb.gmra.mxu2 %v5085_v48 }
0x13f7   :  { %v4942_v11 = vpop.f32.mrf.mxu1 }
0x13ff   :  { %v4901_v49 = vpop.f32.mrf.mxu0  ;;  %v4972_v28 = vpop.f32.mrf.mxu2 }
0x1400   :  { %v4943_v25 = vadd.f32 %v4942_v11, %v4901_v49  ;;  %v5057_v12 = vpop.f32.mrf.mxu1 }
0x1401   :  { %v4999_v7 = vpop.f32.mrf.mxu3 }
0x1402   :  { %v4973_v6 = vadd.f32 %v4972_v28, %v4943_v25 }
0x1404   :  { %v5000_v10 = vadd.f32 %v4999_v7, %v4973_v6 }
0x1407   :  { %v5032_v34 = vpop.f32.mrf.mxu0 }
0x1408   :  { %v5033_v24 = vadd.f32 %v5032_v34, %v5000_v10  ;;  %v5189_v20 = vpop.f32.mrf.mxu1 }
0x140a   :  { %v5058_v13 = vadd.f32 %v5057_v12, %v5033_v24  ;;  %v5132_v63 = vpop.f32.mrf.mxu3 }
0x140f   :  { %v5162_v17 = vpop.f32.mrf.mxu0 }
0x1412   :  { %v5091_v14 = vpop.f32.mrf.mxu2  ;;  %v5247_v30 = vpop.f32.mrf.mxu3 }
0x1413   :  { %v5092_v29 = vadd.f32 %v5091_v14, %v5058_v13 }
0x1415   :  { %v5133_v16 = vadd.f32 %v5132_v63, %v5092_v29 }
0x1417   :  { %v5163_v18 = vadd.f32 %v5162_v17, %v5133_v16 }
0x1419   :  { %v5190_v21 = vadd.f32 %v5189_v20, %v5163_v18 }
0x141a   :  { %v5222_v26 = vpop.f32.mrf.mxu2 }
0x141b   :  { %v5223_v27 = vadd.f32 %v5222_v26, %v5190_v21 }
0x141d   :  { %v5248_v32 = vadd.f32 %v5247_v30, %v5223_v27 }
0x141f   :  { %v5250_v19 = vadd.f32 %v6594_v31, %v5248_v32 }
0x1421   :  { %5506 = vtanh.f32 %v5250_v19  ;;  %v5370_v56 = vmul.f32 -1.442695, %v5250_v19 }
0x1423   :  { %5508 = vpow2.f32 %v5370_v56 }
0x1427   :  { %v5507_v35 = vpop.eup %5506 }
0x1428   :  { %5273 = vrot.lane.b32.xlu2 %v5507_v35, %s5631_s26 }
0x1429   :  { %v5509_v57 = vpop.eup %5508 }
0x142a   :  { %v5254_v62 = vadd.f32 1.0, %v5509_v57 }
0x142c   :  { %5510 = vrcp.f32 %v5254_v62  ;;  %v5266_v4 = vand.u32 2147483648, %v5254_v62  ;;  %vm5260_vm2 = vweird.f32 %v5254_v62  ;;  %v5264_v44 = vand.u32 2147483647, %v5254_v62 }
0x142e   :  { %v5267_v40 = vor.u32 1.1754944e-38, %v5266_v4  ;;  %vm5265_vm4 = vcmp.eq.f32.partialorder %v5264_v44, 8.507059e+37 }
0x1430   :  { %5311 = vrot.lane.b32.xlu2 %v5384_v36, %s5632_s27 }
0x1432   :  { %v5511_v31 = vpop.eup %5510 }
0x1433   :  { %v5256_v2 = vmul.f32 %v5511_v31, %v5254_v62  ;;  %vm5261_vm1 = vweird.f32 %v5511_v31 }
0x1434   :  { %vm5262_vm3 = vmor %vm5260_vm2, %vm5261_vm1 }
0x1435   :  { %v5257_v1 = vsub.f32 1.0, %v5256_v2 }
0x1437   :  { %v5258_v54 = vmul.f32 %v5511_v31, %v5257_v1 }
0x1438   :  { %5291 = vrot.lane.b32.xlu2 %v6608_v43, %s5633_s16 }
0x1439   :  { %v5259_v52 = vadd.f32 %v5511_v31, %v5258_v54 }
0x143b   :  { %v5263_v58 = vsel %vm5262_vm3, %v5511_v31, %v5259_v52 }
0x143c   :  { %v5268_v51 = vsel %vm5265_vm4, %v5267_v40, %v5263_v58 }
0x143d   :  { %v5271_v43 = vmul.f32 %v5268_v51, %v6603_v3 }
0x1482   :  { %v5274_v23 = vpop.permute.xlu2 %5273 }
0x1483   :  { %v5276_v60 = vmul.f32 %v5274_v23, %v5268_v51 }
0x1485   :  { %5278 = vrot.lane.b32.xlu0 %v5276_v60, %s5631_s26 }
0x148a   :  { %v5312_v46 = vpop.permute.xlu2 %5311 }
0x1492   :  { %v5292_v8 = vpop.permute.xlu2 %5291 }
0x1493   :  { %5294 = vst.msk [vmem:[#allocation3] sm:$0xff] %vm98_vm0, %v5292_v8 }
0x14f7   :  { %v5279_v53 = vpop.permute.xlu0 %5278 }
0x14f8   :  { %v5281_v9 = vadd.f32 %v5279_v53, %v5271_v43 }
0x14fa   :  { %5512 = vtanh.f32 %v5281_v9  ;;  %5301 = vrot.lane.b32.xlu2 %v5281_v9, %s5633_s16 }
0x1500   :  { %v5513_v37 = vpop.eup %5512 }
0x1501   :  { %5284 = vrot.lane.b32.xlu1 %v5513_v37, %s5631_s26 }
0x1554   :  { %v5302_v38 = vpop.permute.xlu2 %5301 }
0x1555   :  { %5304 = vst.msk [vmem:[#allocation5] sm:$0xff] %vm98_vm0, %v5302_v38 }
0x1573   :  { %v5285_v45 = vpop.permute.xlu1 %5284 }
0x1574   :  { %v5287_v61 = vmul.f32 %v5285_v45, %v5268_v51 }
0x1576   :  { %v5314_v15 = vmul.f32 %v5312_v46, %v5287_v61 }
0x1578   :  { %5316 = vrot.lane.b32.xlu0 %v5314_v15, %s5632_s27 }
0x1580   :  { %5296 = vrot.lane.b32.xlu0 %v5287_v61, %s5632_s27 }
0x15ea   :  { %v5317_v22 = vpop.permute.xlu0 %5316 }
0x15eb   :  { %v5319_v3 = vsel %vm98_vm0, %v5317_v22, 0.0 }
0x15ec   :  { %5320 = vadd.xlane.f32.xlu1 %v5319_v3 }
0x15f2   :  { %v5297_v0 = vpop.permute.xlu0 %5296 }
0x15f3   :  { %5299 = vst.msk [vmem:[#allocation4] sm:$0xff] %vm98_vm0, %v5297_v0 }
0x165f   :  { %v5321_v39 = vpop.xlane.xlu1 %5320 }
0x1660   :  { %v5326_v50 = vadd.f32 %v5385_v47, %v5321_v39 }
0x1662   :  { %v5371_v59 = vmul.f32 -1.442695, %v5326_v50 }
0x1664   :  { %5514 = vpow2.f32 %v5371_v59 }
0x166a   :  { %v5515_v5 = vpop.eup %5514 }
0x166b   :  { %v5330_v48 = vadd.f32 1.0, %v5515_v5 }
0x166d   :  { %5516 = vrcp.f32 %v5330_v48  ;;  %v5342_v41 = vand.u32 2147483648, %v5330_v48  ;;  %v5340_v11 = vand.u32 2147483647, %v5330_v48  ;;  %vm5336_vm6 = vweird.f32 %v5330_v48 }
0x166f   :  { %v5343_v28 = vor.u32 1.1754944e-38, %v5342_v41  ;;  %vm5341_vm0 = vcmp.eq.f32.partialorder %v5340_v11, 8.507059e+37 }
0x1673   :  { %v5517_v33 = vpop.eup %5516 }
0x1674   :  { %v5332_v42 = vmul.f32 %v5517_v33, %v5330_v48  ;;  %vm5337_vm5 = vweird.f32 %v5517_v33 }
0x1675   :  { %vm5338_vm8 = vmor %vm5336_vm6, %vm5337_vm5 }
0x1676   :  { %v5333_v55 = vsub.f32 1.0, %v5332_v42 }
0x1678   :  { %v5334_v49 = vmul.f32 %v5517_v33, %v5333_v55 }
0x167a   :  { %v5335_v25 = vadd.f32 %v5517_v33, %v5334_v49 }
0x167c   :  { %v5339_v6 = vsel %vm5338_vm8, %v5517_v33, %v5335_v25 }
0x167d   :  { %v5344_v7 = vsel %vm5341_vm0, %v5343_v28, %v5339_v6 }
0x167e   :  { %5347 = vst.msk [vmem:[%s6662_s8] sm:$0xff] %vm5346_vm7, %v5344_v7 }
0x167f   :  { %5352 = vsyncpa [#allocation8], 1 }
0x1680   :  { %5353 = vsyncpa [#allocation10], 1 }
0x1681   :  { %5354 = vsyncpa [#allocation13], 1 }

</bundles_post_ra>
